<compile_context>
chip_gen: v6e
topology: v6e:2x2x1
jax: 0.10.0
libtpu: 0.0.40
codegen_flags: <defaults>
</compile_context>

<pallas_src>
import functools

import jax
import jax.numpy as jnp
from jax import lax
from jax.experimental import pallas as pl
from jax.experimental.pallas import tpu as pltpu

_SUBLANE = 8
_LANE = 128


# ---------------------------------------------------------------------------
# helpers
# ---------------------------------------------------------------------------
def _round_up(n, m):
    return ((n + m - 1) // m) * m


def _vmem_cap_bytes():
    try:
        info = pltpu.get_tpu_info()
        cap = getattr(info, "vmem_capacity_bytes", None)
        if cap:
            return int(cap)
    except Exception:
        pass
    return 128 << 20  # v5e/v6e default


def _vmem_limit_bytes(resident_bytes):
    cap = _vmem_cap_bytes()
    ceiling = int(cap * 13 // 16)          # leave headroom for compiler internals
    need = int(resident_bytes) + (8 << 20)
    return int(min(max(need, 24 << 20), ceiling))


def _default_tm_max():
    # 512-row tiles on 128 MiB-VMEM parts (v5e/v6e), 256 on v7x (64 MiB).
    return 512 if _vmem_cap_bytes() >= (96 << 20) else 256


def _row_tile(M, tm_max):
    tm = min(max(tm_max, _SUBLANE), _round_up(M, _SUBLANE))
    return max(tm - tm % _SUBLANE, _SUBLANE)


def _hidden_tile(hidden, tk_max=512):
    # largest multiple of 128 <= tk_max that divides `hidden`; else no tiling
    if hidden <= max(tk_max, _LANE):
        return hidden
    for tk in range(tk_max - tk_max % _LANE, 0, -_LANE):
        if hidden % tk == 0:
            return tk
    return hidden


# ---------------------------------------------------------------------------
# Attention block:  out = x + Wo @ softmax(q k^T * scale) v   (all heads)
# ---------------------------------------------------------------------------
def _attn_body(x_ref, g_ref, b_ref, wqkv_ref, wo_ref, bo_ref, o_ref, oall_ref,
               *, eps, scale, heads, dim_head, s_real, compute_dtype, project_out):
    cd = compute_dtype
    S = x_ref.shape[0]
    inner = heads * dim_head

    x = x_ref[...].astype(jnp.float32)                 # (S, dim)
    gamma = g_ref[...].astype(jnp.float32)             # (1, dim)
    beta = b_ref[...].astype(jnp.float32)

    # ---- LayerNorm (f32, VPU) ----
    mean = jnp.mean(x, axis=-1, keepdims=True)
    xc = x - mean
    var = jnp.mean(xc * xc, axis=-1, keepdims=True)
    xn = (xc * lax.rsqrt(var + eps) * gamma + beta).astype(cd)

    # ---- fused QKV: one (S, dim) @ (dim, 3*inner) MXU pass, output in cd ----
    qkv = jnp.dot(xn, wqkv_ref[...], preferred_element_type=cd)

    # padded keys (>= s_real) get a -inf additive bias before softmax
    if s_real < S:
        key_ids = lax.broadcasted_iota(jnp.int32, (1, S), 1)
        key_bias = jnp.where(key_ids < s_real, 0.0, -1e30).astype(jnp.float32)
    else:
        key_bias = None

    # Static loop over heads; each head's output goes straight to the
    # (S, inner) VMEM scratch so only one head's scores/probs stay live.
    for h in range(heads):
        lo = h * dim_head
        q = qkv[:, lo:lo + dim_head]
        k = qkv[:, inner + lo:inner + lo + dim_head]
        v = qkv[:, 2 * inner + lo:2 * inner + lo + dim_head]

        # dots = q @ k^T * scale   (contract last dims, no explicit transpose)
        dots = lax.dot_general(q, k, (((1,), (1,)), ((), ())),
                               preferred_element_type=jnp.float32) * scale
        if key_bias is not None:
            dots = dots + key_bias

        # softmax in f32; 1/l via EUP reciprocal + one Newton step, folded
        # into the (S, dh) head output instead of the (S, S) prob matrix.
        dots = dots - jnp.max(dots, axis=-1, keepdims=True)
        p = jnp.exp(dots)
        l = jnp.sum(p, axis=-1, keepdims=True)
        inv = pl.reciprocal(l, approx=True)
        inv = inv * (2.0 - l * inv)
        # Dropout(p=0.0) on attn is identity at inference.

        o_h = jnp.dot(p.astype(cd), v, preferred_element_type=jnp.float32) * inv
        oall_ref[:, lo:lo + dim_head] = o_h.astype(cd)

    if project_out:
        # single (S, inner) @ (inner, dim) output projection
        y = jnp.dot(oall_ref[...], wo_ref[...], preferred_element_type=jnp.float32)
        y = y + bo_ref[...].astype(jnp.float32)
    else:
        y = oall_ref[...].astype(jnp.float32)          # to_out == nn.Identity()

    o_ref[...] = (x + y).astype(o_ref.dtype)           # fused residual add


def _make_attn_kernel(**kw):
    if kw["project_out"]:
        def kernel(x_ref, g_ref, b_ref, wqkv_ref, wo_ref, bo_ref, o_ref, oall_ref):
            _attn_body(x_ref, g_ref, b_ref, wqkv_ref, wo_ref, bo_ref,
                       o_ref, oall_ref, **kw)
    else:
        def kernel(x_ref, g_ref, b_ref, wqkv_ref, o_ref, oall_ref):
            _attn_body(x_ref, g_ref, b_ref, wqkv_ref, None, None,
                       o_ref, oall_ref, **kw)
    return kernel


def attention_block(x, p, *, s_real, eps=1e-5, compute_dtype=jnp.bfloat16):
    B, S_in, dim = x.shape
    heads, dh = p["heads"], p["dim_head"]
    inner = heads * dh
    project_out = p["project_out"]
    cd = compute_dtype
    cds = jnp.dtype(cd).itemsize

    # lane-dense (multiple of 128) sequence for the (S, S) score/prob tiles;
    # padded keys are masked in-kernel, padded query rows are sliced off.
    S_lane = _round_up(S_in, _LANE)
    xk = x if S_lane == S_in else jnp.pad(x, ((0, 0), (0, S_lane - S_in), (0, 0)))

    kernel = _make_attn_kernel(eps=eps, scale=float(dh) ** -0.5, heads=heads,
                               dim_head=dh, s_real=s_real, compute_dtype=cd,
                               project_out=project_out)

    in_specs = [
        pl.BlockSpec((None, S_lane, dim), lambda b: (b, 0, 0)),   # x
        pl.BlockSpec((1, dim), lambda b: (0, 0)),                 # LN gamma
        pl.BlockSpec((1, dim), lambda b: (0, 0)),                 # LN beta
        pl.BlockSpec((dim, 3 * inner), lambda b: (0, 0)),         # fused W_qkv
    ]
    args = [xk, p["ln_g"], p["ln_b"], p["wqkv"]]
    if project_out:
        in_specs += [pl.BlockSpec((inner, dim), lambda b: (0, 0)),  # W_o
                     pl.BlockSpec((1, dim), lambda b: (0, 0))]      # b_o
        args += [p["wo"], p["bo"]]

    wbytes = (dim * 3 * inner + (inner * dim if project_out else 0)) * cds
    resident = (2 * wbytes                      # weights, double-buffered
                + 4 * S_lane * dim * 4          # x in + out blocks
                + S_lane * inner * cds          # o_all scratch
                + S_lane * 3 * inner * cds      # fused qkv tile
                + 2 * S_lane * dim * 4          # x / xn f32 temporaries
                + 3 * S_lane * S_lane * 4       # per-head scores/probs live set
                + 4 * S_lane * dh * 4)

    out = pl.pallas_call(
        kernel,
        out_shape=jax.ShapeDtypeStruct((B, S_lane, dim), x.dtype),
        grid_spec=pltpu.PrefetchScalarGridSpec(
            num_scalar_prefetch=0,
            grid=(B,),
            in_specs=in_specs,
            out_specs=pl.BlockSpec((None, S_lane, dim), lambda b: (b, 0, 0)),
            scratch_shapes=[pltpu.VMEM((S_lane, inner), cd)],
        ),
        compiler_params=pltpu.CompilerParams(
            dimension_semantics=("parallel",),
            vmem_limit_bytes=_vmem_limit_bytes(resident)),
    )(*args)
    return out if S_lane == S_in else out[:, :S_in]


# ---------------------------------------------------------------------------
# FeedForward block:  out = x + W2 @ GELU(W1 @ LN(x) + b1) + b2
# hidden axis is a reduction grid axis; optional fused final LayerNorm.
# ---------------------------------------------------------------------------
def _ffn_body(x_ref, g_ref, b_ref, w1_ref, b1_ref, w2_ref, b2_ref, g2_ref,
              b2f_ref, o_ref, xn_ref, acc_ref, *, eps, compute_dtype, final_ln):
    cd = compute_dtype
    k = pl.program_id(1)

    @pl.when(k == 0)
    def _init():
        x = x_ref[...].astype(jnp.float32)
        gamma = g_ref[...].astype(jnp.float32)
        beta = b_ref[...].astype(jnp.float32)
        mean = jnp.mean(x, axis=-1, keepdims=True)
        xc = x - mean
        var = jnp.mean(xc * xc, axis=-1, keepdims=True)
        xn_ref[...] = (xc * lax.rsqrt(var + eps) * gamma + beta).astype(cd)
        acc_ref[...] = jnp.zeros_like(acc_ref)

    # hidden tile:  h_k = GELU(xn @ W1[:, k] + b1[k]) ;  acc += h_k @ W2[k, :]
    h = jnp.dot(xn_ref[...], w1_ref[...], preferred_element_type=jnp.float32)
    h = h + b1_ref[...].astype(jnp.float32)
    h = 0.5 * h * (1.0 + lax.erf(h * 0.7071067811865476))   # exact-erf GELU
    # Dropout(p=0.0) is identity at inference.
    acc_ref[...] += jnp.dot(h.astype(cd), w2_ref[...],
                            preferred_element_type=jnp.float32)

    @pl.when(k == pl.num_programs(1) - 1)
    def _finalize():
        y = x_ref[...].astype(jnp.float32) + acc_ref[...] \
            + b2_ref[...].astype(jnp.float32)                # fused residual
        if final_ln:                                         # fused final LN
            g2 = g2_ref[...].astype(jnp.float32)
            b2f = b2f_ref[...].astype(jnp.float32)
            m = jnp.mean(y, axis=-1, keepdims=True)
            yc = y - m
            v = jnp.mean(yc * yc, axis=-1, keepdims=True)
            y = yc * lax.rsqrt(v + eps) * g2 + b2f
        o_ref[...] = y.astype(o_ref.dtype)


def _make_ffn_kernel(**kw):
    if kw["final_ln"]:
        def kernel(x_ref, g_ref, b_ref, w1_ref, b1_ref, w2_ref, b2_ref,
                   g2_ref, b2f_ref, o_ref, xn_ref, acc_ref):
            _ffn_body(x_ref, g_ref, b_ref, w1_ref, b1_ref, w2_ref, b2_ref,
                      g2_ref, b2f_ref, o_ref, xn_ref, acc_ref, **kw)
    else:
        def kernel(x_ref, g_ref, b_ref, w1_ref, b1_ref, w2_ref, b2_ref,
                   o_ref, xn_ref, acc_ref):
            _ffn_body(x_ref, g_ref, b_ref, w1_ref, b1_ref, w2_ref, b2_ref,
                      None, None, o_ref, xn_ref, acc_ref, **kw)
    return kernel


def feedforward_block(x, p, *, eps=1e-5, compute_dtype=jnp.bfloat16,
                      tm_max=None, tk_max=512, final_ln=None):
    B, S, dim = x.shape
    hidden = p["w1"].shape[1]
    cd = compute_dtype
    cds = jnp.dtype(cd).itemsize

    if tm_max is None:
        tm_max = _default_tm_max()
    M = B * S                       # S already sublane-aligned by the caller
    tm = _row_tile(M, tm_max)
    tk = _hidden_tile(hidden, tk_max)
    x2d = x.reshape(M, dim)         # metadata-only reshape, no copy

    kernel = _make_ffn_kernel(eps=eps, compute_dtype=cd,
                              final_ln=final_ln is not None)

    in_specs = [
        pl.BlockSpec((tm, dim), lambda i, k: (i, 0)),     # x rows (resident over k)
        pl.BlockSpec((1, dim), lambda i, k: (0, 0)),      # LN gamma
        pl.BlockSpec((1, dim), lambda i, k: (0, 0)),      # LN beta
        pl.BlockSpec((dim, tk), lambda i, k: (0, k)),     # W1 hidden slice
        pl.BlockSpec((1, tk), lambda i, k: (0, k)),       # b1 slice
        pl.BlockSpec((tk, dim), lambda i, k: (k, 0)),     # W2 hidden slice
        pl.BlockSpec((1, dim), lambda i, k: (0, 0)),      # b2
    ]
    args = [x2d, p["ln_g"], p["ln_b"], p["w1"], p["b1"], p["w2"], p["b2"]]
    if final_ln is not None:
        in_specs += [pl.BlockSpec((1, dim), lambda i, k: (0, 0)),
                     pl.BlockSpec((1, dim), lambda i, k: (0, 0))]
        args += [final_ln[0], final_ln[1]]

    resident = (4 * dim * tk * cds        # W1/W2 slices, double-buffered
                + 4 * tm * dim * 4        # x in + out, double-buffered
                + tm * dim * (cds + 4)    # xn + acc scratches
                + 3 * tm * tk * 4         # h tile (+ cast slack)
                + 8 * (dim + tk) * 4)

    out = pl.pallas_call(
        kernel,
        out_shape=jax.ShapeDtypeStruct((M, dim), x.dtype),
        grid_spec=pltpu.PrefetchScalarGridSpec(
            num_scalar_prefetch=0,
            grid=(pl.cdiv(M, tm), hidden // tk),
            in_specs=in_specs,
            out_specs=pl.BlockSpec((tm, dim), lambda i, k: (i, 0)),
            scratch_shapes=[pltpu.VMEM((tm, dim), cd),
                            pltpu.VMEM((tm, dim), jnp.float32)],
        ),
        compiler_params=pltpu.CompilerParams(
            dimension_semantics=("parallel", "arbitrary"),
            vmem_limit_bytes=_vmem_limit_bytes(resident)),
    )(*args)
    return out.reshape(B, S, dim)


# ---------------------------------------------------------------------------
# Standalone LayerNorm (only used when depth == 0; otherwise fused into FFN)
# ---------------------------------------------------------------------------
def _ln_kernel(x_ref, g_ref, b_ref, o_ref, *, eps):
    x = x_ref[...].astype(jnp.float32)
    gamma = g_ref[...].astype(jnp.float32)
    beta = b_ref[...].astype(jnp.float32)
    mean = jnp.mean(x, axis=-1, keepdims=True)
    xc = x - mean
    var = jnp.mean(xc * xc, axis=-1, keepdims=True)
    o_ref[...] = (xc * lax.rsqrt(var + eps) * gamma + beta).astype(o_ref.dtype)


def layernorm(x, gamma, beta, *, eps=1e-5, tm_max=None):
    B, S, dim = x.shape
    if tm_max is None:
        tm_max = _default_tm_max()
    M = B * S
    tm = _row_tile(M, tm_max)
    x2d = x.reshape(M, dim)
    out = pl.pallas_call(
        functools.partial(_ln_kernel, eps=eps),
        out_shape=jax.ShapeDtypeStruct((M, dim), x.dtype),
        grid_spec=pltpu.PrefetchScalarGridSpec(
            num_scalar_prefetch=0,
            grid=(pl.cdiv(M, tm),),
            in_specs=[pl.BlockSpec((tm, dim), lambda i: (i, 0)),
                      pl.BlockSpec((1, dim), lambda i: (0, 0)),
                      pl.BlockSpec((1, dim), lambda i: (0, 0))],
            out_specs=pl.BlockSpec((tm, dim), lambda i: (i, 0)),
        ),
        compiler_params=pltpu.CompilerParams(dimension_semantics=("parallel",)),
    )(x2d, gamma, beta)
    return out.reshape(B, S, dim)


# ---------------------------------------------------------------------------
# parameter preparation (ONE cast/pack per forward pass, outside layer loop)
# ---------------------------------------------------------------------------
def _prepare_params(params, compute_dtype):
    cd = compute_dtype
    heads, dim_head = params["heads"], params["dim_head"]
    prep_layers = []
    for layer in params["layers"]:
        a, f = layer["attn"], layer["ff"]
        pa = dict(
            ln_g=a["ln_g"].reshape(1, -1).astype(jnp.float32),
            ln_b=a["ln_b"].reshape(1, -1).astype(jnp.float32),
            wqkv=a["w_qkv"].astype(cd),
            heads=heads, dim_head=dim_head,
            project_out=("wo" in a),
        )
        if "wo" in a:
            pa["wo"] = a["wo"].astype(cd)
            pa["bo"] = a["bo"].reshape(1, -1).astype(jnp.float32)
        pf = dict(
            ln_g=f["ln_g"].reshape(1, -1).astype(jnp.float32),
            ln_b=f["ln_b"].reshape(1, -1).astype(jnp.float32),
            w1=f["w1"].astype(cd), b1=f["b1"].reshape(1, -1).astype(jnp.float32),
            w2=f["w2"].astype(cd), b2=f["b2"].reshape(1, -1).astype(jnp.float32),
        )
        prep_layers.append(dict(attn=pa, ff=pf))
    return dict(layers=prep_layers,
                norm_g=params["norm_g"].reshape(1, -1).astype(jnp.float32),
                norm_b=params["norm_b"].reshape(1, -1).astype(jnp.float32))


# ---------------------------------------------------------------------------
# Transformer forward
# ---------------------------------------------------------------------------
def transformer_forward(x, params, *, eps=1e-5, compute_dtype=jnp.bfloat16,
                        tm_max=None, tk_max=512):
    B, S, dim = x.shape
    prep = _prepare_params(params, compute_dtype)      # hoisted weight casts

    # token axis padded ONCE to a sublane multiple, kept padded across layers
    S_sub = _round_up(S, _SUBLANE)
    if S_sub != S:
        x = jnp.pad(x, ((0, 0), (0, S_sub - S), (0, 0)))

    layers = prep["layers"]
    n = len(layers)
    for li, layer in enumerate(layers):
        x = attention_block(x, layer["attn"], s_real=S, eps=eps,
                            compute_dtype=compute_dtype)
        final = (prep["norm_g"], prep["norm_b"]) if li == n - 1 else None
        x = feedforward_block(x, layer["ff"], eps=eps, compute_dtype=compute_dtype,
                              tm_max=tm_max, tk_max=tk_max, final_ln=final)
    if n == 0:  # depth == 0: the final LayerNorm still applies
        x = layernorm(x, prep["norm_g"], prep["norm_b"], eps=eps, tm_max=tm_max)
    return x[:, :S] if S_sub != S else x


# ---------------------------------------------------------------------------
# parameter init (matches the nn.Module layer structure / shapes)
# ---------------------------------------------------------------------------
def init_params(key, *, dim, depth, heads, dim_head, mlp_dim):
    inner = heads * dim_head
    project_out = not (heads == 1 and dim_head == dim)
    layers = []
    for _ in range(depth):
        key, *ks = jax.random.split(key, 13)
        attn = dict(
            ln_g=1.0 + 0.02 * jax.random.normal(ks[0], (dim,), jnp.float32),
            ln_b=0.02 * jax.random.normal(ks[1], (dim,), jnp.float32),
            # to_qkv (bias=False) in x @ W layout; columns ordered [Q | K | V],
            # heads packed (h d) inside each chunk (matches the torch rearrange).
            w_qkv=jax.random.normal(ks[2], (dim, 3 * inner), jnp.float32)
                  / jnp.sqrt(dim),
        )
        if project_out:
            attn["wo"] = jax.random.normal(ks[3], (inner, dim), jnp.float32) \
                         / jnp.sqrt(inner)
            attn["bo"] = 0.02 * jax.random.normal(ks[4], (dim,), jnp.float32)
        # else: to_out = nn.Identity() (heads == 1 and dim_head == dim)
        ff = dict(
            ln_g=1.0 + 0.02 * jax.random.normal(ks[5], (dim,), jnp.float32),
            ln_b=0.02 * jax.random.normal(ks[6], (dim,), jnp.float32),
            w1=jax.random.normal(ks[7], (dim, mlp_dim), jnp.float32) / jnp.sqrt(dim),
            b1=0.02 * jax.random.normal(ks[8], (mlp_dim,), jnp.float32),
            w2=jax.random.normal(ks[9], (mlp_dim, dim), jnp.float32)
               / jnp.sqrt(mlp_dim),
            b2=0.02 * jax.random.normal(ks[10], (dim,), jnp.float32),
        )
        layers.append(dict(attn=attn, ff=ff))
    key, kg, kb = jax.random.split(key, 3)
    return dict(layers=layers, heads=heads, dim_head=dim_head,
                norm_g=1.0 + 0.02 * jax.random.normal(kg, (dim,), jnp.float32),
                norm_b=0.02 * jax.random.normal(kb, (dim,), jnp.float32))


# ---------------------------------------------------------------------------
# pure-JAX reference (mirrors the PyTorch module in f32)
# ---------------------------------------------------------------------------
def _reference(x, params, eps=1e-5):
    heads, dh = params["heads"], params["dim_head"]

    def ln(t, g, b):
        m = jnp.mean(t, -1, keepdims=True)
        v = jnp.mean((t - m) ** 2, -1, keepdims=True)
        return (t - m) / jnp.sqrt(v + eps) * g + b

    x = x.astype(jnp.float32)
    B, S, dim = x.shape
    inner = heads * dh
    for layer in params["layers"]:
        a = layer["attn"]
        xn = ln(x, a["ln_g"], a["ln_b"])
        qkv = xn @ a["w_qkv"]
        q, k, v = jnp.split(qkv, 3, axis=-1)

        def split_heads(t):
            return t.reshape(B, S, heads, dh).transpose(0, 2, 1, 3)

        q, k, v = map(split_heads, (q, k, v))
        dots = jnp.einsum("bhqe,bhke->bhqk", q, k) * (dh ** -0.5)
        p = jax.nn.softmax(dots, axis=-1)
        o = jnp.einsum("bhqk,bhke->bhqe", p, v)
        o = o.transpose(0, 2, 1, 3).reshape(B, S, inner)
        if "wo" in a:
            o = o @ a["wo"] + a["bo"]
        x = x + o

        f = layer["ff"]
        xn = ln(x, f["ln_g"], f["ln_b"])
        h = xn @ f["w1"] + f["b1"]
        h = 0.5 * h * (1.0 + lax.erf(h / jnp.sqrt(2.0)))
        x = x + h @ f["w2"] + f["b2"]
    return ln(x, params["norm_g"], params["norm_b"])


if __name__ == "__main__":
    key = jax.random.PRNGKey(0)
    B, S = 2, 13                                   # S=13 exercises pad + key mask
    dim, depth, heads, dim_head, mlp_dim = 64, 2, 4, 16, 128

    pkey, xkey = jax.random.split(key)
    params = init_params(pkey, dim=dim, depth=depth, heads=heads,
                         dim_head=dim_head, mlp_dim=mlp_dim)
    x = jax.random.normal(xkey, (B, S, dim), dtype=jnp.float32)

    y_ref = _reference(x, params)

    # f32 MXU path: matches the PyTorch/f32 math tightly.
    y_f32 = jax.block_until_ready(
        transformer_forward(x, params, compute_dtype=jnp.float32))
    assert y_f32.shape == (B, S, dim)
    assert jnp.allclose(y_f32, y_ref, atol=2e-4, rtol=2e-4), "f32 mismatch"

    # bf16-operand MXU path (production default: bf16 in, f32 accumulate).
    y_bf16 = jax.block_until_ready(
        transformer_forward(x, params, compute_dtype=jnp.bfloat16))
    assert y_bf16.shape == (B, S, dim)
    assert jnp.allclose(y_bf16, y_ref, atol=1e-1, rtol=1e-1), "bf16 mismatch"

    print("KERNEL_OK")
</pallas_src>

<mosaic_0001>
module attributes {stable_mosaic.version = 11 : i64} {
  func.func @kernel(%arg0: i32, %arg1: memref<1x128x64xf32, #tpu.memory_space<vmem>>, %arg2: memref<1x64xf32, #tpu.memory_space<vmem>>, %arg3: memref<1x64xf32, #tpu.memory_space<vmem>>, %arg4: memref<64x192xf32, #tpu.memory_space<vmem>>, %arg5: memref<64x64xf32, #tpu.memory_space<vmem>>, %arg6: memref<1x64xf32, #tpu.memory_space<vmem>>, %arg7: memref<1x128x64xf32, #tpu.memory_space<vmem>>, %arg8: memref<128x64xf32, #tpu.memory_space<vmem>>) attributes {dimension_semantics = [#tpu.dimension_semantics<parallel>], iteration_bounds = array<i64: 2>, scalar_prefetch = 0 : i64, scratch_operands = 1 : i64, tpu.core_type = #tpu.core_type<tc>, window_params = [{transform_indices = @transform_0, window_bounds = array<i64: 1, 128, 64>}, {pipeline_mode = #tpu.pipeline_mode<synchronous>, transform_indices = @transform_1, window_bounds = array<i64: 1, 64>}, {pipeline_mode = #tpu.pipeline_mode<synchronous>, transform_indices = @transform_2, window_bounds = array<i64: 1, 64>}, {pipeline_mode = #tpu.pipeline_mode<synchronous>, transform_indices = @transform_3, window_bounds = array<i64: 64, 192>}, {pipeline_mode = #tpu.pipeline_mode<synchronous>, transform_indices = @transform_4, window_bounds = array<i64: 64, 64>}, {pipeline_mode = #tpu.pipeline_mode<synchronous>, transform_indices = @transform_5, window_bounds = array<i64: 1, 64>}, {transform_indices = @transform_6, window_bounds = array<i64: 1, 128, 64>}]} {
    %c0 = arith.constant 0 : index
    %c0_0 = arith.constant 0 : index
    %c0_1 = arith.constant 0 : index
    %0 = vector.load %arg1[%c0, %c0_0, %c0_1] : memref<1x128x64xf32, #tpu.memory_space<vmem>>, vector<1x128x64xf32>
    %1 = vector.shape_cast %0 : vector<1x128x64xf32> to vector<128x64xf32>
    %c0_2 = arith.constant 0 : index
    %c0_3 = arith.constant 0 : index
    %2 = vector.load %arg2[%c0_2, %c0_3] : memref<1x64xf32, #tpu.memory_space<vmem>>, vector<1x64xf32>
    %c0_4 = arith.constant 0 : index
    %c0_5 = arith.constant 0 : index
    %3 = vector.load %arg3[%c0_4, %c0_5] : memref<1x64xf32, #tpu.memory_space<vmem>>, vector<1x64xf32>
    %cst = arith.constant dense<0.000000e+00> : vector<128xf32>
    %4 = vector.multi_reduction <add>, %1, %cst [1] : vector<128x64xf32> to vector<128xf32>
    %5 = vector.shape_cast %4 : vector<128xf32> to vector<128x1xf32>
    %cst_6 = arith.constant 6.400000e+01 : f32
    %6 = vector.broadcast %cst_6 : f32 to vector<128x1xf32>
    %7 = arith.divf %5, %6 : vector<128x1xf32>
    %8 = vector.broadcast %7 : vector<128x1xf32> to vector<128x64xf32>
    %9 = arith.subf %1, %8 : vector<128x64xf32>
    %10 = arith.mulf %9, %9 : vector<128x64xf32>
    %cst_7 = arith.constant dense<0.000000e+00> : vector<128xf32>
    %11 = vector.multi_reduction <add>, %10, %cst_7 [1] : vector<128x64xf32> to vector<128xf32>
    %12 = vector.shape_cast %11 : vector<128xf32> to vector<128x1xf32>
    %cst_8 = arith.constant 6.400000e+01 : f32
    %13 = vector.broadcast %cst_8 : f32 to vector<128x1xf32>
    %14 = arith.divf %12, %13 : vector<128x1xf32>
    %cst_9 = arith.constant 9.99999974E-6 : f32
    %15 = vector.broadcast %cst_9 : f32 to vector<128x1xf32>
    %16 = arith.addf %14, %15 : vector<128x1xf32>
    %17 = math.rsqrt %16 : vector<128x1xf32>
    %18 = vector.broadcast %17 : vector<128x1xf32> to vector<128x64xf32>
    %19 = arith.mulf %9, %18 : vector<128x64xf32>
    %20 = vector.broadcast %2 : vector<1x64xf32> to vector<128x64xf32>
    %21 = arith.mulf %19, %20 : vector<128x64xf32>
    %22 = vector.broadcast %3 : vector<1x64xf32> to vector<128x64xf32>
    %23 = arith.addf %21, %22 : vector<128x64xf32>
    %c0_10 = arith.constant 0 : index
    %c0_11 = arith.constant 0 : index
    %24 = vector.load %arg4[%c0_10, %c0_11] : memref<64x192xf32, #tpu.memory_space<vmem>>, vector<64x192xf32>
    %cst_12 = arith.constant dense<0.000000e+00> : vector<128x192xf32>
    %25 = tpu.matmul %23, %24, %cst_12 {dimension_numbers = #tpu.dot_dimension_numbers<[1], [0], [0], [1], [0, 0, 1, 1], [], []>} : vector<128x64xf32>, vector<64x192xf32>, vector<128x192xf32> -> vector<128x192xf32>
    %26 = tpu.iota {dimensions = array<i32: 1>} : vector<1x128xi32>
    %c13_i32 = arith.constant 13 : i32
    %27 = vector.broadcast %c13_i32 : i32 to vector<1x128xi32>
    %28 = arith.cmpi slt, %26, %27 : vector<1x128xi32>
    %cst_13 = arith.constant 0.000000e+00 : f32
    %cst_14 = arith.constant -1.000000e+30 : f32
    %29 = vector.broadcast %cst_13 : f32 to vector<1x128xf32>
    %30 = vector.broadcast %cst_14 : f32 to vector<1x128xf32>
    %31 = arith.select %28, %29, %30 : vector<1x128xi1>, vector<1x128xf32>
    %32 = vector.extract_strided_slice %25 {offsets = [0, 0], sizes = [128, 16], strides = [1, 1]} : vector<128x192xf32> to vector<128x16xf32>
    %33 = vector.extract_strided_slice %25 {offsets = [0, 64], sizes = [128, 16], strides = [1, 1]} : vector<128x192xf32> to vector<128x16xf32>
    %34 = vector.extract_strided_slice %25 {offsets = [0, 128], sizes = [128, 16], strides = [1, 1]} : vector<128x192xf32> to vector<128x16xf32>
    %cst_15 = arith.constant dense<0.000000e+00> : vector<128x128xf32>
    %35 = tpu.matmul %32, %33, %cst_15 {dimension_numbers = #tpu.dot_dimension_numbers<[1], [1], [0], [0], [0, 0, 1, 0], [], []>} : vector<128x16xf32>, vector<128x16xf32>, vector<128x128xf32> -> vector<128x128xf32>
    %cst_16 = arith.constant 2.500000e-01 : f32
    %36 = vector.broadcast %cst_16 : f32 to vector<128x128xf32>
    %37 = arith.mulf %35, %36 : vector<128x128xf32>
    %38 = vector.broadcast %31 : vector<1x128xf32> to vector<128x128xf32>
    %39 = arith.addf %37, %38 : vector<128x128xf32>
    %cst_17 = arith.constant dense<0xFF800000> : vector<128xf32>
    %40 = vector.multi_reduction <maximumf>, %39, %cst_17 [1] : vector<128x128xf32> to vector<128xf32>
    %41 = vector.shape_cast %40 : vector<128xf32> to vector<128x1xf32>
    %42 = vector.broadcast %41 : vector<128x1xf32> to vector<128x128xf32>
    %43 = arith.subf %39, %42 : vector<128x128xf32>
    %44 = math.exp %43 : vector<128x128xf32>
    %cst_18 = arith.constant dense<0.000000e+00> : vector<128xf32>
    %45 = vector.multi_reduction <add>, %44, %cst_18 [1] : vector<128x128xf32> to vector<128xf32>
    %46 = vector.shape_cast %45 : vector<128xf32> to vector<128x1xf32>
    %47 = tpu.reciprocal %46 {approx = true} : vector<128x1xf32> -> vector<128x1xf32>
    %48 = arith.mulf %46, %47 : vector<128x1xf32>
    %cst_19 = arith.constant 2.000000e+00 : f32
    %49 = vector.broadcast %cst_19 : f32 to vector<128x1xf32>
    %50 = arith.subf %49, %48 : vector<128x1xf32>
    %51 = arith.mulf %47, %50 : vector<128x1xf32>
    %cst_20 = arith.constant dense<0.000000e+00> : vector<128x16xf32>
    %52 = tpu.matmul %44, %34, %cst_20 {dimension_numbers = #tpu.dot_dimension_numbers<[1], [0], [0], [1], [0, 0, 1, 1], [], []>} : vector<128x128xf32>, vector<128x16xf32>, vector<128x16xf32> -> vector<128x16xf32>
    %53 = vector.broadcast %51 : vector<128x1xf32> to vector<128x16xf32>
    %54 = arith.mulf %52, %53 : vector<128x16xf32>
    %c0_21 = arith.constant 0 : index
    %c0_22 = arith.constant 0 : index
    %55 = vector.load %arg8[%c0_21, %c0_22] : memref<128x64xf32, #tpu.memory_space<vmem>>, vector<128x16xf32>
    tpu.vector_store %arg8[%c0_21, %c0_22], %54 {strides = array<i32>} : memref<128x64xf32, #tpu.memory_space<vmem>>, vector<128x16xf32>,
    %56 = vector.extract_strided_slice %25 {offsets = [0, 16], sizes = [128, 16], strides = [1, 1]} : vector<128x192xf32> to vector<128x16xf32>
    %57 = vector.extract_strided_slice %25 {offsets = [0, 80], sizes = [128, 16], strides = [1, 1]} : vector<128x192xf32> to vector<128x16xf32>
    %58 = vector.extract_strided_slice %25 {offsets = [0, 144], sizes = [128, 16], strides = [1, 1]} : vector<128x192xf32> to vector<128x16xf32>
    %cst_23 = arith.constant dense<0.000000e+00> : vector<128x128xf32>
    %59 = tpu.matmul %56, %57, %cst_23 {dimension_numbers = #tpu.dot_dimension_numbers<[1], [1], [0], [0], [0, 0, 1, 0], [], []>} : vector<128x16xf32>, vector<128x16xf32>, vector<128x128xf32> -> vector<128x128xf32>
    %cst_24 = arith.constant 2.500000e-01 : f32
    %60 = vector.broadcast %cst_24 : f32 to vector<128x128xf32>
    %61 = arith.mulf %59, %60 : vector<128x128xf32>
    %62 = vector.broadcast %31 : vector<1x128xf32> to vector<128x128xf32>
    %63 = arith.addf %61, %62 : vector<128x128xf32>
    %cst_25 = arith.constant dense<0xFF800000> : vector<128xf32>
    %64 = vector.multi_reduction <maximumf>, %63, %cst_25 [1] : vector<128x128xf32> to vector<128xf32>
    %65 = vector.shape_cast %64 : vector<128xf32> to vector<128x1xf32>
    %66 = vector.broadcast %65 : vector<128x1xf32> to vector<128x128xf32>
    %67 = arith.subf %63, %66 : vector<128x128xf32>
    %68 = math.exp %67 : vector<128x128xf32>
    %cst_26 = arith.constant dense<0.000000e+00> : vector<128xf32>
    %69 = vector.multi_reduction <add>, %68, %cst_26 [1] : vector<128x128xf32> to vector<128xf32>
    %70 = vector.shape_cast %69 : vector<128xf32> to vector<128x1xf32>
    %71 = tpu.reciprocal %70 {approx = true} : vector<128x1xf32> -> vector<128x1xf32>
    %72 = arith.mulf %70, %71 : vector<128x1xf32>
    %cst_27 = arith.constant 2.000000e+00 : f32
    %73 = vector.broadcast %cst_27 : f32 to vector<128x1xf32>
    %74 = arith.subf %73, %72 : vector<128x1xf32>
    %75 = arith.mulf %71, %74 : vector<128x1xf32>
    %cst_28 = arith.constant dense<0.000000e+00> : vector<128x16xf32>
    %76 = tpu.matmul %68, %58, %cst_28 {dimension_numbers = #tpu.dot_dimension_numbers<[1], [0], [0], [1], [0, 0, 1, 1], [], []>} : vector<128x128xf32>, vector<128x16xf32>, vector<128x16xf32> -> vector<128x16xf32>
    %77 = vector.broadcast %75 : vector<128x1xf32> to vector<128x16xf32>
    %78 = arith.mulf %76, %77 : vector<128x16xf32>
    %c0_29 = arith.constant 0 : index
    %c16 = arith.constant 16 : index
    %79 = vector.load %arg8[%c0_29, %c16] : memref<128x64xf32, #tpu.memory_space<vmem>>, vector<128x16xf32>
    tpu.vector_store %arg8[%c0_29, %c16], %78 {strides = array<i32>} : memref<128x64xf32, #tpu.memory_space<vmem>>, vector<128x16xf32>,
    %80 = vector.extract_strided_slice %25 {offsets = [0, 32], sizes = [128, 16], strides = [1, 1]} : vector<128x192xf32> to vector<128x16xf32>
    %81 = vector.extract_strided_slice %25 {offsets = [0, 96], sizes = [128, 16], strides = [1, 1]} : vector<128x192xf32> to vector<128x16xf32>
    %82 = vector.extract_strided_slice %25 {offsets = [0, 160], sizes = [128, 16], strides = [1, 1]} : vector<128x192xf32> to vector<128x16xf32>
    %cst_30 = arith.constant dense<0.000000e+00> : vector<128x128xf32>
    %83 = tpu.matmul %80, %81, %cst_30 {dimension_numbers = #tpu.dot_dimension_numbers<[1], [1], [0], [0], [0, 0, 1, 0], [], []>} : vector<128x16xf32>, vector<128x16xf32>, vector<128x128xf32> -> vector<128x128xf32>
    %cst_31 = arith.constant 2.500000e-01 : f32
    %84 = vector.broadcast %cst_31 : f32 to vector<128x128xf32>
    %85 = arith.mulf %83, %84 : vector<128x128xf32>
    %86 = vector.broadcast %31 : vector<1x128xf32> to vector<128x128xf32>
    %87 = arith.addf %85, %86 : vector<128x128xf32>
    %cst_32 = arith.constant dense<0xFF800000> : vector<128xf32>
    %88 = vector.multi_reduction <maximumf>, %87, %cst_32 [1] : vector<128x128xf32> to vector<128xf32>
    %89 = vector.shape_cast %88 : vector<128xf32> to vector<128x1xf32>
    %90 = vector.broadcast %89 : vector<128x1xf32> to vector<128x128xf32>
    %91 = arith.subf %87, %90 : vector<128x128xf32>
    %92 = math.exp %91 : vector<128x128xf32>
    %cst_33 = arith.constant dense<0.000000e+00> : vector<128xf32>
    %93 = vector.multi_reduction <add>, %92, %cst_33 [1] : vector<128x128xf32> to vector<128xf32>
    %94 = vector.shape_cast %93 : vector<128xf32> to vector<128x1xf32>
    %95 = tpu.reciprocal %94 {approx = true} : vector<128x1xf32> -> vector<128x1xf32>
    %96 = arith.mulf %94, %95 : vector<128x1xf32>
    %cst_34 = arith.constant 2.000000e+00 : f32
    %97 = vector.broadcast %cst_34 : f32 to vector<128x1xf32>
    %98 = arith.subf %97, %96 : vector<128x1xf32>
    %99 = arith.mulf %95, %98 : vector<128x1xf32>
    %cst_35 = arith.constant dense<0.000000e+00> : vector<128x16xf32>
    %100 = tpu.matmul %92, %82, %cst_35 {dimension_numbers = #tpu.dot_dimension_numbers<[1], [0], [0], [1], [0, 0, 1, 1], [], []>} : vector<128x128xf32>, vector<128x16xf32>, vector<128x16xf32> -> vector<128x16xf32>
    %101 = vector.broadcast %99 : vector<128x1xf32> to vector<128x16xf32>
    %102 = arith.mulf %100, %101 : vector<128x16xf32>
    %c0_36 = arith.constant 0 : index
    %c32 = arith.constant 32 : index
    %103 = vector.load %arg8[%c0_36, %c32] : memref<128x64xf32, #tpu.memory_space<vmem>>, vector<128x16xf32>
    tpu.vector_store %arg8[%c0_36, %c32], %102 {strides = array<i32>} : memref<128x64xf32, #tpu.memory_space<vmem>>, vector<128x16xf32>,
    %104 = vector.extract_strided_slice %25 {offsets = [0, 48], sizes = [128, 16], strides = [1, 1]} : vector<128x192xf32> to vector<128x16xf32>
    %105 = vector.extract_strided_slice %25 {offsets = [0, 112], sizes = [128, 16], strides = [1, 1]} : vector<128x192xf32> to vector<128x16xf32>
    %106 = vector.extract_strided_slice %25 {offsets = [0, 176], sizes = [128, 16], strides = [1, 1]} : vector<128x192xf32> to vector<128x16xf32>
    %cst_37 = arith.constant dense<0.000000e+00> : vector<128x128xf32>
    %107 = tpu.matmul %104, %105, %cst_37 {dimension_numbers = #tpu.dot_dimension_numbers<[1], [1], [0], [0], [0, 0, 1, 0], [], []>} : vector<128x16xf32>, vector<128x16xf32>, vector<128x128xf32> -> vector<128x128xf32>
    %cst_38 = arith.constant 2.500000e-01 : f32
    %108 = vector.broadcast %cst_38 : f32 to vector<128x128xf32>
    %109 = arith.mulf %107, %108 : vector<128x128xf32>
    %110 = vector.broadcast %31 : vector<1x128xf32> to vector<128x128xf32>
    %111 = arith.addf %109, %110 : vector<128x128xf32>
    %cst_39 = arith.constant dense<0xFF800000> : vector<128xf32>
    %112 = vector.multi_reduction <maximumf>, %111, %cst_39 [1] : vector<128x128xf32> to vector<128xf32>
    %113 = vector.shape_cast %112 : vector<128xf32> to vector<128x1xf32>
    %114 = vector.broadcast %113 : vector<128x1xf32> to vector<128x128xf32>
    %115 = arith.subf %111, %114 : vector<128x128xf32>
    %116 = math.exp %115 : vector<128x128xf32>
    %cst_40 = arith.constant dense<0.000000e+00> : vector<128xf32>
    %117 = vector.multi_reduction <add>, %116, %cst_40 [1] : vector<128x128xf32> to vector<128xf32>
    %118 = vector.shape_cast %117 : vector<128xf32> to vector<128x1xf32>
    %119 = tpu.reciprocal %118 {approx = true} : vector<128x1xf32> -> vector<128x1xf32>
    %120 = arith.mulf %118, %119 : vector<128x1xf32>
    %cst_41 = arith.constant 2.000000e+00 : f32
    %121 = vector.broadcast %cst_41 : f32 to vector<128x1xf32>
    %122 = arith.subf %121, %120 : vector<128x1xf32>
    %123 = arith.mulf %119, %122 : vector<128x1xf32>
    %cst_42 = arith.constant dense<0.000000e+00> : vector<128x16xf32>
    %124 = tpu.matmul %116, %106, %cst_42 {dimension_numbers = #tpu.dot_dimension_numbers<[1], [0], [0], [1], [0, 0, 1, 1], [], []>} : vector<128x128xf32>, vector<128x16xf32>, vector<128x16xf32> -> vector<128x16xf32>
    %125 = vector.broadcast %123 : vector<128x1xf32> to vector<128x16xf32>
    %126 = arith.mulf %124, %125 : vector<128x16xf32>
    %c0_43 = arith.constant 0 : index
    %c48 = arith.constant 48 : index
    %127 = vector.load %arg8[%c0_43, %c48] : memref<128x64xf32, #tpu.memory_space<vmem>>, vector<128x16xf32>
    tpu.vector_store %arg8[%c0_43, %c48], %126 {strides = array<i32>} : memref<128x64xf32, #tpu.memory_space<vmem>>, vector<128x16xf32>,
    %c0_44 = arith.constant 0 : index
    %c0_45 = arith.constant 0 : index
    %128 = vector.load %arg8[%c0_44, %c0_45] : memref<128x64xf32, #tpu.memory_space<vmem>>, vector<128x64xf32>
    %c0_46 = arith.constant 0 : index
    %c0_47 = arith.constant 0 : index
    %129 = vector.load %arg5[%c0_46, %c0_47] : memref<64x64xf32, #tpu.memory_space<vmem>>, vector<64x64xf32>
    %cst_48 = arith.constant dense<0.000000e+00> : vector<128x64xf32>
    %130 = tpu.matmul %128, %129, %cst_48 {dimension_numbers = #tpu.dot_dimension_numbers<[1], [0], [0], [1], [0, 0, 1, 1], [], []>} : vector<128x64xf32>, vector<64x64xf32>, vector<128x64xf32> -> vector<128x64xf32>
    %c0_49 = arith.constant 0 : index
    %c0_50 = arith.constant 0 : index
    %131 = vector.load %arg6[%c0_49, %c0_50] : memref<1x64xf32, #tpu.memory_space<vmem>>, vector<1x64xf32>
    %132 = vector.broadcast %131 : vector<1x64xf32> to vector<128x64xf32>
    %133 = arith.addf %130, %132 : vector<128x64xf32>
    %134 = arith.addf %1, %133 : vector<128x64xf32>
    %c0_51 = arith.constant 0 : index
    %c0_52 = arith.constant 0 : index
    %c0_53 = arith.constant 0 : index
    %135 = vector.load %arg7[%c0_51, %c0_52, %c0_53] : memref<1x128x64xf32, #tpu.memory_space<vmem>>, vector<1x128x64xf32>
    %136 = vector.shape_cast %135 : vector<1x128x64xf32> to vector<128x64xf32>
    %137 = vector.shape_cast %134 : vector<128x64xf32> to vector<1x128x64xf32>
    tpu.vector_store %arg7[%c0_51, %c0_52, %c0_53], %137 {strides = array<i32>} : memref<1x128x64xf32, #tpu.memory_space<vmem>>, vector<1x128x64xf32>,
    return
  }
  func.func @transform_0(%arg0: i32) -> (i32, i32, i32) {
    %c0_i32 = arith.constant 0 : i32
    %c0_i32_0 = arith.constant 0 : i32
    %c0_i32_1 = arith.constant 0 : i32
    return %arg0, %c0_i32, %c0_i32_0 : i32, i32, i32
  }
  func.func @transform_1(%arg0: i32) -> (i32, i32) {
    %c0_i32 = arith.constant 0 : i32
    %c0_i32_0 = arith.constant 0 : i32
    %c0_i32_1 = arith.constant 0 : i32
    return %c0_i32, %c0_i32_0 : i32, i32
  }
  func.func @transform_2(%arg0: i32) -> (i32, i32) {
    %c0_i32 = arith.constant 0 : i32
    %c0_i32_0 = arith.constant 0 : i32
    %c0_i32_1 = arith.constant 0 : i32
    return %c0_i32, %c0_i32_0 : i32, i32
  }
  func.func @transform_3(%arg0: i32) -> (i32, i32) {
    %c0_i32 = arith.constant 0 : i32
    %c0_i32_0 = arith.constant 0 : i32
    %c0_i32_1 = arith.constant 0 : i32
    return %c0_i32, %c0_i32_0 : i32, i32
  }
  func.func @transform_4(%arg0: i32) -> (i32, i32) {
    %c0_i32 = arith.constant 0 : i32
    %c0_i32_0 = arith.constant 0 : i32
    %c0_i32_1 = arith.constant 0 : i32
    return %c0_i32, %c0_i32_0 : i32, i32
  }
  func.func @transform_5(%arg0: i32) -> (i32, i32) {
    %c0_i32 = arith.constant 0 : i32
    %c0_i32_0 = arith.constant 0 : i32
    %c0_i32_1 = arith.constant 0 : i32
    return %c0_i32, %c0_i32_0 : i32, i32
  }
  func.func @transform_6(%arg0: i32) -> (i32, i32, i32) {
    %c0_i32 = arith.constant 0 : i32
    %c0_i32_0 = arith.constant 0 : i32
    %c0_i32_1 = arith.constant 0 : i32
    return %arg0, %c0_i32, %c0_i32_0 : i32, i32, i32
  }
}

</mosaic_0001>

<bundles_post_ra>
// kernel: tpu_custom_call.1
= control target key start
LH: loop header
LB: loop body
LE: loop exit
PB: predicated region body
PF: predicated region fallthrough
CT: control target
= control target key end

     0   :  { %s5385_s21 = smov 0   ;;  %s7570_s0 = inlined_call_operand.vmem [shape: f32[2,128,64], index: 0, kind: input, shape index: {}]   ;;  %s7571_s1 = inlined_call_operand.vmem [shape: f32[1,64], index: 1, kind: input, shape index: {}]   ;;  %s7572_s2 = inlined_call_operand.vmem [shape: f32[1,64], index: 2, kind: input, shape index: {}]   ;;  %s7573_s3 = inlined_call_operand.vmem [shape: f32[64,192], index: 3, kind: input, shape index: {}]   ;;  %s7574_s4 = inlined_call_operand.vmem [shape: f32[64,64], index: 4, kind: input, shape index: {}]   ;;  %s7575_s5 = inlined_call_operand.vmem [shape: f32[1,64], index: 5, kind: input, shape index: {}]   ;;  %s7576_s6 = inlined_call_operand.vmem [shape: f32[2,128,64], index: 6, kind: output, shape index: {}]  }
   0x1 LB: > { %s4036_s22 = sadd.s32 4294967295, %s5339_s21   ;;  %p4040_p0 = scmp.ge.s32.totalorder %s5339_s21, 1  ;;  %s5339_s21 = sphi %s5385_s21, %s16_s21  }
   0x2   : > { %p212_p1 = scmp.lt.s32.totalorder %s5339_s21, 3 }
   0x4   : > { %p213_p2 = pnand %p4040_p0, %p212_p1 }
   0x6   : > { %216 = sbr.rel (%p213_p2) target bundleno = 2706 (0xa92), region = 44 }
   0xb   : > { %p242_p3 = scmp.lt.s32.totalorder %s4036_s22, 1  ;;  %vm270_vm0 = vcmask 523264   ;;  %vm801_vm1 = vcmask 130048   ;;  %s5342_s19 = smov 64   ;;  %vm2166_vm3 = vcmask 261248   ;;  %vm2937_vm4 = vcmask 392448  }
   0xc   : > { %s5343_s20 = smov 48   ;;  %s5344_s24 = smov 112   ;;  %vm3708_vm5 = vcmask 523648  }
   0xd   : > { %s7873_s22 = smov (!%p242_p3, %s4036_s22), 1  ;;  %s5345_s25 = smov 32  }
   0xe   : > { %s4210_s23 = sshll.u32 %s7873_s22, 7  ;;  %s5347_s27 = smov 96  }
   0xf   : > { %s5401_s26 = scalar_lea.vmem %s7570_s0, %s4210_s23  ;;  %s5348_s28 = smov 16  }
  0x10   : > { %v252_v0 = vld [vmem:[%s5401_s26] sm:$0xff]  ;;  %v254_v1 = vld [vmem:[%s5401_s26 + $0x10] sm:$0xff]  ;;  %v253_v2 = vld [vmem:[%s5401_s26 + $0x8] sm:$0xff]  ;;  %s5349_s29 = smov 80   ;;  %s7502_s30 = scalar_lea.vmem %s7576_s6, %s4210_s23 }
  0x11   : > { %v271_v3 = vsel %vm270_vm0, %v252_v0, 0.0  ;;  %v277_v4 = vsel %vm270_vm0, %v254_v1, 0.0  ;;  %v255_v5 = vld [vmem:[%s5401_s26 + $0x18] sm:$0xff]  ;;  %v274_v6 = vsel %vm270_vm0, %v253_v2, 0.0  ;;  %v256_v8 = vld [vmem:[%s5401_s26 + $0x20] sm:$0xff]  ;;  %v257_v9 = vld [vmem:[%s5401_s26 + $0x28] sm:$0xff] }
  0x12   : > { %272 = vadd.xlane.f32.xlu0 %v271_v3  ;;  %278 = vadd.xlane.f32.xlu1 %v277_v4  ;;  %v280_v7 = vsel %vm270_vm0, %v255_v5, 0.0  ;;  %v283_v10 = vsel %vm270_vm0, %v256_v8, 0.0  ;;  %v286_v11 = vsel %vm270_vm0, %v257_v9, 0.0  ;;  %v5416_v12 = vld [vmem:[%s5401_s26 + $0x30] sm:$0xff]  ;;  %v5419_v13 = vld [vmem:[%s5401_s26 + $0x38] sm:$0xff]  ;;  %v5426_v16 = vld [vmem:[%s5401_s26 + $0x40] sm:$0xff] }
  0x13   : > { %v289_v14 = vsel %vm270_vm0, %v5416_v12, 0.0  ;;  %v292_v15 = vsel %vm270_vm0, %v5419_v13, 0.0  ;;  %v5429_v17 = vld [vmem:[%s5401_s26 + $0x48] sm:$0xff]  ;;  %v295_v18 = vsel %vm270_vm0, %v5426_v16, 0.0  ;;  %v5436_v20 = vld [vmem:[%s5401_s26 + $0x50] sm:$0xff]  ;;  %v5439_v21 = vld [vmem:[%s5401_s26 + $0x58] sm:$0xff] }
  0x14   : > { %v298_v19 = vsel %vm270_vm0, %v5429_v17, 0.0  ;;  %v301_v22 = vsel %vm270_vm0, %v5436_v20, 0.0  ;;  %v304_v23 = vsel %vm270_vm0, %v5439_v21, 0.0  ;;  %v5446_v24 = vld [vmem:[%s5401_s26 + $0x60] sm:$0xff]  ;;  %v5449_v25 = vld [vmem:[%s5401_s26 + $0x68] sm:$0xff]  ;;  %v5456_v28 = vld [vmem:[%s5401_s26 + $0x70] sm:$0xff] }
  0x15   : > { %v307_v26 = vsel %vm270_vm0, %v5446_v24, 0.0  ;;  %v310_v27 = vsel %vm270_vm0, %v5449_v25, 0.0  ;;  %v5459_v29 = vld [vmem:[%s5401_s26 + $0x78] sm:$0xff]  ;;  %v313_v30 = vsel %vm270_vm0, %v5456_v28, 0.0 }
  0x16   : > { %275 = vadd.xlane.f32.xlu0 %v274_v6  ;;  %281 = vadd.xlane.f32.xlu1 %v280_v7  ;;  %v316_v31 = vsel %vm270_vm0, %v5459_v29, 0.0 }
  0x1a   : > { %284 = vadd.xlane.f32.xlu0 %v283_v10  ;;  %287 = vadd.xlane.f32.xlu1 %v286_v11 }
  0x1e   : > { %290 = vadd.xlane.f32.xlu0 %v289_v14  ;;  %293 = vadd.xlane.f32.xlu1 %v292_v15 }
  0x22   : > { %296 = vadd.xlane.f32.xlu0 %v295_v18  ;;  %299 = vadd.xlane.f32.xlu1 %v298_v19 }
  0x26   : > { %302 = vadd.xlane.f32.xlu0 %v301_v22  ;;  %305 = vadd.xlane.f32.xlu1 %v304_v23 }
  0x2a   : > { %308 = vadd.xlane.f32.xlu0 %v307_v26  ;;  %311 = vadd.xlane.f32.xlu1 %v310_v27 }
  0x2e   : > { %314 = vadd.xlane.f32.xlu0 %v313_v30  ;;  %317 = vadd.xlane.f32.xlu1 %v316_v31 }
  0x9b   : > { %v273_v32 = vpop.xlane.xlu0 %272  ;;  %v279_v33 = vpop.xlane.xlu1 %278 }
  0x9c   : > { %v320_v34 = vmul.f32 0.015625, %v273_v32  ;;  %v322_v35 = vmul.f32 0.015625, %v279_v33 }
  0x9e   : > { %v5465_v36 = vsub.f32 %v252_v0, %v320_v34  ;;  %v5467_v37 = vsub.f32 %v254_v1, %v322_v35 }
  0x9f   : > { %v276_v38 = vpop.xlane.xlu0 %275  ;;  %v282_v39 = vpop.xlane.xlu1 %281 }
  0xa0   : > { %v321_v40 = vmul.f32 0.015625, %v276_v38  ;;  %v323_v41 = vmul.f32 0.015625, %v282_v39  ;;  %v352_v42 = vmul.f32 %v5465_v36, %v5465_v36  ;;  %v354_v43 = vmul.f32 %v5467_v37, %v5467_v37 }
  0xa2   : > { %v5473_v44 = vsub.f32 %v253_v2, %v321_v40  ;;  %v5475_v45 = vsub.f32 %v255_v5, %v323_v41  ;;  %v368_v46 = vsel %vm270_vm0, %v352_v42, 0.0  ;;  %v374_v49 = vsel %vm270_vm0, %v354_v43, 0.0  ;;  %v538_v40 = vld [vmem:[%s7573_s3 + $0x70] sm:$0xff] }
  0xa3   : > { %369 = vadd.xlane.f32.xlu0 %v368_v46  ;;  %v285_v47 = vpop.xlane.xlu0 %284  ;;  %v288_v48 = vpop.xlane.xlu1 %287 }
  0xa4   : > { %v324_v50 = vmul.f32 0.015625, %v285_v47  ;;  %v325_v51 = vmul.f32 0.015625, %v288_v48  ;;  %v353_v52 = vmul.f32 %v5473_v44, %v5473_v44  ;;  %v355_v53 = vmul.f32 %v5475_v45, %v5475_v45 }
  0xa6   : > { %v5483_v54 = vsub.f32 %v256_v8, %v324_v50  ;;  %v5485_v55 = vsub.f32 %v257_v9, %v325_v51  ;;  %v371_v56 = vsel %vm270_vm0, %v353_v52, 0.0  ;;  %v377_v59 = vsel %vm270_vm0, %v355_v53, 0.0  ;;  %v535_v50 = vld [vmem:[%s7573_s3 + $0x58] sm:$0xff] }
  0xa7   : > { %375 = vadd.xlane.f32.xlu0 %v374_v49  ;;  %372 = vadd.xlane.f32.xlu1 %v371_v56  ;;  %v291_v57 = vpop.xlane.xlu0 %290  ;;  %v294_v58 = vpop.xlane.xlu1 %293  ;;  %v536_v49 = vld [vmem:[%s7573_s3 + $0x60] sm:$0xff]  ;;  %v534_v56 = vld [vmem:[%s7573_s3 + $0x50] sm:$0xff] }
  0xa8   : > { %v326_v60 = vmul.f32 0.015625, %v291_v57  ;;  %v327_v61 = vmul.f32 0.015625, %v294_v58  ;;  %v356_v62 = vmul.f32 %v5483_v54, %v5483_v54  ;;  %v357_v63 = vmul.f32 %v5485_v55, %v5485_v55  ;;  %v533_v57 = vld [vmem:[%s7573_s3 + $0x48] sm:$0xff] }
  0xaa   : > { %v5494_v0 = vsub.f32 %v5416_v12, %v326_v60  ;;  %v5497_v1 = vsub.f32 %v5419_v13, %v327_v61  ;;  %v380_v2 = vsel %vm270_vm0, %v356_v62, 0.0  ;;  %v383_v5 = vsel %vm270_vm0, %v357_v63, 0.0  ;;  %v531_v61 = vld [vmem:[%s7573_s3 + $0x38] sm:$0xff]  ;;  %v530_v62 = vld [vmem:[%s7573_s3 + $0x30] sm:$0xff] }
  0xab   : > { %378 = vadd.xlane.f32.xlu1 %v377_v59  ;;  %381 = vadd.xlane.f32.xlu0 %v380_v2  ;;  %v297_v3 = vpop.xlane.xlu0 %296  ;;  %v300_v4 = vpop.xlane.xlu1 %299  ;;  %v532_v59 = vld [vmem:[%s7573_s3 + $0x40] sm:$0xff]  ;;  %v529_v2 = vld [vmem:[%s7573_s3 + $0x28] sm:$0xff] }
  0xac   : > { %v328_v6 = vmul.f32 0.015625, %v297_v3  ;;  %v329_v7 = vmul.f32 0.015625, %v300_v4  ;;  %v358_v8 = vmul.f32 %v5494_v0, %v5494_v0  ;;  %v359_v9 = vmul.f32 %v5497_v1, %v5497_v1  ;;  %v528_v3 = vld [vmem:[%s7573_s3 + $0x20] sm:$0xff]  ;;  %v527_v4 = vld [vmem:[%s7573_s3 + $0x18] sm:$0xff] }
  0xae   : > { %v5506_v10 = vsub.f32 %v5426_v16, %v328_v6  ;;  %v5509_v11 = vsub.f32 %v5429_v17, %v329_v7  ;;  %v386_v12 = vsel %vm270_vm0, %v358_v8, 0.0  ;;  %v389_v15 = vsel %vm270_vm0, %v359_v9, 0.0  ;;  %v525_v6 = vld [vmem:[%s7573_s3 + $0x8] sm:$0xff]  ;;  %v524_v7 = vld [vmem:[%s7573_s3] sm:$0xff] }
  0xaf   : > { %384 = vadd.xlane.f32.xlu1 %v383_v5  ;;  %387 = vadd.xlane.f32.xlu0 %v386_v12  ;;  %v303_v13 = vpop.xlane.xlu0 %302  ;;  %v306_v14 = vpop.xlane.xlu1 %305  ;;  %v526_v5 = vld [vmem:[%s7573_s3 + $0x10] sm:$0xff]  ;;  %v5341_v8 = vmov 0.0  }
  0xb0   : > { %v330_v18 = vmul.f32 0.015625, %v303_v13  ;;  %v331_v19 = vmul.f32 0.015625, %v306_v14  ;;  %v360_v22 = vmul.f32 %v5506_v10, %v5506_v10  ;;  %v361_v16 = vmul.f32 %v5509_v11, %v5509_v11  ;;  %652 = vmatprep.mubr.f32.mxu0 %v5341_v8 }
  0xb2   : > { %v5518_v23 = vsub.f32 %v5436_v20, %v330_v18  ;;  %v5521_v17 = vsub.f32 %v5439_v21, %v331_v19  ;;  %v392_v26 = vsel %vm270_vm0, %v360_v22, 0.0  ;;  %v395_v31 = vsel %vm270_vm0, %v361_v16, 0.0  ;;  %v539_v21 = vld [vmem:[%s7573_s3 + $0x78] sm:$0xff] }
  0xb3   : > { %390 = vadd.xlane.f32.xlu1 %v389_v15  ;;  %393 = vadd.xlane.f32.xlu0 %v392_v26  ;;  %v309_v27 = vpop.xlane.xlu0 %308  ;;  %v312_v30 = vpop.xlane.xlu1 %311 }
  0xb4   : > { %v332_v32 = vmul.f32 0.015625, %v309_v27  ;;  %v333_v33 = vmul.f32 0.015625, %v312_v30  ;;  %v362_v34 = vmul.f32 %v5518_v23, %v5518_v23  ;;  %v363_v20 = vmul.f32 %v5521_v17, %v5521_v17  ;;  %604 = vmatprep.subr.mxu0 %v539_v21 }
  0xb5   : > { %605 = vmatpush1.msra.mxu0 %v538_v40 }
  0xb6   : > { %v5533_v35 = vsub.f32 %v5446_v24, %v332_v32  ;;  %v5536_v38 = vsub.f32 %v5449_v25, %v333_v33  ;;  %v398_v39 = vsel %vm270_vm0, %v362_v34, 0.0  ;;  %v401_v43 = vsel %vm270_vm0, %v363_v20, 0.0  ;;  %v537_v24 = vld [vmem:[%s7573_s3 + $0x68] sm:$0xff] }
  0xb7   : > { %396 = vadd.xlane.f32.xlu1 %v395_v31  ;;  %399 = vadd.xlane.f32.xlu0 %v398_v39  ;;  %v315_v41 = vpop.xlane.xlu0 %314  ;;  %v318_v42 = vpop.xlane.xlu1 %317 }
  0xb8   : > { %v334_v46 = vmul.f32 0.015625, %v315_v41  ;;  %v335_v25 = vmul.f32 0.015625, %v318_v42  ;;  %v364_v47 = vmul.f32 %v5533_v35, %v5533_v35  ;;  %v365_v48 = vmul.f32 %v5536_v38, %v5536_v38  ;;  %606 = vmatprep.subr.mxu0 %v537_v24 }
  0xb9   : > { %607 = vmatpush1.msra.mxu0 %v536_v49 }
  0xba   : > { %v5557_v51 = vsub.f32 %v5456_v28, %v334_v46  ;;  %v5560_v52 = vsub.f32 %v5459_v29, %v335_v25  ;;  %v404_v53 = vsel %vm270_vm0, %v364_v47, 0.0  ;;  %v407_v58 = vsel %vm270_vm0, %v365_v48, 0.0  ;;  %608 = vmatprep.subr.mxu0 %v535_v50  ;;  %v5613_v48 = vld [vmem:[%s7572_s2] ss:$0 sm:$0xff] }
  0xbb   : > { %402 = vadd.xlane.f32.xlu1 %v401_v43  ;;  %405 = vadd.xlane.f32.xlu0 %v404_v53  ;;  %v5607_v43 = vld [vmem:[%s7571_s1] ss:$0 sm:$0xff] }
  0xbc   : > { %v366_v28 = vmul.f32 %v5557_v51, %v5557_v51  ;;  %v367_v29 = vmul.f32 %v5560_v52, %v5560_v52  ;;  %609 = vmatpush1.msra.mxu0 %v534_v56 }
  0xbd   : > { %610 = vmatprep.subr.mxu0 %v533_v57 }
  0xbe   : > { %v410_v60 = vsel %vm270_vm0, %v366_v28, 0.0  ;;  %v413_v63 = vsel %vm270_vm0, %v367_v29, 0.0  ;;  %611 = vmatpush1.msra.mxu0 %v532_v59 }
  0xbf   : > { %408 = vadd.xlane.f32.xlu1 %v407_v58  ;;  %411 = vadd.xlane.f32.xlu0 %v410_v60 }
  0xc0   : > { %612 = vmatprep.subr.mxu0 %v531_v61 }
  0xc1   : > { %613 = vmatpush1.msra.mxu0 %v530_v62 }
  0xc2   : > { %614 = vmatprep.subr.mxu0 %v529_v2 }
  0xc3   : > { %414 = vadd.xlane.f32.xlu1 %v413_v63  ;;  %615 = vmatpush1.msra.mxu0 %v528_v3 }
  0xc4   : > { %616 = vmatprep.subr.mxu0 %v527_v4 }
  0xc5   : > { %617 = vmatpush1.msra.mxu0 %v526_v5 }
  0xc6   : > { %618 = vmatprep.subr.mxu0 %v525_v6 }
  0xc7   : > { %619 = vmatpush1.msra.mxu0 %v524_v7 }
 0x12c   : > { %v370_v9 = vpop.xlane.xlu0 %369 }
 0x12d   : > { %v416_v12 = vmul.f32 0.015625, %v370_v9 }
 0x12f   : > { %v432_v13 = vadd.f32 1e-05, %v416_v12 }
 0x130   : > { %v373_v14 = vpop.xlane.xlu1 %372  ;;  %v376_v15 = vpop.xlane.xlu0 %375 }
 0x131   : > { %5029 = vrsqrt.f32 %v432_v13  ;;  %v417_v18 = vmul.f32 0.015625, %v373_v14  ;;  %v418_v19 = vmul.f32 0.015625, %v376_v15 }
 0x133   : > { %v433_v22 = vadd.f32 1e-05, %v417_v18  ;;  %v434_v16 = vadd.f32 1e-05, %v418_v19 }
 0x134   : > { %v379_v26 = vpop.xlane.xlu1 %378  ;;  %v382_v27 = vpop.xlane.xlu0 %381 }
 0x135   : > { %5031 = vrsqrt.f32 %v433_v22  ;;  %v419_v30 = vmul.f32 0.015625, %v379_v26  ;;  %v420_v31 = vmul.f32 0.015625, %v382_v27 }
 0x136   : > { %5033 = vrsqrt.f32 %v434_v16 }
 0x137   : > { %v435_v32 = vadd.f32 1e-05, %v419_v30  ;;  %v436_v33 = vadd.f32 1e-05, %v420_v31 }
 0x138   : > { %v385_v34 = vpop.xlane.xlu1 %384  ;;  %v388_v20 = vpop.xlane.xlu0 %387 }
 0x139   : > { %5035 = vrsqrt.f32 %v435_v32  ;;  %v421_v21 = vmul.f32 0.015625, %v385_v34  ;;  %v422_v40 = vmul.f32 0.015625, %v388_v20 }
 0x13a   : > { %5037 = vrsqrt.f32 %v436_v33 }
 0x13b   : > { %v437_v39 = vadd.f32 1e-05, %v421_v21  ;;  %v438_v24 = vadd.f32 1e-05, %v422_v40 }
 0x13c   : > { %v391_v41 = vpop.xlane.xlu1 %390  ;;  %v394_v25 = vpop.xlane.xlu0 %393 }
 0x13d   : > { %5039 = vrsqrt.f32 %v437_v39  ;;  %v423_v46 = vmul.f32 0.015625, %v391_v41  ;;  %v424_v53 = vmul.f32 0.015625, %v394_v25 }
 0x13e   : > { %v5030_v42 = vpop.eup %5029  ;;  %5041 = vrsqrt.f32 %v438_v24 }
 0x13f   : > { %v464_v47 = vmul.f32 %v5030_v42, %v5465_v36  ;;  %v439_v57 = vadd.f32 1e-05, %v423_v46  ;;  %v440_v61 = vadd.f32 1e-05, %v424_v53 }
 0x140   : > { %v397_v58 = vpop.xlane.xlu1 %396  ;;  %v400_v63 = vpop.xlane.xlu0 %399 }
 0x141   : > { %v486_v49 = vmul.f32 %v5607_v43, %v464_v47  ;;  %v425_v62 = vmul.f32 0.015625, %v397_v58  ;;  %5043 = vrsqrt.f32 %v439_v57  ;;  %v426_v5 = vmul.f32 0.015625, %v400_v63 }
 0x142   : > { %v5032_v50 = vpop.eup %5031  ;;  %5045 = vrsqrt.f32 %v440_v61 }
 0x143   : > { %v5034_v56 = vpop.eup %5033  ;;  %v508_v28 = vadd.f32 %v5613_v48, %v486_v49  ;;  %v465_v29 = vmul.f32 %v5032_v50, %v5473_v44 }
 0x144   : > { %v466_v59 = vmul.f32 %v5034_v56, %v5467_v37  ;;  %v441_v37 = vadd.f32 1e-05, %v425_v62  ;;  %v403_v13 = vpop.xlane.xlu1 %402  ;;  %v406_v15 = vpop.xlane.xlu0 %405 }
 0x145   : > { %4047 = vmatmul.mubr.msk.f32.vlgmr.msra.gmra.mxu0 %vm270_vm0, %v508_v28  ;;  %v487_v36 = vmul.f32 %v5607_v43, %v465_v29  ;;  %v427_v14 = vmul.f32 0.015625, %v403_v13 }
 0x146   : > { %v5036_v60 = vpop.eup %5035  ;;  %658 = vmatprep.mubr.f32.mxu0 %v5341_v8  ;;  %v488_v3 = vmul.f32 %v5607_v43, %v466_v59  ;;  %5047 = vrsqrt.f32 %v441_v37 }
 0x147   : > { %v509_v2 = vadd.f32 %v5613_v48, %v487_v36  ;;  %v467_v4 = vmul.f32 %v5036_v60, %v5475_v45  ;;  %v5038_v44 = vpop.eup %5037  ;;  %v442_v45 = vadd.f32 1e-05, %v426_v5  ;;  %v443_v26 = vadd.f32 1e-05, %v427_v14 }
 0x148   : > { %v510_v6 = vadd.f32 %v5613_v48, %v488_v3  ;;  %v468_v9 = vmul.f32 %v5038_v44, %v5483_v54  ;;  %v428_v54 = vmul.f32 0.015625, %v406_v15  ;;  %v409_v27 = vpop.xlane.xlu1 %408  ;;  %v412_v20 = vpop.xlane.xlu0 %411 }
 0x149   : > { %4048 = vmatmul.mubr.msk.f32.gmra.mxu0 %vm270_vm0, %v509_v2  ;;  %v489_v7 = vmul.f32 %v5607_v43, %v467_v4  ;;  %5049 = vrsqrt.f32 %v442_v45 }
 0x14a   : > { %664 = vmatprep.mubr.f32.mxu0 %v5341_v8  ;;  %v5040_v12 = vpop.eup %5039  ;;  %v490_v19 = vmul.f32 %v5607_v43, %v468_v9  ;;  %v444_v34 = vadd.f32 1e-05, %v428_v54  ;;  %5051 = vrsqrt.f32 %v443_v26 }
 0x14b   : > { %v511_v18 = vadd.f32 %v5613_v48, %v489_v7  ;;  %v469_v22 = vmul.f32 %v5040_v12, %v5485_v55  ;;  %v5042_v16 = vpop.eup %5041  ;;  %v429_v55 = vmul.f32 0.015625, %v409_v27 }
 0x14c   : > { %v512_v30 = vadd.f32 %v5613_v48, %v490_v19  ;;  %v470_v32 = vmul.f32 %v5042_v16, %v5494_v0  ;;  %v430_v0 = vmul.f32 0.015625, %v412_v20  ;;  %5053 = vrsqrt.f32 %v444_v34  ;;  %v415_v49 = vpop.xlane.xlu1 %414 }
 0x14d   : > { %4049 = vmatmul.mubr.msk.f32.gmra.mxu0 %vm270_vm0, %v510_v6  ;;  %v491_v31 = vmul.f32 %v5607_v43, %v469_v22  ;;  %v445_v42 = vadd.f32 1e-05, %v429_v55  ;;  %v431_v53 = vmul.f32 0.015625, %v415_v49 }
 0x14e   : > { %670 = vmatprep.mubr.f32.mxu0 %v5341_v8  ;;  %v5044_v33 = vpop.eup %5043  ;;  %v492_v39 = vmul.f32 %v5607_v43, %v470_v32 }
 0x14f   : > { %v513_v21 = vadd.f32 %v5613_v48, %v491_v31  ;;  %v471_v40 = vmul.f32 %v5044_v33, %v5497_v1  ;;  %v5046_v41 = vpop.eup %5045  ;;  %5055 = vrsqrt.f32 %v445_v42  ;;  %v446_v1 = vadd.f32 1e-05, %v430_v0 }
 0x150   : > { %v514_v46 = vadd.f32 %v5613_v48, %v492_v39  ;;  %v472_v47 = vmul.f32 %v5046_v41, %v5506_v10  ;;  %v447_v10 = vadd.f32 1e-05, %v431_v53 }
 0x151   : > { %4050 = vmatmul.mubr.msk.f32.gmra.mxu0 %vm270_vm0, %v511_v18  ;;  %v493_v25 = vmul.f32 %v5607_v43, %v471_v40  ;;  %5057 = vrsqrt.f32 %v446_v1 }
 0x152   : > { %676 = vmatprep.mubr.f32.mxu0 %v5341_v8  ;;  %v494_v57 = vmul.f32 %v5607_v43, %v472_v47  ;;  %5059 = vrsqrt.f32 %v447_v10 }
 0x153   : > { %v5048_v24 = vpop.eup %5047  ;;  %v515_v56 = vadd.f32 %v5613_v48, %v493_v25 }
 0x154   : > { %v473_v58 = vmul.f32 %v5048_v24, %v5509_v11  ;;  %v516_v28 = vadd.f32 %v5613_v48, %v494_v57 }
 0x155   : > { %4051 = vmatmul.mubr.msk.f32.gmra.mxu0 %vm270_vm0, %v512_v30 }
 0x156   : > { %682 = vmatprep.mubr.f32.mxu0 %v5341_v8  ;;  %v5050_v50 = vpop.eup %5049  ;;  %v495_v29 = vmul.f32 %v5607_v43, %v473_v58 }
 0x157   : > { %v474_v59 = vmul.f32 %v5050_v50, %v5518_v23  ;;  %v5052_v36 = vpop.eup %5051 }
 0x158   : > { %v517_v11 = vadd.f32 %v5613_v48, %v495_v29  ;;  %v475_v61 = vmul.f32 %v5052_v36, %v5521_v17 }
 0x159   : > { %4052 = vmatmul.mubr.msk.f32.gmra.mxu0 %vm270_vm0, %v513_v21  ;;  %v496_v60 = vmul.f32 %v5607_v43, %v474_v59  ;;  %v5054_v62 = vpop.eup %5053 }
 0x15a   : > { %688 = vmatprep.mubr.f32.mxu0 %v5341_v8  ;;  %v497_v2 = vmul.f32 %v5607_v43, %v475_v61  ;;  %v476_v3 = vmul.f32 %v5054_v62, %v5533_v35 }
 0x15b   : > { %v518_v23 = vadd.f32 %v5613_v48, %v496_v60 }
 0x15c   : > { %v5056_v63 = vpop.eup %5055  ;;  %v519_v44 = vadd.f32 %v5613_v48, %v497_v2  ;;  %v498_v17 = vmul.f32 %v5607_v43, %v476_v3 }
 0x15d   : > { %4053 = vmatmul.mubr.msk.f32.gmra.mxu0 %vm270_vm0, %v514_v46  ;;  %v477_v37 = vmul.f32 %v5056_v63, %v5536_v38 }
 0x15e   : > { %694 = vmatprep.mubr.f32.mxu0 %v5341_v8  ;;  %v5058_v4 = vpop.eup %5057  ;;  %v520_v5 = vadd.f32 %v5613_v48, %v498_v17 }
 0x15f   : > { %v499_v6 = vmul.f32 %v5607_v43, %v477_v37  ;;  %v478_v35 = vmul.f32 %v5058_v4, %v5557_v51  ;;  %v5060_v7 = vpop.eup %5059 }
 0x160   : > { %v479_v38 = vmul.f32 %v5060_v7, %v5560_v52 }
 0x161   : > { %4054 = vmatmul.mubr.msk.f32.gmra.mxu0 %vm270_vm0, %v515_v56  ;;  %v521_v9 = vadd.f32 %v5613_v48, %v499_v6  ;;  %v500_v12 = vmul.f32 %v5607_v43, %v478_v35 }
 0x162   : > { %700 = vmatprep.mubr.f32.mxu0 %v5341_v8  ;;  %v501_v45 = vmul.f32 %v5607_v43, %v479_v38 }
 0x163   : > { %v522_v13 = vadd.f32 %v5613_v48, %v500_v12 }
 0x164   : > { %v523_v51 = vadd.f32 %v5613_v48, %v501_v45 }
 0x165   : > { %4055 = vmatmul.mubr.msk.f32.gmra.mxu0 %vm270_vm0, %v516_v28 }
 0x166   : > { %706 = vmatprep.mubr.f32.mxu0 %v5341_v8 }
 0x169   : > { %4056 = vmatmul.mubr.msk.f32.gmra.mxu0 %vm270_vm0, %v517_v11 }
 0x16a   : > { %712 = vmatprep.mubr.f32.mxu0 %v5341_v8 }
 0x16d   : > { %4057 = vmatmul.mubr.msk.f32.gmra.mxu0 %vm270_vm0, %v518_v23 }
 0x16e   : > { %718 = vmatprep.mubr.f32.mxu0 %v5341_v8 }
 0x171   : > { %4058 = vmatmul.mubr.msk.f32.gmra.mxu0 %vm270_vm0, %v519_v44 }
 0x172   : > { %724 = vmatprep.mubr.f32.mxu0 %v5341_v8 }
 0x175   : > { %4059 = vmatmul.mubr.msk.f32.gmra.mxu0 %vm270_vm0, %v520_v5 }
 0x176   : > { %730 = vmatprep.mubr.f32.mxu0 %v5341_v8 }
 0x179   : > { %4060 = vmatmul.mubr.msk.f32.gmra.mxu0 %vm270_vm0, %v521_v9 }
 0x17a   : > { %736 = vmatprep.mubr.f32.mxu0 %v5341_v8 }
 0x17d   : > { %4061 = vmatmul.mubr.msk.f32.gmra.mxu0 %vm270_vm0, %v522_v13 }
 0x17e   : > { %742 = vmatprep.mubr.f32.mxu0 %v5341_v8 }
 0x181   : > { %4062 = vmatmul.mubr.msk.f32.gmra.mxu0 %vm270_vm0, %v523_v51 }
 0x205   : > { %v5693_v14 = vpop.f32.mrf.mxu0 }
 0x206   : > { %4524 = vmatprep.mubr.msk.f32.mxu1 %vm801_vm1, %v5693_v14 }
 0x207   : > { %v5697_v52 = vpop.f32.mrf.mxu0 }
 0x208   : > { %7662 = vst [vmem:[#allocation3_spill] sm:$0xff] %v5697_v52 }
 0x209   : > { %v5699_v15 = vpop.f32.mrf.mxu0 }
 0x20b   : > { %v5701_v18 = vpop.f32.mrf.mxu0 }
 0x20c   : > { %7663 = vst [vmem:[#allocation4_spill] sm:$0xff] %v5701_v18 }
 0x20d   : > { %v5703_v43 = vpop.f32.mrf.mxu0 }
 0x20f   : > { %v5705_v19 = vpop.f32.mrf.mxu0 }
 0x210   : > { %7664 = vst [vmem:[#allocation5_spill] sm:$0xff] %v5705_v19 }
 0x211   : > { %v5707_v8 = vpop.f32.mrf.mxu0 }
 0x213   : > { %v5709_v48 = vpop.f32.mrf.mxu0 }
 0x214   : > { %7665 = vst [vmem:[#allocation6_spill] sm:$0xff] %v5709_v48 }
 0x215   : > { %v5711_v22 = vpop.f32.mrf.mxu0 }
 0x217   : > { %v5713_v16 = vpop.f32.mrf.mxu0 }
 0x218   : > { %7666 = vst [vmem:[#allocation7_spill] sm:$0xff] %v5713_v16 }
 0x219   : > { %v5715_v54 = vpop.f32.mrf.mxu0 }
 0x21b   : > { %v5717_v26 = vpop.f32.mrf.mxu0 }
 0x21c   : > { %7667 = vst [vmem:[#allocation8_spill] sm:$0xff] %v5717_v26 }
 0x21d   : > { %v5719_v27 = vpop.f32.mrf.mxu0 }
 0x21f   : > { %v5721_v30 = vpop.f32.mrf.mxu0 }
 0x220   : > { %7668 = vst [vmem:[#allocation9_spill] sm:$0xff] %v5721_v30 }
 0x221   : > { %v5723_v31 = vpop.f32.mrf.mxu0 }
 0x223   : > { %v5725_v32 = vpop.f32.mrf.mxu0 }
 0x224   : > { %7669 = vst [vmem:[#allocation10_spill] sm:$0xff] %v5725_v32 }
 0x225   : > { %v5727_v33 = vpop.f32.mrf.mxu0 }
 0x227   : > { %v5729_v34 = vpop.f32.mrf.mxu0 }
 0x228   : > { %7670 = vst [vmem:[#allocation11_spill] sm:$0xff] %v5729_v34 }
 0x229   : > { %v5731_v55 = vpop.f32.mrf.mxu0 }
 0x22b   : > { %v5733_v20 = vpop.f32.mrf.mxu0 }
 0x22c   : > { %7671 = vst [vmem:[#allocation12_spill] sm:$0xff] %v5733_v20 }
 0x22d   : > { %v5735_v21 = vpop.f32.mrf.mxu0 }
 0x22f   : > { %v5737_v39 = vpop.f32.mrf.mxu0 }
 0x230   : > { %7672 = vst [vmem:[#allocation13_spill] sm:$0xff] %v5737_v39 }
 0x231   : > { %v5739_v40 = vpop.f32.mrf.mxu0 }
 0x233   : > { %v5741_v41 = vpop.f32.mrf.mxu0 }
 0x234   : > { %7673 = vst [vmem:[#allocation14_spill] sm:$0xff] %v5741_v41 }
 0x235   : > { %v5743_v42 = vpop.f32.mrf.mxu0 }
 0x237   : > { %v5745_v0 = vpop.f32.mrf.mxu0 }
 0x238   : > { %7674 = vst [vmem:[#allocation15_spill] sm:$0xff] %v5745_v0 }
 0x239   : > { %v5747_v24 = vpop.f32.mrf.mxu0 }
 0x23a   : > { %7675 = vst [vmem:[#allocation16_spill] sm:$0xff] %v5747_v24 }
 0x23b   : > { %v5749_v46 = vpop.f32.mrf.mxu0 }
 0x23c   : > { %7676 = vst [vmem:[#allocation17_spill] sm:$0xff] %v5749_v46 }
 0x23d   : > { %v5751_v25 = vpop.f32.mrf.mxu0 }
 0x23e   : > { %797 = vrot.lane.b32.xlu1 %v5751_v25, %s5342_s19 }
 0x23f   : > { %v5755_v47 = vpop.f32.mrf.mxu0 }
 0x240   : > { %7677 = vst [vmem:[#allocation18_spill] sm:$0xff] %v5755_v47 }
 0x241   : > { %v5757_v49 = vpop.f32.mrf.mxu0 }
 0x242   : > { %7678 = vst [vmem:[#allocation19_spill] sm:$0xff] %v5757_v49  ;;  %795 = vrot.lane.b32.xlu1 %v5747_v24, %s5342_s19  ;;  %799 = vrot.lane.b32.xlu0 %v5757_v49, %s5342_s19 }
 0x243   : > { %v5763_v1 = vpop.f32.mrf.mxu0 }
 0x244   : > { %4548 = vmatprep.subr.mxu0 %v5763_v1 }
 0x245   : > { %4549 = vmatpush3.msra.mxu0 %v5763_v1 }
 0x246   : > { %793 = vrot.lane.b32.xlu1 %v5743_v42, %s5342_s19  ;;  %791 = vrot.lane.b32.xlu0 %v5739_v40, %s5342_s19 }
 0x247   : > { %4550 = vmatprep.subr.mxu0 %v5755_v47 }
 0x248   : > { %4551 = vmatpush3.msra.mxu0 %v5755_v47 }
 0x249   : > { %4552 = vmatprep.subr.mxu0 %v5749_v46 }
 0x24a   : > { %4553 = vmatpush3.msra.mxu0 %v5749_v46  ;;  %789 = vrot.lane.b32.xlu1 %v5735_v21, %s5342_s19 }
 0x24b   : > { %787 = vrot.lane.b32.xlu0 %v5731_v55, %s5342_s19  ;;  %4554 = vmatprep.subr.mxu0 %v5745_v0 }
 0x24c   : > { %4555 = vmatpush3.msra.mxu0 %v5745_v0 }
 0x24d   : > { %4556 = vmatprep.subr.mxu0 %v5741_v41 }
 0x24e   : > { %4557 = vmatpush3.msra.mxu0 %v5741_v41  ;;  %785 = vrot.lane.b32.xlu1 %v5727_v33, %s5342_s19 }
 0x24f   : > { %783 = vrot.lane.b32.xlu0 %v5723_v31, %s5342_s19  ;;  %4558 = vmatprep.subr.mxu0 %v5737_v39 }
 0x250   : > { %4559 = vmatpush3.msra.mxu0 %v5737_v39 }
 0x251   : > { %4560 = vmatprep.subr.mxu0 %v5733_v20 }
 0x252   : > { %4561 = vmatpush3.msra.mxu0 %v5733_v20  ;;  %781 = vrot.lane.b32.xlu1 %v5719_v27, %s5342_s19 }
 0x253   : > { %779 = vrot.lane.b32.xlu0 %v5715_v54, %s5342_s19  ;;  %4562 = vmatprep.subr.mxu0 %v5729_v34 }
 0x254   : > { %4563 = vmatpush3.msra.mxu0 %v5729_v34 }
 0x255   : > { %4564 = vmatprep.subr.mxu0 %v5725_v32 }
 0x256   : > { %4565 = vmatpush3.msra.mxu0 %v5725_v32  ;;  %777 = vrot.lane.b32.xlu1 %v5711_v22, %s5342_s19 }
 0x257   : > { %775 = vrot.lane.b32.xlu0 %v5707_v8, %s5342_s19  ;;  %4566 = vmatprep.subr.mxu0 %v5721_v30 }
 0x258   : > { %4567 = vmatpush3.msra.mxu0 %v5721_v30 }
 0x259   : > { %4568 = vmatprep.subr.mxu0 %v5717_v26 }
 0x25a   : > { %4569 = vmatpush3.msra.mxu0 %v5717_v26  ;;  %773 = vrot.lane.b32.xlu1 %v5703_v43, %s5342_s19 }
 0x25b   : > { %771 = vrot.lane.b32.xlu0 %v5699_v15, %s5342_s19  ;;  %4570 = vmatprep.subr.mxu0 %v5713_v16 }
 0x25c   : > { %4571 = vmatpush3.msra.mxu0 %v5713_v16 }
 0x25d   : > { %4572 = vmatprep.subr.mxu0 %v5709_v48 }
 0x25e   : > { %4573 = vmatpush3.msra.mxu0 %v5709_v48  ;;  %769 = vrot.lane.b32.xlu1 %v5693_v14, %s5342_s19 }
 0x25f   : > { %1458 = vrot.lane.b32.xlu0 %v5757_v49, %s5343_s20  ;;  %4574 = vmatprep.subr.mxu0 %v5705_v19 }
 0x260   : > { %4575 = vmatpush3.msra.mxu0 %v5705_v19 }
 0x261   : > { %4576 = vmatprep.subr.mxu0 %v5701_v18 }
 0x262   : > { %4577 = vmatpush3.msra.mxu0 %v5701_v18  ;;  %1456 = vrot.lane.b32.xlu1 %v5751_v25, %s5343_s20 }
 0x263   : > { %1454 = vrot.lane.b32.xlu0 %v5747_v24, %s5343_s20  ;;  %4578 = vmatprep.subr.mxu0 %v5697_v52 }
 0x264   : > { %4579 = vmatpush3.msra.mxu0 %v5697_v52 }
 0x266   : > { %1452 = vrot.lane.b32.xlu1 %v5743_v42, %s5343_s20 }
 0x267   : > { %1450 = vrot.lane.b32.xlu0 %v5739_v40, %s5343_s20 }
 0x26a   : > { %1448 = vrot.lane.b32.xlu1 %v5735_v21, %s5343_s20 }
 0x26b   : > { %1446 = vrot.lane.b32.xlu0 %v5731_v55, %s5343_s20 }
 0x26e   : > { %1444 = vrot.lane.b32.xlu1 %v5727_v33, %s5343_s20 }
 0x26f   : > { %1442 = vrot.lane.b32.xlu0 %v5723_v31, %s5343_s20 }
 0x272   : > { %1440 = vrot.lane.b32.xlu1 %v5719_v27, %s5343_s20 }
 0x273   : > { %1438 = vrot.lane.b32.xlu0 %v5715_v54, %s5343_s20 }
 0x276   : > { %1436 = vrot.lane.b32.xlu1 %v5711_v22, %s5343_s20 }
 0x277   : > { %1434 = vrot.lane.b32.xlu0 %v5707_v8, %s5343_s20 }
 0x27a   : > { %1432 = vrot.lane.b32.xlu1 %v5703_v43, %s5343_s20 }
 0x27b   : > { %1430 = vrot.lane.b32.xlu0 %v5699_v15, %s5343_s20 }
 0x27e   : > { %1428 = vrot.lane.b32.xlu1 %v5693_v14, %s5343_s20 }
 0x27f   : > { %1396 = vrot.lane.b32.xlu0 %v5693_v14, %s5344_s24 }
 0x282   : > { %1398 = vrot.lane.b32.xlu1 %v5699_v15, %s5344_s24 }
 0x283   : > { %1400 = vrot.lane.b32.xlu0 %v5703_v43, %s5344_s24 }
 0x286   : > { %1402 = vrot.lane.b32.xlu1 %v5707_v8, %s5344_s24 }
 0x287   : > { %1404 = vrot.lane.b32.xlu0 %v5711_v22, %s5344_s24 }
 0x28a   : > { %1406 = vrot.lane.b32.xlu1 %v5715_v54, %s5344_s24 }
 0x28b   : > { %1408 = vrot.lane.b32.xlu0 %v5719_v27, %s5344_s24 }
 0x28e   : > { %1410 = vrot.lane.b32.xlu1 %v5723_v31, %s5344_s24 }
 0x28f   : > { %1412 = vrot.lane.b32.xlu0 %v5727_v33, %s5344_s24 }
 0x292   : > { %1414 = vrot.lane.b32.xlu1 %v5731_v55, %s5344_s24 }
 0x293   : > { %1416 = vrot.lane.b32.xlu0 %v5735_v21, %s5344_s24 }
 0x296   : > { %1418 = vrot.lane.b32.xlu1 %v5739_v40, %s5344_s24 }
 0x297   : > { %1420 = vrot.lane.b32.xlu0 %v5743_v42, %s5344_s24 }
 0x29a   : > { %1422 = vrot.lane.b32.xlu1 %v5747_v24, %s5344_s24 }
 0x29b   : > { %1424 = vrot.lane.b32.xlu0 %v5751_v25, %s5344_s24 }
 0x29e   : > { %1426 = vrot.lane.b32.xlu1 %v5757_v49, %s5344_s24 }
 0x29f   : > { %1919 = vrot.lane.b32.xlu0 %v5749_v46, %s5344_s24 }
 0x2a2   : > { %1921 = vrot.lane.b32.xlu1 %v5755_v47, %s5344_s24 }
 0x2a3   : > { %1917 = vrot.lane.b32.xlu0 %v5745_v0, %s5344_s24 }
 0x2a6   : > { %1901 = vrot.lane.b32.xlu1 %v5713_v16, %s5344_s24 }
 0x2a7   : > { %1915 = vrot.lane.b32.xlu0 %v5741_v41, %s5344_s24 }
 0x2aa   : > { %2243 = vrot.lane.b32.xlu1 %v5751_v25, %s5345_s25 }
 0x2ab   : > { %1913 = vrot.lane.b32.xlu0 %v5737_v39, %s5344_s24 }
 0x2ae   : > { %2239 = vrot.lane.b32.xlu1 %v5743_v42, %s5345_s25 }
 0x2af   : > { %1911 = vrot.lane.b32.xlu0 %v5733_v20, %s5344_s24 }
 0x2b0   : > { %v798_v50 = vpop.permute.xlu1 %797 }
 0x2b2   : > { %2235 = vrot.lane.b32.xlu1 %v5735_v21, %s5345_s25 }
 0x2b3   : > { %1909 = vrot.lane.b32.xlu0 %v5729_v34, %s5344_s24 }
 0x2b4   : > { %v800_v53 = vpop.permute.xlu0 %799  ;;  %v796_v56 = vpop.permute.xlu1 %795 }
 0x2b5   : > { %4492 = vmatprep.subr.msk.mxu1 %vm801_vm1, %v800_v53 }
 0x2b6   : > { %2231 = vrot.lane.b32.xlu1 %v5727_v33, %s5345_s25  ;;  %4493 = vmatpush3.xpose.msk.msra.mxu1 %vm801_vm1, %v800_v53 }
 0x2b7   : > { %1907 = vrot.lane.b32.xlu0 %v5725_v32, %s5344_s24  ;;  %4494 = vmatprep.subr.msk.mxu1 %vm801_vm1, %v798_v50 }
 0x2b8   : > { %v792_v57 = vpop.permute.xlu0 %791  ;;  %v794_v10 = vpop.permute.xlu1 %793 }
 0x2ba   : > { %2227 = vrot.lane.b32.xlu1 %v5719_v27, %s5345_s25  ;;  %4495 = vmatpush3.xpose.msk.msra.mxu1 %vm801_vm1, %v798_v50 }
 0x2bb   : > { %1905 = vrot.lane.b32.xlu0 %v5721_v30, %s5344_s24  ;;  %4496 = vmatprep.subr.msk.mxu1 %vm801_vm1, %v796_v56 }
 0x2bc   : > { %v790_v59 = vpop.permute.xlu1 %789 }
 0x2bd   : > { %v788_v58 = vpop.permute.xlu0 %787 }
 0x2be   : > { %4497 = vmatpush3.xpose.msk.msra.mxu1 %vm801_vm1, %v796_v56 }
 0x2bf   : > { %1903 = vrot.lane.b32.xlu0 %v5717_v26, %s5344_s24  ;;  %4498 = vmatprep.subr.msk.mxu1 %vm801_vm1, %v794_v10 }
 0x2c0   : > { %v786_v60 = vpop.permute.xlu1 %785 }
 0x2c1   : > { %v784_v28 = vpop.permute.xlu0 %783 }
 0x2c2   : > { %4499 = vmatpush3.xpose.msk.msra.mxu1 %vm801_vm1, %v794_v10 }
 0x2c3   : > { %1899 = vrot.lane.b32.xlu0 %v5709_v48, %s5344_s24  ;;  %4500 = vmatprep.subr.msk.mxu1 %vm801_vm1, %v792_v57 }
 0x2c4   : > { %v782_v63 = vpop.permute.xlu1 %781 }
 0x2c5   : > { %v780_v29 = vpop.permute.xlu0 %779 }
 0x2c6   : > { %4501 = vmatpush3.xpose.msk.msra.mxu1 %vm801_vm1, %v792_v57 }
 0x2c7   : > { %1897 = vrot.lane.b32.xlu0 %v5705_v19, %s5344_s24  ;;  %4502 = vmatprep.subr.msk.mxu1 %vm801_vm1, %v790_v59 }
 0x2c8   : > { %v778_v3 = vpop.permute.xlu1 %777 }
 0x2c9   : > { %v776_v36 = vpop.permute.xlu0 %775 }
 0x2ca   : > { %4503 = vmatpush3.xpose.msk.msra.mxu1 %vm801_vm1, %v790_v59 }
 0x2cb   : > { %1895 = vrot.lane.b32.xlu0 %v5701_v18, %s5344_s24  ;;  %4504 = vmatprep.subr.msk.mxu1 %vm801_vm1, %v788_v58 }
 0x2cc   : > { %v774_v17 = vpop.permute.xlu1 %773 }
 0x2cd   : > { %v772_v11 = vpop.permute.xlu0 %771 }
 0x2ce   : > { %4505 = vmatpush3.xpose.msk.msra.mxu1 %vm801_vm1, %v788_v58 }
 0x2cf   : > { %1893 = vrot.lane.b32.xlu0 %v5697_v52, %s5344_s24  ;;  %4506 = vmatprep.subr.msk.mxu1 %vm801_vm1, %v786_v60 }
 0x2d0   : > { %v770_v6 = vpop.permute.xlu1 %769 }
 0x2d1   : > { %v1459_v61 = vpop.permute.xlu0 %1458 }
 0x2d2   : > { %4507 = vmatpush3.xpose.msk.msra.mxu1 %vm801_vm1, %v786_v60 }
 0x2d3   : > { %2241 = vrot.lane.b32.xlu0 %v5747_v24, %s5345_s25  ;;  %4508 = vmatprep.subr.msk.mxu1 %vm801_vm1, %v784_v28 }
 0x2d4   : > { %v1457_v9 = vpop.permute.xlu1 %1456 }
 0x2d5   : > { %v1455_v62 = vpop.permute.xlu0 %1454 }
 0x2d6   : > { %4509 = vmatpush3.xpose.msk.msra.mxu1 %vm801_vm1, %v784_v28 }
 0x2d7   : > { %2237 = vrot.lane.b32.xlu0 %v5739_v40, %s5345_s25  ;;  %4510 = vmatprep.subr.msk.mxu1 %vm801_vm1, %v782_v63 }
 0x2d8   : > { %v1453_v38 = vpop.permute.xlu1 %1452 }
 0x2d9   : > { %v1451_v23 = vpop.permute.xlu0 %1450 }
 0x2da   : > { %4511 = vmatpush3.xpose.msk.msra.mxu1 %vm801_vm1, %v782_v63 }
 0x2db   : > { %2233 = vrot.lane.b32.xlu0 %v5731_v55, %s5345_s25  ;;  %4512 = vmatprep.subr.msk.mxu1 %vm801_vm1, %v780_v29 }
 0x2dc   : > { %v1449_v51 = vpop.permute.xlu1 %1448 }
 0x2dd   : > { %v5954_v2 = vpop.permute.xlu0 %1446 }
 0x2de   : > { %4513 = vmatpush3.xpose.msk.msra.mxu1 %vm801_vm1, %v780_v29 }
 0x2df   : > { %2229 = vrot.lane.b32.xlu0 %v5723_v31, %s5345_s25  ;;  %4514 = vmatprep.subr.msk.mxu1 %vm801_vm1, %v778_v3 }
 0x2e0   : > { %v1445_v53 = vpop.permute.xlu1 %1444 }
 0x2e1   : > { %v5960_v4 = vpop.permute.xlu0 %1442 }
 0x2e2   : > { %4515 = vmatpush3.xpose.msk.msra.mxu1 %vm801_vm1, %v778_v3 }
 0x2e3   : > { %2225 = vrot.lane.b32.xlu0 %v5715_v54, %s5345_s25  ;;  %4516 = vmatprep.subr.msk.mxu1 %vm801_vm1, %v776_v36 }
 0x2e4   : > { %v1441_v58 = vpop.permute.xlu1 %1440 }
 0x2e5   : > { %v5966_v44 = vpop.permute.xlu0 %1438 }
 0x2e6   : > { %4517 = vmatpush3.xpose.msk.msra.mxu1 %vm801_vm1, %v776_v36 }
 0x2e7   : > { %2223 = vrot.lane.b32.xlu0 %v5711_v22, %s5345_s25  ;;  %4518 = vmatprep.subr.msk.mxu1 %vm801_vm1, %v774_v17 }
 0x2e8   : > { %v1437_v28 = vpop.permute.xlu1 %1436 }
 0x2e9   : > { %v5972_v37 = vpop.permute.xlu0 %1434 }
 0x2ea   : > { %4519 = vmatpush3.xpose.msk.msra.mxu1 %vm801_vm1, %v774_v17 }
 0x2eb   : > { %2221 = vrot.lane.b32.xlu0 %v5707_v8, %s5345_s25  ;;  %4520 = vmatprep.subr.msk.mxu1 %vm801_vm1, %v772_v11 }
 0x2ec   : > { %v1433_v36 = vpop.permute.xlu1 %1432 }
 0x2ed   : > { %v5978_v5 = vpop.permute.xlu0 %1430 }
 0x2ee   : > { %4521 = vmatpush3.xpose.msk.msra.mxu1 %vm801_vm1, %v772_v11 }
 0x2ef   : > { %2245 = vrot.lane.b32.xlu0 %v5757_v49, %s5345_s25  ;;  %4522 = vmatprep.subr.msk.mxu1 %vm801_vm1, %v770_v6 }
 0x2f0   : > { %v1429_v60 = vpop.permute.xlu1 %1428 }
 0x2f1   : > { %v1397_v35 = vpop.permute.xlu0 %1396 }
 0x2f2   : > { %4523 = vmatpush3.xpose.msk.msra.mxu1 %vm801_vm1, %v770_v6 }
 0x2f3   : > { %1923 = vrot.lane.b32.xlu0 %v5763_v1, %s5344_s24  ;;  %4604 = vmatprep.subr.msk.mxu1 %vm801_vm1, %v1459_v61 }
 0x2f4   : > { %v1399_v63 = vpop.permute.xlu1 %1398 }
 0x2f5   : > { %v5988_v7 = vpop.permute.xlu0 %1400  ;;  %4525 = vmatmul.mubr.msk.f32.vlgmr.msra.gmra.mxu1 %vm801_vm1, %v5699_v15 }
 0x2f6   : > { %4527 = vmatprep.mubr.msk.f32.mxu1 %vm801_vm1, %v5703_v43  ;;  %4605 = vmatpush3.xpose.msk.msra.mxu1 %vm801_vm1, %v1459_v61 }
 0x2f7   : > { %4606 = vmatprep.subr.msk.mxu1 %vm801_vm1, %v1457_v9 }
 0x2f9   : > { %v5996_v12 = vpop.permute.xlu0 %1404  ;;  %4528 = vmatmul.mubr.msk.f32.gmra.mxu1 %vm801_vm1, %v5707_v8 }
 0x2fa   : > { %4530 = vmatprep.mubr.msk.f32.mxu1 %vm801_vm1, %v5711_v22  ;;  %4607 = vmatpush3.xpose.msk.msra.mxu1 %vm801_vm1, %v1457_v9 }
 0x2fb   : > { %4608 = vmatprep.subr.msk.mxu1 %vm801_vm1, %v1455_v62 }
 0x2fd   : > { %v6004_v13 = vpop.permute.xlu0 %1408  ;;  %4531 = vmatmul.mubr.msk.f32.gmra.mxu1 %vm801_vm1, %v5715_v54 }
 0x2fe   : > { %4533 = vmatprep.mubr.msk.f32.mxu1 %vm801_vm1, %v5719_v27  ;;  %4609 = vmatpush3.xpose.msk.msra.mxu1 %vm801_vm1, %v1455_v62 }
 0x2ff   : > { %4610 = vmatprep.subr.msk.mxu1 %vm801_vm1, %v1453_v38 }
 0x301   : > { %v6012_v45 = vpop.permute.xlu0 %1412  ;;  %4534 = vmatmul.mubr.msk.f32.gmra.mxu1 %vm801_vm1, %v5723_v31 }
 0x302   : > { %4536 = vmatprep.mubr.msk.f32.mxu1 %vm801_vm1, %v5727_v33  ;;  %4611 = vmatpush3.xpose.msk.msra.mxu1 %vm801_vm1, %v1453_v38 }
 0x303   : > { %4612 = vmatprep.subr.msk.mxu1 %vm801_vm1, %v1451_v23 }
 0x305   : > { %v6020_v50 = vpop.permute.xlu0 %1416  ;;  %4537 = vmatmul.mubr.msk.f32.gmra.mxu1 %vm801_vm1, %v5731_v55 }
 0x306   : > { %4539 = vmatprep.mubr.msk.f32.mxu1 %vm801_vm1, %v5735_v21  ;;  %4613 = vmatpush3.xpose.msk.msra.mxu1 %vm801_vm1, %v1451_v23 }
 0x307   : > { %4614 = vmatprep.subr.msk.mxu1 %vm801_vm1, %v1449_v51 }
 0x309   : > { %v6028_v56 = vpop.permute.xlu0 %1420  ;;  %4540 = vmatmul.mubr.msk.f32.gmra.mxu1 %vm801_vm1, %v5739_v40 }
 0x30a   : > { %4542 = vmatprep.mubr.msk.f32.mxu1 %vm801_vm1, %v5743_v42  ;;  %4615 = vmatpush3.xpose.msk.msra.mxu1 %vm801_vm1, %v1449_v51 }
 0x30b   : > { %4616 = vmatprep.subr.msk.mxu1 %vm801_vm1, %v5954_v2 }
 0x30d   : > { %v6037_v57 = vpop.permute.xlu0 %1424  ;;  %4543 = vmatmul.mubr.msk.f32.gmra.mxu1 %vm801_vm1, %v5747_v24 }
 0x30e   : > { %4545 = vmatprep.mubr.msk.f32.mxu1 %vm801_vm1, %v5751_v25  ;;  %4617 = vmatpush3.xpose.msk.msra.mxu1 %vm801_vm1, %v5954_v2  ;;  %v1403_v2 = vpop.permute.xlu1 %1402 }
 0x30f   : > { %4618 = vmatprep.subr.msk.mxu1 %vm801_vm1, %v1445_v53 }
 0x311   : > { %v6046_v10 = vpop.permute.xlu0 %1919  ;;  %4546 = vmatmul.mubr.msk.f32.gmra.mxu1 %vm801_vm1, %v5757_v49 }
 0x312   : > { %4619 = vmatpush3.xpose.msk.msra.mxu1 %vm801_vm1, %v1445_v53  ;;  %4636 = vmatprep.mubr.msk.f32.mxu1 %vm801_vm1, %v1397_v35 }
 0x313   : > { %4620 = vmatprep.subr.msk.mxu1 %vm801_vm1, %v5960_v4 }
 0x315   : > { %v6054_v29 = vpop.permute.xlu0 %1917 }
 0x316   : > { %4621 = vmatpush3.xpose.msk.msra.mxu1 %vm801_vm1, %v5960_v4 }
 0x317   : > { %4622 = vmatprep.subr.msk.mxu1 %vm801_vm1, %v1441_v58 }
 0x319   : > { %v6059_v59 = vpop.permute.xlu0 %1915 }
 0x31a   : > { %4623 = vmatpush3.xpose.msk.msra.mxu1 %vm801_vm1, %v1441_v58 }
 0x31b   : > { %4624 = vmatprep.subr.msk.mxu1 %vm801_vm1, %v5966_v44 }
 0x31d   : > { %v6064_v11 = vpop.permute.xlu0 %1913 }
 0x31e   : > { %4625 = vmatpush3.xpose.msk.msra.mxu1 %vm801_vm1, %v5966_v44  ;;  %v1407_v44 = vpop.permute.xlu1 %1406 }
 0x31f   : > { %4626 = vmatprep.subr.msk.mxu1 %vm801_vm1, %v1437_v28 }
 0x321   : > { %v6069_v61 = vpop.permute.xlu0 %1911 }
 0x322   : > { %4627 = vmatpush3.xpose.msk.msra.mxu1 %vm801_vm1, %v1437_v28 }
 0x323   : > { %4628 = vmatprep.subr.msk.mxu1 %vm801_vm1, %v5972_v37 }
 0x325   : > { %v6074_v62 = vpop.permute.xlu0 %1909 }
 0x326   : > { %4629 = vmatpush3.xpose.msk.msra.mxu1 %vm801_vm1, %v5972_v37  ;;  %v1411_v37 = vpop.permute.xlu1 %1410 }
 0x327   : > { %4630 = vmatprep.subr.msk.mxu1 %vm801_vm1, %v1433_v36 }
 0x329   : > { %v6079_v23 = vpop.permute.xlu0 %1907 }
 0x32a   : > { %4631 = vmatpush3.xpose.msk.msra.mxu1 %vm801_vm1, %v1433_v36  ;;  %v1415_v35 = vpop.permute.xlu1 %1414 }
 0x32b   : > { %4632 = vmatprep.subr.msk.mxu1 %vm801_vm1, %v5978_v5 }
 0x32d   : > { %v6084_v3 = vpop.permute.xlu0 %1905 }
 0x32e   : > { %4633 = vmatpush3.xpose.msk.msra.mxu1 %vm801_vm1, %v5978_v5 }
 0x32f   : > { %4634 = vmatprep.subr.msk.mxu1 %vm801_vm1, %v1429_v60 }
 0x331   : > { %v6089_v4 = vpop.permute.xlu0 %1903 }
 0x332   : > { %4635 = vmatpush3.xpose.msk.msra.mxu1 %vm801_vm1, %v1429_v60  ;;  %v749_v60 = vlaneseq }
 0x335   : > { %v6092_v17 = vpop.permute.xlu0 %1899  ;;  %4637 = vmatmul.mubr.msk.f32.vlgmr.msra.gmra.mxu1 %vm801_vm1, %v1399_v63  ;;  %v750_v63 = vand.u32 127, %v749_v60 }
 0x336   : > { %4639 = vmatprep.mubr.msk.f32.mxu1 %vm801_vm1, %v5988_v7  ;;  %v1419_v7 = vpop.permute.xlu1 %1418 }
 0x337   : > { %vm751_vm2 = vcmp.lt.s32.totalorder %v750_v63, 13 }
 0x339   : > { %v6097_v6 = vpop.permute.xlu0 %1897  ;;  %4640 = vmatmul.mubr.msk.f32.gmra.mxu1 %vm801_vm1, %v1403_v2  ;;  %v5346_v2 = vmov -1e+30  }
 0x33a   : > { %4642 = vmatprep.mubr.msk.f32.mxu1 %vm801_vm1, %v5996_v12 }
 0x33d   : > { %v6102_v5 = vpop.permute.xlu0 %1895  ;;  %4643 = vmatmul.mubr.msk.f32.gmra.mxu1 %vm801_vm1, %v1407_v44  ;;  %v6141_v44 = vsel %vm751_vm2, 0.0, %v5346_v2 }
 0x33e   : > { %4645 = vmatprep.mubr.msk.f32.mxu1 %vm801_vm1, %v6004_v13  ;;  %v1423_v13 = vpop.permute.xlu1 %1422 }
 0x341   : > { %v6107_v9 = vpop.permute.xlu0 %1893  ;;  %4646 = vmatmul.mubr.msk.f32.gmra.mxu1 %vm801_vm1, %v1411_v37 }
 0x342   : > { %4648 = vmatprep.mubr.msk.f32.mxu1 %vm801_vm1, %v6012_v45  ;;  %v1427_v45 = vpop.permute.xlu1 %1426 }
 0x345   : > { %v6112_v38 = vpop.permute.xlu0 %2241  ;;  %4649 = vmatmul.mubr.msk.f32.gmra.mxu1 %vm801_vm1, %v1415_v35 }
 0x346   : > { %7679 = vst [vmem:[#allocation20_spill] sm:$0xff] %v6112_v38  ;;  %4651 = vmatprep.mubr.msk.f32.mxu1 %vm801_vm1, %v6020_v50 }
 0x349   : > { %v6117_v12 = vpop.permute.xlu0 %2237  ;;  %4652 = vmatmul.mubr.msk.f32.gmra.mxu1 %vm801_vm1, %v1419_v7 }
 0x34a   : > { %7680 = vst [vmem:[#allocation21_spill] sm:$0xff] %v6117_v12  ;;  %4654 = vmatprep.mubr.msk.f32.mxu1 %vm801_vm1, %v6028_v56 }
 0x34d   : > { %v6122_v51 = vpop.permute.xlu0 %2233  ;;  %4655 = vmatmul.mubr.msk.f32.gmra.mxu1 %vm801_vm1, %v1423_v13 }
 0x34e   : > { %7681 = vst [vmem:[#allocation22_spill] sm:$0xff] %v6122_v51  ;;  %4657 = vmatprep.mubr.msk.f32.mxu1 %vm801_vm1, %v6037_v57 }
 0x351   : > { %v6127_v53 = vpop.permute.xlu0 %2229  ;;  %4658 = vmatmul.mubr.msk.f32.gmra.mxu1 %vm801_vm1, %v1427_v45 }
 0x352   : > { %7682 = vst [vmem:[#allocation23_spill] sm:$0xff] %v6127_v53 }
 0x355   : > { %v6130_v50 = vpop.permute.xlu0 %2225 }
 0x356   : > { %7683 = vst [vmem:[#allocation24_spill] sm:$0xff] %v6130_v50 }
 0x359   : > { %v6132_v58 = vpop.permute.xlu0 %2223 }
 0x35a   : > { %7684 = vst [vmem:[#allocation25_spill] sm:$0xff] %v6132_v58 }
 0x35d   : > { %v6134_v28 = vpop.permute.xlu0 %2221 }
 0x35e   : > { %7685 = vst [vmem:[#allocation26_spill] sm:$0xff] %v6134_v28 }
 0x361   : > { %v6136_v36 = vpop.permute.xlu0 %2245 }
 0x365   : > { %v6138_v56 = vpop.permute.xlu0 %1923 }
 0x366   : > { %4660 = vmatprep.subr.mxu0 %v6138_v56 }
 0x3b5   : > { %v4526_v57 = vpop.f32.mrf.mxu1 }
 0x3b6   : > { %v1012_v37 = vmul.f32 0.25, %v4526_v57 }
 0x3b7   : > { %v932_v35 = vpop.f32.mrf.mxu1 }
 0x3b8   : > { %v1011_v7 = vmul.f32 0.25, %v932_v35  ;;  %v6144_v13 = vadd.f32 %v1012_v37, %v6141_v44 }
 0x3b9   : > { %v4529_v45 = vpop.f32.mrf.mxu1 }
 0x3ba   : > { %v6147_v28 = vadd.f32 %v1011_v7, %v6141_v44  ;;  %v1014_v58 = vmul.f32 0.25, %v4529_v45  ;;  %1045 = vmax.xlane.f32.xlu1 %v6144_v13 }
 0x3bb   : > { %v942_v50 = vpop.f32.mrf.mxu1 }
 0x3bc   : > { %1043 = vmax.xlane.f32.xlu0 %v6147_v28  ;;  %v6152_v63 = vadd.f32 %v1014_v58, %v6141_v44  ;;  %v1013_v57 = vmul.f32 0.25, %v942_v50 }
 0x3bd   : > { %v4532_v60 = vpop.f32.mrf.mxu1 }
 0x3be   : > { %v1016_v2 = vmul.f32 0.25, %v4532_v60  ;;  %v6159_v45 = vadd.f32 %v1013_v57, %v6141_v44 }
 0x3bf   : > { %v952_v35 = vpop.f32.mrf.mxu1 }
 0x3c0   : > { %v6155_v37 = vadd.f32 %v1016_v2, %v6141_v44  ;;  %1049 = vmax.xlane.f32.xlu0 %v6152_v63  ;;  %v1015_v53 = vmul.f32 0.25, %v952_v35 }
 0x3c1   : > { %v4535_v7 = vpop.f32.mrf.mxu1 }
 0x3c2   : > { %v1018_v51 = vmul.f32 0.25, %v4535_v7  ;;  %1053 = vmax.xlane.f32.xlu1 %v6155_v37  ;;  %v6167_v60 = vadd.f32 %v1015_v53, %v6141_v44 }
 0x3c3   : > { %v962_v12 = vpop.f32.mrf.mxu1 }
 0x3c4   : > { %v6163_v58 = vadd.f32 %v1018_v51, %v6141_v44  ;;  %1047 = vmax.xlane.f32.xlu0 %v6159_v45  ;;  %v1017_v2 = vmul.f32 0.25, %v962_v12 }
 0x3c5   : > { %v4538_v50 = vpop.f32.mrf.mxu1 }
 0x3c6   : > { %v1020_v38 = vmul.f32 0.25, %v4538_v50  ;;  %1057 = vmax.xlane.f32.xlu1 %v6163_v58  ;;  %v6175_v51 = vadd.f32 %v1017_v2, %v6141_v44 }
 0x3c7   : > { %v972_v57 = vpop.f32.mrf.mxu1 }
 0x3c8   : > { %v6171_v35 = vadd.f32 %v1020_v38, %v6141_v44  ;;  %1051 = vmax.xlane.f32.xlu0 %v6167_v60  ;;  %v1019_v52 = vmul.f32 0.25, %v972_v57 }
 0x3c9   : > { %v4541_v7 = vpop.f32.mrf.mxu1 }
 0x3ca   : > { %v1022_v19 = vmul.f32 0.25, %v4541_v7  ;;  %1061 = vmax.xlane.f32.xlu1 %v6171_v35  ;;  %v6183_v38 = vadd.f32 %v1019_v52, %v6141_v44 }
 0x3cb   : > { %v982_v53 = vpop.f32.mrf.mxu1 }
 0x3cc   : > { %v6179_v12 = vadd.f32 %v1022_v19, %v6141_v44  ;;  %1055 = vmax.xlane.f32.xlu0 %v6175_v51  ;;  %v1021_v16 = vmul.f32 0.25, %v982_v53 }
 0x3cd   : > { %v4544_v50 = vpop.f32.mrf.mxu1 }
 0x3ce   : > { %v1024_v18 = vmul.f32 0.25, %v4544_v50  ;;  %1065 = vmax.xlane.f32.xlu1 %v6179_v12  ;;  %v6191_v19 = vadd.f32 %v1021_v16, %v6141_v44 }
 0x3cf   : > { %v992_v2 = vpop.f32.mrf.mxu1 }
 0x3d0   : > { %v6187_v57 = vadd.f32 %v1024_v18, %v6141_v44  ;;  %1059 = vmax.xlane.f32.xlu0 %v6183_v38  ;;  %v1023_v30 = vmul.f32 0.25, %v992_v2 }
 0x3d1   : > { %v4547_v7 = vpop.f32.mrf.mxu1 }
 0x3d2   : > { %v1026_v48 = vmul.f32 0.25, %v4547_v7  ;;  %1069 = vmax.xlane.f32.xlu1 %v6187_v57  ;;  %v6199_v50 = vadd.f32 %v1023_v30, %v6141_v44 }
 0x3d3   : > { %v1002_v52 = vpop.f32.mrf.mxu1 }
 0x3d4   : > { %v6195_v53 = vadd.f32 %v1026_v48, %v6141_v44  ;;  %1063 = vmax.xlane.f32.xlu0 %v6191_v19  ;;  %v1025_v18 = vmul.f32 0.25, %v1002_v52 }
 0x3d6   : > { %1073 = vmax.xlane.f32.xlu1 %v6195_v53  ;;  %v6204_v16 = vadd.f32 %v1025_v18, %v6141_v44 }
 0x3d8   : > { %1067 = vmax.xlane.f32.xlu0 %v6199_v50 }
 0x3dc   : > { %1071 = vmax.xlane.f32.xlu0 %v6204_v16 }
 0x3f5   : > { %v4638_v2 = vpop.f32.mrf.mxu1 }
 0x3f6   : > { %v1670_v7 = vmul.f32 0.25, %v4638_v2 }
 0x3f7   : > { %v1590_v34 = vpop.f32.mrf.mxu1 }
 0x3f8   : > { %v6208_v48 = vadd.f32 %v1670_v7, %v6141_v44  ;;  %v1669_v26 = vmul.f32 0.25, %v1590_v34 }
 0x3f9   : > { %v4641_v39 = vpop.f32.mrf.mxu1 }
 0x3fa   : > { %7686 = vst [vmem:[#allocation27_spill] sm:$0xff] %v6208_v48  ;;  %1703 = vmax.xlane.f32.xlu1 %v6208_v48  ;;  %v6212_v52 = vadd.f32 %v1669_v26, %v6141_v44  ;;  %v1672_v32 = vmul.f32 0.25, %v4641_v39 }
 0x3fb   : > { %v1600_v30 = vpop.f32.mrf.mxu1 }
 0x3fc   : > { %7687 = vst [vmem:[#allocation28_spill] sm:$0xff] %v6212_v52  ;;  %v1671_v41 = vmul.f32 0.25, %v1600_v30  ;;  %v6219_v7 = vadd.f32 %v1672_v32, %v6141_v44 }
 0x3fd   : > { %v4644_v18 = vpop.f32.mrf.mxu1 }
 0x3fe   : > { %v6215_v20 = vadd.f32 %v1671_v41, %v6141_v44  ;;  %1701 = vmax.xlane.f32.xlu1 %v6212_v52  ;;  %7689 = vst [vmem:[#allocation30_spill] sm:$0xff] %v6219_v7  ;;  %v1674_v34 = vmul.f32 0.25, %v4644_v18 }
 0x3ff   : > { %v1610_v2 = vpop.f32.mrf.mxu1 }
 0x400   : > { %7688 = vst [vmem:[#allocation29_spill] sm:$0xff] %v6215_v20  ;;  %1705 = vmax.xlane.f32.xlu0 %v6215_v20  ;;  %v6224_v39 = vadd.f32 %v1674_v34, %v6141_v44  ;;  %v1673_v30 = vmul.f32 0.25, %v1610_v2 }
 0x401   : > { %v4647_v48 = vpop.f32.mrf.mxu1 }
 0x402   : > { %1707 = vmax.xlane.f32.xlu1 %v6219_v7  ;;  %7690 = vst [vmem:[#allocation31_spill] sm:$0xff] %v6224_v39  ;;  %v6228_v52 = vadd.f32 %v1673_v30, %v6141_v44  ;;  %v1676_v32 = vmul.f32 0.25, %v4647_v48 }
 0x403   : > { %v1620_v26 = vpop.f32.mrf.mxu1 }
 0x404   : > { %7691 = vst [vmem:[#allocation32_spill] sm:$0xff] %v6228_v52  ;;  %v6232_v18 = vadd.f32 %v1676_v32, %v6141_v44 }
 0x405   : > { %v4650_v46 = vpop.f32.mrf.mxu1 }
 0x406   : > { %1711 = vmax.xlane.f32.xlu1 %v6224_v39  ;;  %7692 = vst [vmem:[#allocation33_spill] sm:$0xff] %v6232_v18  ;;  %v1678_v7 = vmul.f32 0.25, %v4650_v46 }
 0x407   : > { %v1630_v41 = vpop.f32.mrf.mxu1 }
 0x408   : > { %v6236_v2 = vadd.f32 %v1678_v7, %v6141_v44  ;;  %v1677_v34 = vmul.f32 0.25, %v1630_v41  ;;  %v6249_v7 = vpop.permute.xlu1 %1921 }
 0x409   : > { %v4653_v0 = vpop.f32.mrf.mxu1 }
 0x40a   : > { %1709 = vmax.xlane.f32.xlu1 %v6228_v52  ;;  %7693 = vst [vmem:[#allocation34_spill] sm:$0xff] %v6236_v2  ;;  %v6240_v30 = vadd.f32 %v1677_v34, %v6141_v44  ;;  %v1680_v48 = vmul.f32 0.25, %v4653_v0 }
 0x40b   : > { %v1640_v20 = vpop.f32.mrf.mxu1 }
 0x40c   : > { %7694 = vst [vmem:[#allocation35_spill] sm:$0xff] %v6240_v30  ;;  %v6246_v46 = vadd.f32 %v1680_v48, %v6141_v44  ;;  %v6255_v0 = vpop.permute.xlu1 %1901 }
 0x40d   : > { %v4656_v39 = vpop.f32.mrf.mxu1 }
 0x40e   : > { %1715 = vmax.xlane.f32.xlu1 %v6232_v18  ;;  %7695 = vst [vmem:[#allocation36_spill] sm:$0xff] %v6246_v46 }
 0x40f   : > { %v1650_v49 = vpop.f32.mrf.mxu1 }
 0x410   : > { %v1681_v32 = vmul.f32 0.25, %v1650_v49  ;;  %v6257_v34 = vpop.permute.xlu1 %2243 }
 0x411   : > { %7697 = vst [vmem:[#allocation38_spill] sm:$0xff] %v6257_v34  ;;  %v4659_v18 = vpop.f32.mrf.mxu1 }
 0x412   : > { %1719 = vmax.xlane.f32.xlu1 %v6236_v2  ;;  %v6252_v41 = vadd.f32 %v1681_v32, %v6141_v44 }
 0x413   : > { %v1660_v52 = vpop.f32.mrf.mxu1 }
 0x414   : > { %7696 = vst [vmem:[#allocation37_spill] sm:$0xff] %v6252_v41  ;;  %v6259_v2 = vpop.permute.xlu1 %2239 }
 0x415   : > { %7698 = vst [vmem:[#allocation39_spill] sm:$0xff] %v6259_v2  ;;  %v1684_v2 = vmul.f32 0.25, %v4659_v18 }
 0x416   : > { %1717 = vmax.xlane.f32.xlu1 %v6240_v30  ;;  %2219 = vrot.lane.b32.xlu0 %v5703_v43, %s5345_s25  ;;  %v1675_v30 = vmul.f32 0.25, %v1620_v26 }
 0x418   : > { %v6263_v49 = vpop.permute.xlu1 %2235  ;;  %v6266_v48 = vadd.f32 %v1675_v30, %v6141_v44 }
 0x419   : > { %7699 = vst [vmem:[#allocation40_spill] sm:$0xff] %v6263_v49 }
 0x41a   : > { %1723 = vmax.xlane.f32.xlu1 %v6246_v46  ;;  %7700 = vst [vmem:[#allocation41_spill] sm:$0xff] %v6266_v48  ;;  %v1679_v46 = vmul.f32 0.25, %v1640_v20  ;;  %v6282_v20 = vadd.f32 %v1684_v2, %v6141_v44 }
 0x41c   : > { %v6270_v32 = vadd.f32 %v1679_v46, %v6141_v44  ;;  %v6272_v34 = vpop.permute.xlu1 %2231  ;;  %7705 = vst [vmem:[#allocation46_spill] sm:$0xff] %v6282_v20 }
 0x41d   : > { %7702 = vst [vmem:[#allocation43_spill] sm:$0xff] %v6272_v34 }
 0x41e   : > { %1725 = vmax.xlane.f32.xlu1 %v6252_v41  ;;  %7701 = vst [vmem:[#allocation42_spill] sm:$0xff] %v6270_v32  ;;  %v1682_v41 = vmul.f32 0.25, %v4656_v39 }
 0x420   : > { %v6276_v26 = vadd.f32 %v1682_v41, %v6141_v44  ;;  %v6279_v30 = vpop.permute.xlu1 %2227 }
 0x421   : > { %7704 = vst [vmem:[#allocation45_spill] sm:$0xff] %v6279_v30  ;;  %v1683_v30 = vmul.f32 0.25, %v1660_v52 }
 0x422   : > { %7703 = vst [vmem:[#allocation44_spill] sm:$0xff] %v6276_v26 }
 0x42f   : > { %2215 = vrot.lane.b32.xlu1 %v5693_v14, %s5345_s25 }
 0x435   : > { %1713 = vmax.xlane.f32.xlu0 %v6266_v48 }
 0x439   : > { %1721 = vmax.xlane.f32.xlu0 %v6270_v32 }
 0x43d   : > { %1727 = vmax.xlane.f32.xlu0 %v6276_v26 }
 0x441   : > { %1731 = vmax.xlane.f32.xlu0 %v6282_v20 }
 0x443   : > { %v1046_v46 = vpop.xlane.xlu1 %1045 }
 0x444   : > { %v1076_v39 = vsub.f32 %v6144_v13, %v1046_v46 }
 0x445   : > { %v1044_v48 = vpop.xlane.xlu0 %1043 }
 0x446   : > { %v1075_v34 = vsub.f32 %v6147_v28, %v1044_v48  ;;  %v1093_v32 = vmul.f32 1.442695, %v1076_v39  ;;  %v6291_v28 = vadd.f32 %v1683_v30, %v6141_v44 }
 0x448   : > { %v1091_v49 = vmul.f32 1.442695, %v1075_v34 }
 0x449   : > { %v1050_v41 = vpop.xlane.xlu0 %1049 }
 0x44a   : > { %5061 = vpow2.f32 %v1091_v49  ;;  %v1078_v18 = vsub.f32 %v6152_v63, %v1050_v41 }
 0x44b   : > { %5063 = vpow2.f32 %v1093_v32  ;;  %v1054_v26 = vpop.xlane.xlu1 %1053 }
 0x44c   : > { %v1097_v20 = vmul.f32 1.442695, %v1078_v18  ;;  %v1080_v13 = vsub.f32 %v6155_v37, %v1054_v26 }
 0x44d   : > { %v1048_v2 = vpop.xlane.xlu0 %1047 }
 0x44e   : > { %v1077_v47 = vsub.f32 %v6159_v45, %v1048_v2  ;;  %v1101_v63 = vmul.f32 1.442695, %v1080_v13 }
 0x44f   : > { %v1058_v24 = vpop.xlane.xlu1 %1057 }
 0x450   : > { %v1095_v46 = vmul.f32 1.442695, %v1077_v47  ;;  %v1082_v52 = vsub.f32 %v6163_v58, %v1058_v24 }
 0x451   : > { %v1052_v34 = vpop.xlane.xlu0 %1051 }
 0x452   : > { %5065 = vpow2.f32 %v1095_v46  ;;  %v1079_v49 = vsub.f32 %v6167_v60, %v1052_v34  ;;  %v1105_v60 = vmul.f32 1.442695, %v1082_v52 }
 0x453   : > { %5067 = vpow2.f32 %v1097_v20  ;;  %v1062_v48 = vpop.xlane.xlu1 %1061  ;;  %1729 = vmax.xlane.f32.xlu1 %v6291_v28 }
 0x454   : > { %v1099_v45 = vmul.f32 1.442695, %v1079_v49  ;;  %v1084_v20 = vsub.f32 %v6171_v35, %v1062_v48 }
 0x455   : > { %v1056_v32 = vpop.xlane.xlu0 %1055 }
 0x456   : > { %5069 = vpow2.f32 %v1099_v45  ;;  %v1081_v37 = vsub.f32 %v6175_v51, %v1056_v32  ;;  %v1109_v35 = vmul.f32 1.442695, %v1084_v20  ;;  %v7724_v32 = vld [vmem:[#allocation19_spill] sm:$0xff] }
 0x457   : > { %v6297_v47 = vpop.eup %5061  ;;  %v1066_v26 = vpop.xlane.xlu1 %1065  ;;  %2217 = vrot.lane.b32.xlu0 %v5699_v15, %s5345_s25  ;;  %5071 = vpow2.f32 %v1101_v63 }
 0x458   : > { %7706 = vst [vmem:[#allocation47_spill] sm:$0xff] %v6297_v47  ;;  %v6301_v30 = vpop.eup %5063  ;;  %v1103_v39 = vmul.f32 1.442695, %v1081_v37  ;;  %4580 = vmatprep.mubr.f32.mxu0 %v6297_v47  ;;  %v1086_v41 = vsub.f32 %v6179_v12, %v1066_v26  ;;  %v7725_v37 = vld [vmem:[#allocation15_spill] sm:$0xff]  ;;  %v7726_v26 = vld [vmem:[#allocation17_spill] sm:$0xff] }
 0x459   : > { %7707 = vst [vmem:[#allocation48_spill] sm:$0xff] %v6301_v30  ;;  %v1060_v24 = vpop.xlane.xlu0 %1059  ;;  %4581 = vmatmul.mubr.f32.vlgmr.msra.gmra.mxu0 %v6301_v30 }
 0x45a   : > { %5073 = vpow2.f32 %v1103_v39  ;;  %v1083_v58 = vsub.f32 %v6183_v38, %v1060_v24  ;;  %4661 = vmatpush3.msra.mxu0 %v6138_v56  ;;  %v1113_v12 = vmul.f32 1.442695, %v1086_v41  ;;  %v7728_v24 = vld [vmem:[#allocation12_spill] sm:$0xff] }
 0x45b   : > { %4662 = vmatprep.subr.mxu0 %v6249_v7  ;;  %v1070_v51 = vpop.xlane.xlu1 %1069  ;;  %2183 = vrot.lane.b32.xlu0 %v5693_v14, %s5347_s27  ;;  %5075 = vpow2.f32 %v1105_v60  ;;  %v7727_v60 = vld [vmem:[#allocation27_spill] sm:$0xff] }
 0x45c   : > { %v1107_v18 = vmul.f32 1.442695, %v1083_v58  ;;  %4663 = vmatpush3.msra.mxu0 %v6249_v7  ;;  %v1088_v7 = vsub.f32 %v6187_v57, %v1070_v51  ;;  %v7729_v58 = vld [vmem:[#allocation28_spill] sm:$0xff] }
 0x45d   : > { %4664 = vmatprep.subr.mxu0 %v6046_v10  ;;  %v1064_v2 = vpop.xlane.xlu0 %1063 }
 0x45e   : > { %5077 = vpow2.f32 %v1107_v18  ;;  %v1085_v56 = vsub.f32 %v6191_v19, %v1064_v2  ;;  %4665 = vmatpush3.msra.mxu0 %v6046_v10 }
 0x45f   : > { %v6316_v38 = vpop.eup %5065  ;;  %4666 = vmatprep.subr.mxu0 %v6054_v29  ;;  %2187 = vrot.lane.b32.xlu0 %v5703_v43, %s5347_s27  ;;  %5079 = vpow2.f32 %v1109_v35  ;;  %v1074_v19 = vpop.xlane.xlu1 %1073  ;;  %v7730_v35 = vld [vmem:[#allocation14_spill] sm:$0xff] }
 0x460   : > { %7708 = vst [vmem:[#allocation49_spill] sm:$0xff] %v6316_v38  ;;  %v6321_v13 = vpop.eup %5067  ;;  %v1111_v46 = vmul.f32 1.442695, %v1085_v56  ;;  %4667 = vmatpush3.msra.mxu0 %v6054_v29  ;;  %4583 = vmatprep.mubr.f32.mxu0 %v6316_v38  ;;  %v1117_v29 = vmul.f32 1.442695, %v1088_v7  ;;  %v1090_v57 = vsub.f32 %v6195_v53, %v1074_v19  ;;  %v7731_v56 = vld [vmem:[#allocation29_spill] sm:$0xff] }
 0x461   : > { %7709 = vst [vmem:[#allocation50_spill] sm:$0xff] %v6321_v13  ;;  %4668 = vmatprep.subr.mxu0 %v6059_v59  ;;  %v1068_v10 = vpop.xlane.xlu0 %1067  ;;  %4584 = vmatmul.mubr.f32.gmra.mxu0 %v6321_v13 }
 0x462   : > { %5081 = vpow2.f32 %v1111_v46  ;;  %v1087_v34 = vsub.f32 %v6199_v50, %v1068_v10  ;;  %4669 = vmatpush3.msra.mxu0 %v6059_v59  ;;  %v7732_v46 = vld [vmem:[#allocation10_spill] sm:$0xff] }
 0x463   : > { %v6330_v49 = vpop.eup %5069  ;;  %4670 = vmatprep.subr.mxu0 %v6064_v11  ;;  %2191 = vrot.lane.b32.xlu0 %v5711_v22, %s5347_s27  ;;  %5083 = vpow2.f32 %v1113_v12  ;;  %v7733_v10 = vld [vmem:[#allocation30_spill] sm:$0xff] }
 0x464   : > { %7710 = vst [vmem:[#allocation51_spill] sm:$0xff] %v6330_v49  ;;  %v1115_v48 = vmul.f32 1.442695, %v1087_v34  ;;  %4671 = vmatpush3.msra.mxu0 %v6064_v11  ;;  %2185 = vrot.lane.b32.xlu1 %v5699_v15, %s5347_s27  ;;  %v6339_v50 = vpop.eup %5071  ;;  %v1121_v11 = vmul.f32 1.442695, %v1090_v57 }
 0x465   : > { %7711 = vst [vmem:[#allocation52_spill] sm:$0xff] %v6339_v50  ;;  %4586 = vmatprep.mubr.f32.mxu0 %v6330_v49  ;;  %4672 = vmatprep.subr.mxu0 %v6069_v61  ;;  %v1072_v59 = vpop.xlane.xlu0 %1071 }
 0x466   : > { %5085 = vpow2.f32 %v1115_v48  ;;  %v1089_v63 = vsub.f32 %v6204_v16, %v1072_v59  ;;  %4587 = vmatmul.mubr.f32.gmra.mxu0 %v6339_v50  ;;  %v7735_v59 = vld [vmem:[#allocation8_spill] sm:$0xff] }
 0x467   : > { %v6345_v52 = vpop.eup %5073  ;;  %4673 = vmatpush3.msra.mxu0 %v6069_v61  ;;  %2195 = vrot.lane.b32.xlu0 %v5719_v27, %s5347_s27  ;;  %5087 = vpow2.f32 %v1117_v29  ;;  %v7734_v29 = vld [vmem:[#allocation13_spill] sm:$0xff] }
 0x468   : > { %7712 = vst [vmem:[#allocation53_spill] sm:$0xff] %v6345_v52  ;;  %v1119_v53 = vmul.f32 1.442695, %v1089_v63  ;;  %4674 = vmatprep.subr.mxu0 %v6074_v62  ;;  %2189 = vrot.lane.b32.xlu1 %v5707_v8, %s5347_s27  ;;  %v6353_v45 = vpop.eup %5075  ;;  %v7736_v63 = vld [vmem:[#allocation11_spill] sm:$0xff] }
 0x469   : > { %7713 = vst [vmem:[#allocation54_spill] sm:$0xff] %v6353_v45  ;;  %4675 = vmatpush3.msra.mxu0 %v6074_v62  ;;  %4589 = vmatprep.mubr.f32.mxu0 %v6345_v52  ;;  %v7756_v52 = vld [vmem:[#allocation41_spill] sm:$0xff] }
 0x46a   : > { %5089 = vpow2.f32 %v1119_v53  ;;  %4676 = vmatprep.subr.mxu0 %v6079_v23  ;;  %4590 = vmatmul.mubr.f32.gmra.mxu0 %v6353_v45  ;;  %v7760_v45 = vld [vmem:[#allocation36_spill] sm:$0xff] }
 0x46b   : > { %v6359_v61 = vpop.eup %5077  ;;  %4677 = vmatpush3.msra.mxu0 %v6079_v23  ;;  %2199 = vrot.lane.b32.xlu0 %v5727_v33, %s5347_s27  ;;  %5091 = vpow2.f32 %v1121_v11  ;;  %v7737_v11 = vld [vmem:[#allocation31_spill] sm:$0xff] }
 0x46c   : > { %7714 = vst [vmem:[#allocation55_spill] sm:$0xff] %v6359_v61  ;;  %4678 = vmatprep.subr.mxu0 %v6084_v3  ;;  %2193 = vrot.lane.b32.xlu1 %v5715_v54, %s5347_s27  ;;  %v6367_v62 = vpop.eup %5079 }
 0x46d   : > { %7715 = vst [vmem:[#allocation56_spill] sm:$0xff] %v6367_v62  ;;  %4679 = vmatpush3.msra.mxu0 %v6084_v3  ;;  %4592 = vmatprep.mubr.f32.mxu0 %v6359_v61  ;;  %v7755_v61 = vld [vmem:[#allocation45_spill] sm:$0xff] }
 0x46e   : > { %4680 = vmatprep.subr.mxu0 %v6089_v4  ;;  %4593 = vmatmul.mubr.f32.gmra.mxu0 %v6367_v62 }
 0x46f   : > { %v6373_v23 = vpop.eup %5081  ;;  %4681 = vmatpush3.msra.mxu0 %v6089_v4  ;;  %2203 = vrot.lane.b32.xlu0 %v5735_v21, %s5347_s27 }
 0x470   : > { %7716 = vst [vmem:[#allocation57_spill] sm:$0xff] %v6373_v23  ;;  %4682 = vmatprep.subr.mxu0 %v6255_v0  ;;  %2197 = vrot.lane.b32.xlu1 %v5723_v31, %s5347_s27  ;;  %v6381_v16 = vpop.eup %5083 }
 0x471   : > { %7717 = vst [vmem:[#allocation58_spill] sm:$0xff] %v6381_v16  ;;  %4683 = vmatpush3.msra.mxu0 %v6255_v0  ;;  %4595 = vmatprep.mubr.f32.mxu0 %v6373_v23 }
 0x472   : > { %4684 = vmatprep.subr.mxu0 %v6092_v17  ;;  %4596 = vmatmul.mubr.f32.gmra.mxu0 %v6381_v16 }
 0x473   : > { %v6387_v3 = vpop.eup %5085  ;;  %4685 = vmatpush3.msra.mxu0 %v6092_v17  ;;  %2207 = vrot.lane.b32.xlu0 %v5743_v42, %s5347_s27 }
 0x474   : > { %7718 = vst [vmem:[#allocation59_spill] sm:$0xff] %v6387_v3  ;;  %4686 = vmatprep.subr.mxu0 %v6097_v6  ;;  %2201 = vrot.lane.b32.xlu1 %v5731_v55, %s5347_s27  ;;  %v6395_v4 = vpop.eup %5087 }
 0x475   : > { %7719 = vst [vmem:[#allocation60_spill] sm:$0xff] %v6395_v4  ;;  %4687 = vmatpush3.msra.mxu0 %v6097_v6  ;;  %4598 = vmatprep.mubr.f32.mxu0 %v6387_v3  ;;  %v7722_v6 = vld [vmem:[#allocation16_spill] sm:$0xff]  ;;  %v7754_v3 = vld [vmem:[#allocation35_spill] sm:$0xff] }
 0x476   : > { %4688 = vmatprep.subr.mxu0 %v6102_v5  ;;  %4599 = vmatmul.mubr.f32.gmra.mxu0 %v6395_v4 }
 0x477   : > { %v6401_v0 = vpop.eup %5089  ;;  %4689 = vmatpush3.msra.mxu0 %v6102_v5  ;;  %2211 = vrot.lane.b32.xlu0 %v5751_v25, %s5347_s27  ;;  %v7723_v5 = vld [vmem:[#allocation18_spill] sm:$0xff] }
 0x478   : > { %7720 = vst [vmem:[#allocation61_spill] sm:$0xff] %v6401_v0  ;;  %4690 = vmatprep.subr.mxu0 %v6107_v9  ;;  %2205 = vrot.lane.b32.xlu1 %v5739_v40, %s5347_s27  ;;  %v6409_v17 = vpop.eup %5091 }
 0x479   : > { %7721 = vst [vmem:[#allocation62_spill] sm:$0xff] %v6409_v17  ;;  %4691 = vmatpush3.msra.mxu0 %v6107_v9  ;;  %4601 = vmatprep.mubr.f32.mxu0 %v6401_v0 }
 0x47a   : > { %4716 = vmatprep.subr.msk.mxu0 %vm801_vm1, %v6136_v36  ;;  %4602 = vmatmul.mubr.f32.gmra.mxu0 %v6409_v17 }
 0x47b   : > { %2694 = vrot.lane.b32.xlu0 %v5763_v1, %s5347_s27 }
 0x47c   : > { %2209 = vrot.lane.b32.xlu1 %v7722_v6, %s5347_s27 }
 0x47f   : > { %2692 = vrot.lane.b32.xlu0 %v7723_v5, %s5347_s27 }
 0x480   : > { %2213 = vrot.lane.b32.xlu1 %v7724_v32, %s5347_s27 }
 0x483   : > { %v1704_v9 = vpop.xlane.xlu1 %1703  ;;  %2688 = vrot.lane.b32.xlu0 %v7725_v37, %s5347_s27 }
 0x484   : > { %2690 = vrot.lane.b32.xlu1 %v7726_v26, %s5347_s27  ;;  %v1734_v20 = vsub.f32 %v7727_v60, %v1704_v9  ;;  %v7738_v60 = vld [vmem:[#allocation6_spill] sm:$0xff] }
 0x486   : > { %v1751_v41 = vmul.f32 1.442695, %v1734_v20  ;;  %v7739_v20 = vld [vmem:[#allocation32_spill] sm:$0xff] }
 0x487   : > { %v1702_v39 = vpop.xlane.xlu1 %1701  ;;  %2682 = vrot.lane.b32.xlu0 %v7728_v24, %s5347_s27 }
 0x488   : > { %v1733_v51 = vsub.f32 %v7729_v58, %v1702_v39  ;;  %2686 = vrot.lane.b32.xlu1 %v7730_v35, %s5347_s27  ;;  %v7740_v58 = vld [vmem:[#allocation9_spill] sm:$0xff] }
 0x489   : > { %v1706_v18 = vpop.xlane.xlu0 %1705 }
 0x48a   : > { %v1749_v2 = vmul.f32 1.442695, %v1733_v51  ;;  %v1735_v12 = vsub.f32 %v7731_v56, %v1706_v18  ;;  %v7741_v18 = vld [vmem:[#allocation4_spill] sm:$0xff] }
 0x48b   : > { %v1708_v7 = vpop.xlane.xlu1 %1707  ;;  %2678 = vrot.lane.b32.xlu0 %v7732_v46, %s5347_s27 }
 0x48c   : > { %5093 = vpow2.f32 %v1749_v2  ;;  %v1753_v19 = vmul.f32 1.442695, %v1735_v12  ;;  %v1736_v34 = vsub.f32 %v7733_v10, %v1708_v7  ;;  %2684 = vrot.lane.b32.xlu1 %v7734_v29, %s5347_s27  ;;  %v7742_v2 = vld [vmem:[#allocation7_spill] sm:$0xff] }
 0x48d   : > { %5095 = vpow2.f32 %v1751_v41 }
 0x48e   : > { %5097 = vpow2.f32 %v1753_v19  ;;  %v1755_v57 = vmul.f32 1.442695, %v1736_v34  ;;  %v7743_v19 = vld [vmem:[#allocation5_spill] sm:$0xff]  ;;  %v7744_v34 = vld [vmem:[#allocation38_spill] sm:$0xff] }
 0x48f   : > { %v1712_v48 = vpop.xlane.xlu1 %1711  ;;  %2674 = vrot.lane.b32.xlu0 %v7735_v59, %s5347_s27 }
 0x490   : > { %5099 = vpow2.f32 %v1755_v57  ;;  %2680 = vrot.lane.b32.xlu1 %v7736_v63, %s5347_s27  ;;  %v1738_v53 = vsub.f32 %v7737_v11, %v1712_v48  ;;  %v7746_v57 = vld [vmem:[#allocation20_spill] sm:$0xff]  ;;  %v7747_v11 = vld [vmem:[#allocation39_spill] sm:$0xff] }
 0x492   : > { %v1759_v51 = vmul.f32 1.442695, %v1738_v53 }
 0x493   : > { %v1710_v9 = vpop.xlane.xlu1 %1709  ;;  %2670 = vrot.lane.b32.xlu0 %v7738_v60, %s5347_s27 }
 0x494   : > { %v1737_v39 = vsub.f32 %v7739_v20, %v1710_v9  ;;  %2676 = vrot.lane.b32.xlu1 %v7740_v58, %s5347_s27  ;;  %v7748_v9 = vld [vmem:[#allocation21_spill] sm:$0xff] }
 0x496   : > { %v1757_v41 = vmul.f32 1.442695, %v1737_v39  ;;  %v7749_v39 = vld [vmem:[#allocation40_spill] sm:$0xff] }
 0x497   : > { %2666 = vrot.lane.b32.xlu0 %v7741_v18, %s5347_s27  ;;  %v1716_v20 = vpop.xlane.xlu1 %1715 }
 0x498   : > { %5101 = vpow2.f32 %v1757_v41  ;;  %2672 = vrot.lane.b32.xlu1 %v7742_v2, %s5347_s27  ;;  %v7750_v41 = vld [vmem:[#allocation22_spill] sm:$0xff] }
 0x499   : > { %v6454_v56 = vpop.eup %5093  ;;  %5103 = vpow2.f32 %v1759_v51 }
 0x49a   : > { %v6456_v12 = vpop.eup %5095  ;;  %4692 = vmatprep.mubr.f32.mxu0 %v6454_v56 }
 0x49b   : > { %v6459_v7 = vpop.eup %5097  ;;  %3016 = vrot.lane.b32.xlu0 %v7724_v32, %s5348_s28  ;;  %4693 = vmatmul.mubr.f32.vlgmr.msra.gmra.mxu0 %v6456_v12  ;;  %v1720_v51 = vpop.xlane.xlu1 %1719 }
 0x49c   : > { %4717 = vmatpush3.xpose.msk.msra.mxu0 %vm801_vm1, %v6136_v36  ;;  %2668 = vrot.lane.b32.xlu1 %v7743_v19, %s5347_s27  ;;  %v7745_v36 = vld [vmem:[#allocation3_spill] sm:$0xff] }
 0x49d   : > { %v6468_v10 = vpop.eup %5099  ;;  %4695 = vmatprep.mubr.f32.mxu0 %v6459_v7  ;;  %4718 = vmatprep.subr.msk.mxu0 %vm801_vm1, %v7744_v34 }
 0x49f   : > { %3012 = vrot.lane.b32.xlu0 %v7722_v6, %s5348_s28  ;;  %4696 = vmatmul.mubr.f32.gmra.mxu0 %v6468_v10 }
 0x4a0   : > { %4719 = vmatpush3.xpose.msk.msra.mxu0 %vm801_vm1, %v7744_v34  ;;  %2664 = vrot.lane.b32.xlu1 %v7745_v36, %s5347_s27  ;;  %v7751_v34 = vld [vmem:[#allocation43_spill] sm:$0xff] }
 0x4a1   : > { %4720 = vmatprep.subr.msk.mxu0 %vm801_vm1, %v7746_v57 }
 0x4a3   : > { %3008 = vrot.lane.b32.xlu0 %v5739_v40, %s5348_s28 }
 0x4a4   : > { %4721 = vmatpush3.xpose.msk.msra.mxu0 %vm801_vm1, %v7746_v57  ;;  %3014 = vrot.lane.b32.xlu1 %v5751_v25, %s5348_s28  ;;  %v1718_v57 = vpop.xlane.xlu1 %1717 }
 0x4a5   : > { %v6488_v48 = vpop.eup %5101  ;;  %4722 = vmatprep.subr.msk.mxu0 %vm801_vm1, %v7747_v11  ;;  %v1741_v23 = vsub.f32 %v7754_v3, %v1718_v57  ;;  %v7759_v3 = vld [vmem:[#allocation42_spill] sm:$0xff] }
 0x4a6   : > { %v6492_v53 = vpop.eup %5103  ;;  %4698 = vmatprep.mubr.f32.mxu0 %v6488_v48 }
 0x4a7   : > { %3004 = vrot.lane.b32.xlu0 %v5731_v55, %s5348_s28  ;;  %4699 = vmatmul.mubr.f32.gmra.mxu0 %v6492_v53  ;;  %v1765_v38 = vmul.f32 1.442695, %v1741_v23 }
 0x4a8   : > { %4723 = vmatpush3.xpose.msk.msra.mxu0 %vm801_vm1, %v7747_v11  ;;  %3010 = vrot.lane.b32.xlu1 %v5743_v42, %s5348_s28  ;;  %v7752_v11 = vld [vmem:[#allocation23_spill] sm:$0xff] }
 0x4a9   : > { %4724 = vmatprep.subr.msk.mxu0 %vm801_vm1, %v7748_v9 }
 0x4ab   : > { %3000 = vrot.lane.b32.xlu0 %v5723_v31, %s5348_s28 }
 0x4ac   : > { %4725 = vmatpush3.xpose.msk.msra.mxu0 %vm801_vm1, %v7748_v9  ;;  %3006 = vrot.lane.b32.xlu1 %v5735_v21, %s5348_s28  ;;  %v2220_v9 = vpop.permute.xlu0 %2219 }
 0x4ad   : > { %4726 = vmatprep.subr.msk.mxu0 %vm801_vm1, %v7749_v39 }
 0x4af   : > { %2996 = vrot.lane.b32.xlu0 %v5715_v54, %s5348_s28 }
 0x4b0   : > { %4727 = vmatpush3.xpose.msk.msra.mxu0 %vm801_vm1, %v7749_v39  ;;  %3002 = vrot.lane.b32.xlu1 %v5727_v33, %s5348_s28  ;;  %v7753_v39 = vld [vmem:[#allocation33_spill] sm:$0xff] }
 0x4b1   : > { %4728 = vmatprep.subr.msk.mxu0 %vm801_vm1, %v7750_v41  ;;  %v1740_v0 = vsub.f32 %v7753_v39, %v1716_v20  ;;  %v7758_v39 = vld [vmem:[#allocation24_spill] sm:$0xff] }
 0x4b3   : > { %2994 = vrot.lane.b32.xlu0 %v5711_v22, %s5348_s28  ;;  %v1763_v49 = vmul.f32 1.442695, %v1740_v0  ;;  %v7761_v0 = vld [vmem:[#allocation37_spill] sm:$0xff] }
 0x4b4   : > { %4729 = vmatpush3.xpose.msk.msra.mxu0 %vm801_vm1, %v7750_v41  ;;  %2998 = vrot.lane.b32.xlu1 %v5719_v27, %s5348_s28  ;;  %v1724_v41 = vpop.xlane.xlu1 %1723 }
 0x4b5   : > { %4730 = vmatprep.subr.msk.mxu0 %vm801_vm1, %v7751_v34 }
 0x4b7   : > { %2992 = vrot.lane.b32.xlu0 %v5707_v8, %s5348_s28 }
 0x4b8   : > { %4731 = vmatpush3.xpose.msk.msra.mxu0 %vm801_vm1, %v7751_v34  ;;  %v7757_v34 = vld [vmem:[#allocation34_spill] sm:$0xff] }
 0x4b9   : > { %4732 = vmatprep.subr.msk.mxu0 %vm801_vm1, %v7752_v11  ;;  %v1742_v16 = vsub.f32 %v7757_v34, %v1720_v51  ;;  %v7763_v34 = vld [vmem:[#allocation44_spill] sm:$0xff] }
 0x4bb   : > { %v1767_v47 = vmul.f32 1.442695, %v1742_v16 }
 0x4bc   : > { %4733 = vmatpush3.xpose.msk.msra.mxu0 %vm801_vm1, %v7752_v11  ;;  %v1726_v11 = vpop.xlane.xlu1 %1725 }
 0x4bd   : > { %4734 = vmatprep.subr.msk.mxu0 %vm801_vm1, %v7755_v61 }
 0x4be   : > { %v1714_v17 = vpop.xlane.xlu0 %1713 }
 0x4bf   : > { %v1739_v4 = vsub.f32 %v7756_v52, %v1714_v17  ;;  %v1744_v52 = vsub.f32 %v7760_v45, %v1724_v41  ;;  %v7764_v45 = vld [vmem:[#allocation26_spill] sm:$0xff] }
 0x4c0   : > { %4735 = vmatpush3.xpose.msk.msra.mxu0 %vm801_vm1, %v7755_v61  ;;  %v1745_v61 = vsub.f32 %v7761_v0, %v1726_v11 }
 0x4c1   : > { %v1761_v20 = vmul.f32 1.442695, %v1739_v4  ;;  %4736 = vmatprep.subr.msk.mxu0 %vm801_vm1, %v7758_v39  ;;  %v7762_v4 = vld [vmem:[#allocation25_spill] sm:$0xff]  ;;  %v1771_v51 = vmul.f32 1.442695, %v1744_v52 }
 0x4c2   : > { %v1722_v62 = vpop.xlane.xlu0 %1721 }
 0x4c3   : > { %5105 = vpow2.f32 %v1761_v20  ;;  %v1743_v57 = vsub.f32 %v7759_v3, %v1722_v62  ;;  %v2216_v3 = vpop.permute.xlu1 %2215 }
 0x4c4   : > { %5107 = vpow2.f32 %v1763_v49  ;;  %4737 = vmatpush3.xpose.msk.msra.mxu0 %vm801_vm1, %v7758_v39  ;;  %v1773_v49 = vmul.f32 1.442695, %v1745_v61 }
 0x4c5   : > { %5109 = vpow2.f32 %v1765_v38  ;;  %v1769_v23 = vmul.f32 1.442695, %v1743_v57  ;;  %4738 = vmatprep.subr.msk.mxu0 %vm801_vm1, %v7762_v4 }
 0x4c6   : > { %v1728_v17 = vpop.xlane.xlu0 %1727  ;;  %5111 = vpow2.f32 %v1767_v47 }
 0x4c7   : > { %v1746_v20 = vsub.f32 %v7763_v34, %v1728_v17  ;;  %5113 = vpow2.f32 %v1769_v23  ;;  %v7770_v23 = vld [vmem:[#allocation46_spill] sm:$0xff] }
 0x4c8   : > { %4739 = vmatpush3.xpose.msk.msra.mxu0 %vm801_vm1, %v7762_v4  ;;  %5115 = vpow2.f32 %v1771_v51 }
 0x4c9   : > { %4740 = vmatprep.subr.msk.mxu0 %vm801_vm1, %v7764_v45  ;;  %v1775_v62 = vmul.f32 1.442695, %v1746_v20  ;;  %5117 = vpow2.f32 %v1773_v49 }
 0x4ca   : > { %v1732_v38 = vpop.xlane.xlu0 %1731 }
 0x4cb   : > { %5119 = vpow2.f32 %v1775_v62  ;;  %v1748_v4 = vsub.f32 %v7770_v23, %v1732_v38 }
 0x4cc   : > { %4741 = vmatpush3.xpose.msk.msra.mxu0 %vm801_vm1, %v7764_v45 }
 0x4cd   : > { %4742 = vmatprep.subr.msk.mxu0 %vm801_vm1, %v2220_v9  ;;  %v1779_v49 = vmul.f32 1.442695, %v1748_v4 }
 0x4ce   : > { %v2218_v47 = vpop.permute.xlu0 %2217 }
 0x4d0   : > { %v6561_v16 = vpop.eup %5105  ;;  %4743 = vmatpush3.xpose.msk.msra.mxu0 %vm801_vm1, %v2220_v9 }
 0x4d1   : > { %7765 = vst [vmem:[#allocation16_spill] sm:$0xff] %v6561_v16  ;;  %v6564_v41 = vpop.eup %5107  ;;  %4744 = vmatprep.subr.msk.mxu0 %vm801_vm1, %v2218_v47  ;;  %4701 = vmatprep.mubr.f32.mxu0 %v6561_v16 }
 0x4d2   : > { %v6568_v39 = vpop.eup %5109  ;;  %v2184_v11 = vpop.permute.xlu0 %2183  ;;  %4702 = vmatmul.mubr.f32.gmra.mxu0 %v6564_v41 }
 0x4d3   : > { %7766 = vst [vmem:[#allocation18_spill] sm:$0xff] %v6568_v39  ;;  %4704 = vmatprep.mubr.f32.mxu0 %v6568_v39  ;;  %v6573_v57 = vpop.eup %5111 }
 0x4d4   : > { %4745 = vmatpush3.xpose.msk.msra.mxu0 %vm801_vm1, %v2218_v47  ;;  %v6576_v9 = vpop.eup %5113 }
 0x4d5   : > { %4746 = vmatprep.subr.msk.mxu0 %vm801_vm1, %v2216_v3  ;;  %7767 = vst [vmem:[#allocation19_spill] sm:$0xff] %v6576_v9  ;;  %v6581_v0 = vpop.eup %5115 }
 0x4d6   : > { %v2188_v52 = vpop.permute.xlu0 %2187  ;;  %4705 = vmatmul.mubr.f32.gmra.mxu0 %v6573_v57  ;;  %7768 = vst [vmem:[#allocation15_spill] sm:$0xff] %v6581_v0  ;;  %v6583_v61 = vpop.eup %5117 }
 0x4d7   : > { %4707 = vmatprep.mubr.f32.mxu0 %v6576_v9  ;;  %7769 = vst [vmem:[#allocation17_spill] sm:$0xff] %v6583_v61 }
 0x4d8   : > { %4747 = vmatpush3.xpose.msk.msra.mxu0 %vm801_vm1, %v2216_v3  ;;  %v6588_v34 = vpop.eup %5119 }
 0x4d9   : > { %7771 = vst [vmem:[#allocation27_spill] sm:$0xff] %v6588_v34 }
 0x4da   : > { %v2192_v17 = vpop.permute.xlu0 %2191  ;;  %4708 = vmatmul.mubr.f32.gmra.mxu0 %v6581_v0 }
 0x4db   : > { %4710 = vmatprep.mubr.f32.mxu0 %v6583_v61 }
 0x4dc   : > { %v1730_v51 = vpop.xlane.xlu1 %1729 }
 0x4dd   : > { %v1747_v20 = vsub.f32 %v6291_v28, %v1730_v51 }
 0x4de   : > { %v2196_v45 = vpop.permute.xlu0 %2195  ;;  %4711 = vmatmul.mubr.f32.gmra.mxu0 %v6588_v34 }
 0x4df   : > { %v1777_v62 = vmul.f32 1.442695, %v1747_v20 }
 0x4e0   : > { %v2186_v47 = vpop.permute.xlu1 %2185 }
 0x4e1   : > { %5121 = vpow2.f32 %v1777_v62 }
 0x4e2   : > { %5123 = vpow2.f32 %v1779_v49  ;;  %v2200_v3 = vpop.permute.xlu0 %2199 }
 0x4e4   : > { %v2190_v38 = vpop.permute.xlu1 %2189 }
 0x4e6   : > { %v2204_v23 = vpop.permute.xlu0 %2203 }
 0x4e8   : > { %v2194_v50 = vpop.permute.xlu1 %2193 }
 0x4ea   : > { %v2208_v13 = vpop.permute.xlu0 %2207 }
 0x4ec   : > { %v2198_v30 = vpop.permute.xlu1 %2197 }
 0x4ee   : > { %v6592_v61 = vpop.eup %5121  ;;  %v2212_v9 = vpop.permute.xlu0 %2211 }
 0x4ef   : > { %7772 = vst [vmem:[#allocation12_spill] sm:$0xff] %v6592_v61  ;;  %v6594_v39 = vpop.eup %5123  ;;  %4713 = vmatprep.mubr.f32.mxu0 %v6592_v61 }
 0x4f0   : > { %7773 = vst [vmem:[#allocation28_spill] sm:$0xff] %v6594_v39  ;;  %v2202_v28 = vpop.permute.xlu1 %2201  ;;  %4714 = vmatmul.mubr.f32.gmra.mxu0 %v6594_v39 }
 0x4f1   : > { %4748 = vmatprep.mubr.msk.f32.mxu0 %vm801_vm1, %v2184_v11 }
 0x4f2   : > { %v2695_v4 = vpop.permute.xlu0 %2694 }
 0x4f3   : > { %4772 = vmatprep.subr.mxu1 %v2695_v4 }
 0x4f4   : > { %v2206_v51 = vpop.permute.xlu1 %2205  ;;  %4749 = vmatmul.mubr.msk.f32.vlgmr.msra.gmra.mxu0 %vm801_vm1, %v2186_v47  ;;  %4773 = vmatpush3.msra.mxu1 %v2695_v4 }
 0x4f5   : > { %4751 = vmatprep.mubr.msk.f32.mxu0 %vm801_vm1, %v2188_v52 }
 0x4f6   : > { %v2693_v20 = vpop.permute.xlu0 %2692 }
 0x4f7   : > { %4774 = vmatprep.subr.mxu1 %v2693_v20 }
 0x4f8   : > { %v2210_v49 = vpop.permute.xlu1 %2209  ;;  %4752 = vmatmul.mubr.msk.f32.gmra.mxu0 %vm801_vm1, %v2190_v38  ;;  %4775 = vmatpush3.msra.mxu1 %v2693_v20 }
 0x4f9   : > { %4754 = vmatprep.mubr.msk.f32.mxu0 %vm801_vm1, %v2192_v17 }
 0x4fa   : > { %v2689_v62 = vpop.permute.xlu0 %2688 }
 0x4fc   : > { %v2214_v61 = vpop.permute.xlu1 %2213  ;;  %4755 = vmatmul.mubr.msk.f32.gmra.mxu0 %vm801_vm1, %v2194_v50 }
 0x4fd   : > { %4757 = vmatprep.mubr.msk.f32.mxu0 %vm801_vm1, %v2196_v45 }
 0x4fe   : > { %v2683_v11 = vpop.permute.xlu0 %2682 }
 0x500   : > { %v2691_v39 = vpop.permute.xlu1 %2690  ;;  %4758 = vmatmul.mubr.msk.f32.gmra.mxu0 %vm801_vm1, %v2198_v30 }
 0x501   : > { %4760 = vmatprep.mubr.msk.f32.mxu0 %vm801_vm1, %v2200_v3  ;;  %4776 = vmatprep.subr.mxu1 %v2691_v39 }
 0x502   : > { %4777 = vmatpush3.msra.mxu1 %v2691_v39  ;;  %v2679_v17 = vpop.permute.xlu0 %2678 }
 0x503   : > { %4778 = vmatprep.subr.mxu1 %v2689_v62 }
 0x504   : > { %v2687_v52 = vpop.permute.xlu1 %2686  ;;  %4761 = vmatmul.mubr.msk.f32.gmra.mxu0 %vm801_vm1, %v2202_v28  ;;  %4779 = vmatpush3.msra.mxu1 %v2689_v62 }
 0x505   : > { %4763 = vmatprep.mubr.msk.f32.mxu0 %vm801_vm1, %v2204_v23  ;;  %4780 = vmatprep.subr.mxu1 %v2687_v52 }
 0x506   : > { %4781 = vmatpush3.msra.mxu1 %v2687_v52  ;;  %v2675_v30 = vpop.permute.xlu0 %2674 }
 0x508   : > { %v2685_v50 = vpop.permute.xlu1 %2684  ;;  %4764 = vmatmul.mubr.msk.f32.gmra.mxu0 %vm801_vm1, %v2206_v51 }
 0x509   : > { %4766 = vmatprep.mubr.msk.f32.mxu0 %vm801_vm1, %v2208_v13  ;;  %4782 = vmatprep.subr.mxu1 %v2685_v50 }
 0x50a   : > { %4783 = vmatpush3.msra.mxu1 %v2685_v50  ;;  %v2671_v47 = vpop.permute.xlu0 %2670 }
 0x50b   : > { %4784 = vmatprep.subr.mxu1 %v2683_v11 }
 0x50c   : > { %v2681_v39 = vpop.permute.xlu1 %2680  ;;  %4767 = vmatmul.mubr.msk.f32.gmra.mxu0 %vm801_vm1, %v2210_v49  ;;  %4785 = vmatpush3.msra.mxu1 %v2683_v11 }
 0x50d   : > { %4769 = vmatprep.mubr.msk.f32.mxu0 %vm801_vm1, %v2212_v9  ;;  %4786 = vmatprep.subr.mxu1 %v2681_v39 }
 0x50e   : > { %4787 = vmatpush3.msra.mxu1 %v2681_v39  ;;  %v2667_v3 = vpop.permute.xlu0 %2666 }
 0x50f   : > { %4788 = vmatprep.subr.mxu1 %v2679_v17 }
 0x510   : > { %v2677_v45 = vpop.permute.xlu1 %2676  ;;  %4770 = vmatmul.mubr.msk.f32.gmra.mxu0 %vm801_vm1, %v2214_v61  ;;  %4789 = vmatpush3.msra.mxu1 %v2679_v17 }
 0x511   : > { %4790 = vmatprep.subr.mxu1 %v2677_v45 }
 0x512   : > { %4791 = vmatpush3.msra.mxu1 %v2677_v45  ;;  %v6614_v61 = vpop.permute.xlu0 %3016 }
 0x513   : > { %4792 = vmatprep.subr.mxu1 %v2675_v30 }
 0x514   : > { %v2673_v13 = vpop.permute.xlu1 %2672  ;;  %4793 = vmatpush3.msra.mxu1 %v2675_v30 }
 0x515   : > { %4794 = vmatprep.subr.mxu1 %v2673_v13 }
 0x516   : > { %4795 = vmatpush3.msra.mxu1 %v2673_v13 }
 0x517   : > { %4796 = vmatprep.subr.mxu1 %v2671_v47 }
 0x518   : > { %v2669_v38 = vpop.permute.xlu1 %2668  ;;  %4797 = vmatpush3.msra.mxu1 %v2671_v47 }
 0x519   : > { %4798 = vmatprep.subr.mxu1 %v2669_v38  ;;  %v6618_v23 = vpop.f32.mrf.mxu0 }
 0x51a   : > { %4799 = vmatpush3.msra.mxu1 %v2669_v38  ;;  %7774 = vst [vmem:[#allocation14_spill] sm:$0xff] %v6618_v23 }
 0x51b   : > { %4800 = vmatprep.subr.mxu1 %v2667_v3  ;;  %v6620_v28 = vpop.f32.mrf.mxu0 }
 0x51c   : > { %v2665_v9 = vpop.permute.xlu1 %2664  ;;  %4801 = vmatpush3.msra.mxu1 %v2667_v3  ;;  %7775 = vst [vmem:[#allocation29_spill] sm:$0xff] %v6620_v28 }
 0x51d   : > { %4802 = vmatprep.subr.mxu1 %v2665_v9 }
 0x51e   : > { %4803 = vmatpush3.msra.mxu1 %v2665_v9 }
 0x51f   : > { %4828 = vmatprep.subr.msk.mxu1 %vm801_vm1, %v6614_v61 }
 0x521   : > { %v6622_v4 = vpop.f32.mrf.mxu0 }
 0x522   : > { %7776 = vst [vmem:[#allocation10_spill] sm:$0xff] %v6622_v4 }
 0x523   : > { %v6624_v51 = vpop.f32.mrf.mxu0 }
 0x524   : > { %7777 = vst [vmem:[#allocation30_spill] sm:$0xff] %v6624_v51 }
 0x526   : > { %v6626_v20 = vpop.f32.mrf.mxu0 }
 0x527   : > { %7778 = vst [vmem:[#allocation13_spill] sm:$0xff] %v6626_v20 }
 0x528   : > { %v6628_v49 = vpop.f32.mrf.mxu0 }
 0x529   : > { %7779 = vst [vmem:[#allocation8_spill] sm:$0xff] %v6628_v49 }
 0x52a   : > { %v6630_v62 = vpop.f32.mrf.mxu0 }
 0x52b   : > { %7780 = vst [vmem:[#allocation11_spill] sm:$0xff] %v6630_v62 }
 0x52c   : > { %v6632_v11 = vpop.f32.mrf.mxu0 }
 0x52d   : > { %7781 = vst [vmem:[#allocation31_spill] sm:$0xff] %v6632_v11 }
 0x52e   : > { %v6634_v52 = vpop.f32.mrf.mxu0 }
 0x52f   : > { %7782 = vst [vmem:[#allocation6_spill] sm:$0xff] %v6634_v52 }
 0x530   : > { %v6636_v17 = vpop.f32.mrf.mxu0 }
 0x531   : > { %7783 = vst [vmem:[#allocation32_spill] sm:$0xff] %v6636_v17 }
 0x532   : > { %v6638_v50 = vpop.f32.mrf.mxu0 }
 0x533   : > { %7784 = vst [vmem:[#allocation9_spill] sm:$0xff] %v6638_v50 }
 0x534   : > { %v6640_v30 = vpop.f32.mrf.mxu0 }
 0x535   : > { %7785 = vst [vmem:[#allocation4_spill] sm:$0xff] %v6640_v30 }
 0x536   : > { %v6642_v39 = vpop.f32.mrf.mxu0 }
 0x537   : > { %7786 = vst [vmem:[#allocation7_spill] sm:$0xff] %v6642_v39 }
 0x538   : > { %v6644_v45 = vpop.f32.mrf.mxu0 }
 0x539   : > { %7787 = vst [vmem:[#allocation5_spill] sm:$0xff] %v6644_v45 }
 0x53a   : > { %v6646_v47 = vpop.f32.mrf.mxu0 }
 0x53b   : > { %7788 = vst [vmem:[#allocation38_spill] sm:$0xff] %v6646_v47 }
 0x53c   : > { %v6648_v13 = vpop.f32.mrf.mxu0 }
 0x53d   : > { %7789 = vst [vmem:[#allocation3_spill] sm:$0xff] %v6648_v13 }
 0x55b   : > { %v6650_v3 = vpop.f32.mrf.mxu0 }
 0x55c   : > { %7790 = vst [vmem:[#allocation20_spill] sm:$0xff] %v6650_v3 }
 0x55d   : > { %v6652_v38 = vpop.f32.mrf.mxu0 }
 0x55e   : > { %7791 = vst [vmem:[#allocation39_spill] sm:$0xff] %v6652_v38 }
 0x55f   : > { %v6654_v9 = vpop.f32.mrf.mxu0 }
 0x560   : > { %7792 = vst [vmem:[#allocation21_spill] sm:$0xff] %v6654_v9 }
 0x561   : > { %v6656_v11 = vpop.f32.mrf.mxu0 }
 0x562   : > { %7793 = vst [vmem:[#allocation40_spill] sm:$0xff] %v6656_v11 }
 0x567   : > { %v6658_v17 = vpop.f32.mrf.mxu0 }
 0x568   : > { %7794 = vst [vmem:[#allocation22_spill] sm:$0xff] %v6658_v17 }
 0x569   : > { %v6660_v49 = vpop.f32.mrf.mxu0 }
 0x56a   : > { %7795 = vst [vmem:[#allocation43_spill] sm:$0xff] %v6660_v49 }
 0x592   : > { %v6662_v30 = vpop.f32.mrf.mxu0 }
 0x593   : > { %7796 = vst [vmem:[#allocation23_spill] sm:$0xff] %v6662_v30 }
 0x594   : > { %v6664_v39 = vpop.f32.mrf.mxu0 }
 0x595   : > { %7797 = vst [vmem:[#allocation33_spill] sm:$0xff] %v6664_v39 }
 0x596   : > { %v6666_v45 = vpop.f32.mrf.mxu0 }
 0x597   : > { %7798 = vst [vmem:[#allocation35_spill] sm:$0xff] %v6666_v45 }
 0x598   : > { %v6668_v47 = vpop.f32.mrf.mxu0 }
 0x599   : > { %7799 = vst [vmem:[#allocation45_spill] sm:$0xff] %v6668_v47 }
 0x59a   : > { %v6670_v13 = vpop.f32.mrf.mxu0 }
 0x59b   : > { %7800 = vst [vmem:[#allocation41_spill] sm:$0xff] %v6670_v13 }
 0x59c   : > { %v6672_v50 = vpop.f32.mrf.mxu0 }
 0x59d   : > { %7801 = vst [vmem:[#allocation34_spill] sm:$0xff] %v6672_v50 }
 0x59e   : > { %v6674_v51 = vpop.f32.mrf.mxu0 }
 0x59f   : > { %7802 = vst [vmem:[#allocation24_spill] sm:$0xff] %v6674_v51 }
 0x5a0   : > { %v6676_v52 = vpop.f32.mrf.mxu0 }
 0x5a1   : > { %7803 = vst [vmem:[#allocation42_spill] sm:$0xff] %v6676_v52 }
 0x5b0   : > { %v6678_v28 = vpop.f32.mrf.mxu0 }
 0x5b1   : > { %7804 = vst [vmem:[#allocation36_spill] sm:$0xff] %v6678_v28 }
 0x5b2   : > { %v6680_v62 = vpop.f32.mrf.mxu0 }
 0x5b3   : > { %7805 = vst [vmem:[#allocation37_spill] sm:$0xff] %v6680_v62 }
 0x5b4   : > { %v4750_v20 = vpop.f32.mrf.mxu0 }
 0x5b5   : > { %v2457_v4 = vmul.f32 0.25, %v4750_v20 }
 0x5b6   : > { %v2377_v23 = vpop.f32.mrf.mxu0 }
 0x5b7   : > { %v6683_v39 = vadd.f32 %v2457_v4, %v6141_v44  ;;  %v2456_v45 = vmul.f32 0.25, %v2377_v23 }
 0x5b8   : > { %v4753_v47 = vpop.f32.mrf.mxu0 }
 0x5b9   : > { %v6686_v13 = vadd.f32 %v2456_v45, %v6141_v44  ;;  %v2459_v50 = vmul.f32 0.25, %v4753_v47  ;;  %2490 = vmax.xlane.f32.xlu0 %v6683_v39 }
 0x5ba   : > { %v2387_v51 = vpop.f32.mrf.mxu0 }
 0x5bb   : > { %v2458_v52 = vmul.f32 0.25, %v2387_v51  ;;  %2488 = vmax.xlane.f32.xlu1 %v6686_v13  ;;  %v6691_v62 = vadd.f32 %v2459_v50, %v6141_v44 }
 0x5bc   : > { %v4756_v28 = vpop.f32.mrf.mxu0 }
 0x5bd   : > { %v6694_v20 = vadd.f32 %v2458_v52, %v6141_v44  ;;  %v2461_v4 = vmul.f32 0.25, %v4756_v28 }
 0x5be   : > { %v2397_v23 = vpop.f32.mrf.mxu0 }
 0x5bf   : > { %2494 = vmax.xlane.f32.xlu1 %v6691_v62  ;;  %2492 = vmax.xlane.f32.xlu0 %v6694_v20  ;;  %v6699_v47 = vadd.f32 %v2461_v4, %v6141_v44  ;;  %v2460_v51 = vmul.f32 0.25, %v2397_v23 }
 0x5c0   : > { %v4759_v45 = vpop.f32.mrf.mxu0 }
 0x5c1   : > { %v6703_v50 = vadd.f32 %v2460_v51, %v6141_v44  ;;  %v2463_v52 = vmul.f32 0.25, %v4759_v45 }
 0x5c2   : > { %v2407_v49 = vpop.f32.mrf.mxu0 }
 0x5c3   : > { %2498 = vmax.xlane.f32.xlu1 %v6699_v47  ;;  %v6707_v17 = vadd.f32 %v2463_v52, %v6141_v44 }
 0x5c4   : > { %v4762_v11 = vpop.f32.mrf.mxu0 }
 0x5c5   : > { %v2465_v9 = vmul.f32 0.25, %v4762_v11 }
 0x5c6   : > { %v2417_v30 = vpop.f32.mrf.mxu0 }
 0x5c7   : > { %2496 = vmax.xlane.f32.xlu1 %v6703_v50  ;;  %v6711_v4 = vadd.f32 %v2465_v9, %v6141_v44  ;;  %v2464_v23 = vmul.f32 0.25, %v2417_v30  ;;  %v2462_v9 = vmul.f32 0.25, %v2407_v49 }
 0x5c8   : > { %v4765_v28 = vpop.f32.mrf.mxu0 }
 0x5c9   : > { %v6715_v45 = vadd.f32 %v2464_v23, %v6141_v44  ;;  %v2467_v51 = vmul.f32 0.25, %v4765_v28  ;;  %v6731_v28 = vadd.f32 %v2462_v9, %v6141_v44 }
 0x5ca   : > { %v2427_v3 = vpop.f32.mrf.mxu0 }
 0x5cb   : > { %2502 = vmax.xlane.f32.xlu1 %v6707_v17  ;;  %v6719_v52 = vadd.f32 %v2467_v51, %v6141_v44  ;;  %v2466_v23 = vmul.f32 0.25, %v2427_v3 }
 0x5cc   : > { %v4768_v38 = vpop.f32.mrf.mxu0 }
 0x5cd   : > { %v2469_v51 = vmul.f32 0.25, %v4768_v38  ;;  %v6752_v38 = vpop.permute.xlu0 %3012 }
 0x5ce   : > { %v2437_v34 = vpop.f32.mrf.mxu0 }
 0x5cf   : > { %2506 = vmax.xlane.f32.xlu1 %v6711_v4  ;;  %v2468_v11 = vmul.f32 0.25, %v2437_v34  ;;  %v6735_v34 = vadd.f32 %v2466_v23, %v6141_v44 }
 0x5d0   : > { %v4771_v0 = vpop.f32.mrf.mxu0 }
 0x5d1   : > { %v6725_v30 = vadd.f32 %v2468_v11, %v6141_v44  ;;  %v6739_v11 = vadd.f32 %v2469_v51, %v6141_v44  ;;  %v2471_v16 = vmul.f32 0.25, %v4771_v0 }
 0x5d2   : > { %v2447_v3 = vpop.f32.mrf.mxu0 }
 0x5d3   : > { %2504 = vmax.xlane.f32.xlu1 %v6715_v45  ;;  %v6743_v49 = vadd.f32 %v2471_v16, %v6141_v44  ;;  %v2470_v9 = vmul.f32 0.25, %v2447_v3  ;;  %v6758_v16 = vpop.permute.xlu0 %3008 }
 0x5d5   : > { %2990 = vrot.lane.b32.xlu0 %v5703_v43, %s5348_s28  ;;  %v6747_v23 = vadd.f32 %v2470_v9, %v6141_v44 }
 0x5d7   : > { %2510 = vmax.xlane.f32.xlu1 %v6719_v52  ;;  %v6766_v0 = vpop.permute.xlu0 %3004 }
 0x5db   : > { %2512 = vmax.xlane.f32.xlu1 %v6725_v30 }
 0x5ec   : > { %2986 = vrot.lane.b32.xlu1 %v5693_v14, %s5348_s28 }
 0x5f4   : > { %2500 = vmax.xlane.f32.xlu0 %v6731_v28 }
 0x5f8   : > { %2508 = vmax.xlane.f32.xlu0 %v6735_v34 }
 0x5fc   : > { %2514 = vmax.xlane.f32.xlu0 %v6739_v11 }
 0x600   : > { %2518 = vmax.xlane.f32.xlu0 %v6743_v49 }
 0x610   : > { %2516 = vmax.xlane.f32.xlu1 %v6747_v23 }
 0x616   : > { %2988 = vrot.lane.b32.xlu0 %v5699_v15, %s5348_s28 }
 0x61a   : > { %2954 = vrot.lane.b32.xlu0 %v5693_v14, %s5349_s29  ;;  %v6770_v14 = vpop.permute.xlu1 %3014 }
 0x61e   : > { %2958 = vrot.lane.b32.xlu0 %v5703_v43, %s5349_s29  ;;  %v6780_v43 = vpop.permute.xlu1 %3010 }
 0x621   : > { %2956 = vrot.lane.b32.xlu1 %v5699_v15, %s5349_s29  ;;  %v6776_v15 = vpop.permute.xlu0 %3000 }
 0x622   : > { %2962 = vrot.lane.b32.xlu0 %v5711_v22, %s5349_s29  ;;  %v6790_v22 = vpop.permute.xlu1 %3006 }
 0x625   : > { %2960 = vrot.lane.b32.xlu1 %v5707_v8, %s5349_s29  ;;  %v6786_v8 = vpop.permute.xlu0 %2996 }
 0x626   : > { %2966 = vrot.lane.b32.xlu0 %v5719_v27, %s5349_s29  ;;  %v6800_v27 = vpop.permute.xlu1 %3002 }
 0x629   : > { %2964 = vrot.lane.b32.xlu1 %v5715_v54, %s5349_s29  ;;  %v6796_v54 = vpop.permute.xlu0 %2994 }
 0x62a   : > { %2970 = vrot.lane.b32.xlu0 %v5727_v33, %s5349_s29  ;;  %v6810_v33 = vpop.permute.xlu1 %2998 }
 0x62d   : > { %2968 = vrot.lane.b32.xlu1 %v5723_v31, %s5349_s29  ;;  %v6806_v31 = vpop.permute.xlu0 %2992 }
 0x62e   : > { %2974 = vrot.lane.b32.xlu0 %v5735_v21, %s5349_s29 }
 0x631   : > { %2972 = vrot.lane.b32.xlu1 %v5731_v55, %s5349_s29 }
 0x632   : > { %2978 = vrot.lane.b32.xlu0 %v5743_v42, %s5349_s29 }
 0x635   : > { %2976 = vrot.lane.b32.xlu1 %v5739_v40, %s5349_s29 }
 0x636   : > { %2982 = vrot.lane.b32.xlu0 %v5751_v25, %s5349_s29 }
 0x639   : > { %2980 = vrot.lane.b32.xlu1 %v7722_v6, %s5349_s29 }
 0x63a   : > { %3465 = vrot.lane.b32.xlu0 %v5763_v1, %s5349_s29 }
 0x63d   : > { %2984 = vrot.lane.b32.xlu1 %v7724_v32, %s5349_s29 }
 0x63e   : > { %3463 = vrot.lane.b32.xlu0 %v7723_v5, %s5349_s29 }
 0x641   : > { %3461 = vrot.lane.b32.xlu1 %v7726_v26, %s5349_s29 }
 0x642   : > { %v2491_v55 = vpop.xlane.xlu0 %2490  ;;  %3459 = vrot.lane.b32.xlu0 %v7725_v37, %s5349_s29 }
 0x643   : > { %v2521_v21 = vsub.f32 %v6683_v39, %v2491_v55 }
 0x644   : > { %v2489_v40 = vpop.xlane.xlu1 %2488 }
 0x645   : > { %v2520_v42 = vsub.f32 %v6686_v13, %v2489_v40  ;;  %3457 = vrot.lane.b32.xlu1 %v7730_v35, %s5349_s29  ;;  %v2538_v25 = vmul.f32 1.442695, %v2521_v21 }
 0x646   : > { %3455 = vrot.lane.b32.xlu0 %v7734_v29, %s5349_s29 }
 0x647   : > { %v2536_v1 = vmul.f32 1.442695, %v2520_v42 }
 0x648   : > { %v2495_v6 = vpop.xlane.xlu1 %2494  ;;  %v2493_v5 = vpop.xlane.xlu0 %2492 }
 0x649   : > { %5125 = vpow2.f32 %v2536_v1  ;;  %v2523_v32 = vsub.f32 %v6691_v62, %v2495_v6  ;;  %v2522_v37 = vsub.f32 %v6694_v20, %v2493_v5  ;;  %3453 = vrot.lane.b32.xlu1 %v7728_v24, %s5349_s29 }
 0x64a   : > { %5127 = vpow2.f32 %v2538_v25  ;;  %3451 = vrot.lane.b32.xlu0 %v7736_v63, %s5349_s29 }
 0x64b   : > { %v2542_v26 = vmul.f32 1.442695, %v2523_v32  ;;  %v2540_v35 = vmul.f32 1.442695, %v2522_v37 }
 0x64c   : > { %v2499_v39 = vpop.xlane.xlu1 %2498 }
 0x64d   : > { %5129 = vpow2.f32 %v2542_v26  ;;  %3449 = vrot.lane.b32.xlu1 %v7732_v46, %s5349_s29  ;;  %v2525_v29 = vsub.f32 %v6699_v47, %v2499_v39  ;;  %v2991_v47 = vpop.permute.xlu0 %2990 }
 0x64e   : > { %5131 = vpow2.f32 %v2540_v35  ;;  %3447 = vrot.lane.b32.xlu0 %v7740_v58, %s5349_s29 }
 0x64f   : > { %v2546_v63 = vmul.f32 1.442695, %v2525_v29 }
 0x650   : > { %v2497_v62 = vpop.xlane.xlu1 %2496 }
 0x651   : > { %v2524_v24 = vsub.f32 %v6703_v50, %v2497_v62  ;;  %3445 = vrot.lane.b32.xlu1 %v7735_v59, %s5349_s29 }
 0x652   : > { %3443 = vrot.lane.b32.xlu0 %v7742_v2, %s5349_s29 }
 0x653   : > { %v2544_v13 = vmul.f32 1.442695, %v2524_v24 }
 0x655   : > { %5133 = vpow2.f32 %v2544_v13  ;;  %3441 = vrot.lane.b32.xlu1 %v7738_v60, %s5349_s29 }
 0x656   : > { %v6840_v46 = vpop.eup %5125  ;;  %5135 = vpow2.f32 %v2546_v63  ;;  %3439 = vrot.lane.b32.xlu0 %v7743_v19, %s5349_s29  ;;  %v2503_v19 = vpop.xlane.xlu1 %2502 }
 0x657   : > { %v6844_v58 = vpop.eup %5127  ;;  %4804 = vmatprep.mubr.f32.mxu1 %v6840_v46  ;;  %v2527_v50 = vsub.f32 %v6707_v17, %v2503_v19 }
 0x658   : > { %4805 = vmatmul.mubr.f32.vlgmr.msra.gmra.mxu1 %v6844_v58 }
 0x659   : > { %4829 = vmatpush3.xpose.msk.msra.mxu1 %vm801_vm1, %v6614_v61  ;;  %3437 = vrot.lane.b32.xlu1 %v7741_v18, %s5349_s29 }
 0x65a   : > { %v6852_v59 = vpop.eup %5129  ;;  %4830 = vmatprep.subr.msk.mxu1 %vm801_vm1, %v6770_v14  ;;  %v2507_v61 = vpop.xlane.xlu1 %2506 }
 0x65b   : > { %v6856_v60 = vpop.eup %5131 }
 0x65c   : > { %4807 = vmatprep.mubr.f32.mxu1 %v6856_v60 }
 0x65d   : > { %4808 = vmatmul.mubr.f32.gmra.mxu1 %v6852_v59 }
 0x65e   : > { %4831 = vmatpush3.xpose.msk.msra.mxu1 %vm801_vm1, %v6770_v14  ;;  %v2505_v20 = vpop.xlane.xlu1 %2504 }
 0x65f   : > { %4832 = vmatprep.subr.msk.mxu1 %vm801_vm1, %v6752_v38  ;;  %v2528_v3 = vsub.f32 %v6715_v45, %v2505_v20 }
 0x661   : > { %v2552_v14 = vmul.f32 1.442695, %v2528_v3 }
 0x662   : > { %v6864_v2 = vpop.eup %5133  ;;  %4833 = vmatpush3.xpose.msk.msra.mxu1 %vm801_vm1, %v6752_v38  ;;  %v2511_v51 = vpop.xlane.xlu1 %2510 }
 0x663   : > { %v6868_v18 = vpop.eup %5135  ;;  %4834 = vmatprep.subr.msk.mxu1 %vm801_vm1, %v6780_v43  ;;  %4810 = vmatprep.mubr.f32.mxu1 %v6864_v2 }
 0x664   : > { %4811 = vmatmul.mubr.f32.gmra.mxu1 %v6868_v18 }
 0x666   : > { %4835 = vmatpush3.xpose.msk.msra.mxu1 %vm801_vm1, %v6780_v43 }
 0x667   : > { %4836 = vmatprep.subr.msk.mxu1 %vm801_vm1, %v6758_v16 }
 0x66a   : > { %4837 = vmatpush3.xpose.msk.msra.mxu1 %vm801_vm1, %v6758_v16  ;;  %v2550_v16 = vmul.f32 1.442695, %v2527_v50 }
 0x66b   : > { %4838 = vmatprep.subr.msk.mxu1 %vm801_vm1, %v6790_v22 }
 0x66e   : > { %4839 = vmatpush3.xpose.msk.msra.mxu1 %vm801_vm1, %v6790_v22 }
 0x66f   : > { %4840 = vmatprep.subr.msk.mxu1 %vm801_vm1, %v6766_v0 }
 0x672   : > { %4841 = vmatpush3.xpose.msk.msra.mxu1 %vm801_vm1, %v6766_v0  ;;  %v2529_v0 = vsub.f32 %v6711_v4, %v2507_v61 }
 0x673   : > { %4842 = vmatprep.subr.msk.mxu1 %vm801_vm1, %v6800_v27 }
 0x674   : > { %v2554_v22 = vmul.f32 1.442695, %v2529_v0 }
 0x676   : > { %4843 = vmatpush3.xpose.msk.msra.mxu1 %vm801_vm1, %v6800_v27 }
 0x677   : > { %4844 = vmatprep.subr.msk.mxu1 %vm801_vm1, %v6776_v15 }
 0x67a   : > { %4845 = vmatpush3.xpose.msk.msra.mxu1 %vm801_vm1, %v6776_v15  ;;  %v2513_v15 = vpop.xlane.xlu1 %2512 }
 0x67b   : > { %4846 = vmatprep.subr.msk.mxu1 %vm801_vm1, %v6810_v33  ;;  %v2532_v4 = vsub.f32 %v6725_v30, %v2513_v15 }
 0x67d   : > { %v2501_v9 = vpop.xlane.xlu0 %2500 }
 0x67e   : > { %4847 = vmatpush3.xpose.msk.msra.mxu1 %vm801_vm1, %v6810_v33  ;;  %v2526_v38 = vsub.f32 %v6731_v28, %v2501_v9  ;;  %v2531_v28 = vsub.f32 %v6719_v52, %v2511_v51  ;;  %v2987_v42 = vpop.permute.xlu1 %2986 }
 0x67f   : > { %4848 = vmatprep.subr.msk.mxu1 %vm801_vm1, %v6786_v8 }
 0x680   : > { %v2548_v17 = vmul.f32 1.442695, %v2526_v38  ;;  %v2558_v55 = vmul.f32 1.442695, %v2531_v28 }
 0x681   : > { %v2509_v43 = vpop.xlane.xlu0 %2508 }
 0x682   : > { %5137 = vpow2.f32 %v2548_v17  ;;  %4849 = vmatpush3.xpose.msk.msra.mxu1 %vm801_vm1, %v6786_v8  ;;  %v2530_v45 = vsub.f32 %v6735_v34, %v2509_v43  ;;  %v2560_v8 = vmul.f32 1.442695, %v2532_v4 }
 0x683   : > { %5139 = vpow2.f32 %v2550_v16  ;;  %4850 = vmatprep.subr.msk.mxu1 %vm801_vm1, %v6796_v54 }
 0x684   : > { %5141 = vpow2.f32 %v2552_v14  ;;  %v2556_v27 = vmul.f32 1.442695, %v2530_v45 }
 0x685   : > { %v2515_v33 = vpop.xlane.xlu0 %2514  ;;  %5143 = vpow2.f32 %v2554_v22 }
 0x686   : > { %4851 = vmatpush3.xpose.msk.msra.mxu1 %vm801_vm1, %v6796_v54  ;;  %v2533_v34 = vsub.f32 %v6739_v11, %v2515_v33  ;;  %5145 = vpow2.f32 %v2556_v27 }
 0x687   : > { %4852 = vmatprep.subr.msk.mxu1 %vm801_vm1, %v6806_v31  ;;  %5147 = vpow2.f32 %v2558_v55 }
 0x688   : > { %v2562_v30 = vmul.f32 1.442695, %v2533_v34  ;;  %5149 = vpow2.f32 %v2560_v8 }
 0x689   : > { %v2519_v52 = vpop.xlane.xlu0 %2518 }
 0x68a   : > { %4853 = vmatpush3.xpose.msk.msra.mxu1 %vm801_vm1, %v6806_v31  ;;  %5151 = vpow2.f32 %v2562_v30  ;;  %v2535_v5 = vsub.f32 %v6743_v49, %v2519_v52 }
 0x68b   : > { %4854 = vmatprep.subr.msk.mxu1 %vm801_vm1, %v2991_v47 }
 0x68c   : > { %v2566_v29 = vmul.f32 1.442695, %v2535_v5 }
 0x68d   : > { %v2989_v21 = vpop.permute.xlu0 %2988 }
 0x68e   : > { %4855 = vmatpush3.xpose.msk.msra.mxu1 %vm801_vm1, %v2991_v47 }
 0x68f   : > { %v6922_v54 = vpop.eup %5137  ;;  %4856 = vmatprep.subr.msk.mxu1 %vm801_vm1, %v2989_v21 }
 0x690   : > { %v6925_v11 = vpop.eup %5139  ;;  %4813 = vmatprep.mubr.f32.mxu1 %v6922_v54 }
 0x691   : > { %v6928_v40 = vpop.eup %5141  ;;  %4814 = vmatmul.mubr.f32.gmra.mxu1 %v6925_v11  ;;  %v2955_v31 = vpop.permute.xlu0 %2954 }
 0x692   : > { %4857 = vmatpush3.xpose.msk.msra.mxu1 %vm801_vm1, %v2989_v21  ;;  %4816 = vmatprep.mubr.f32.mxu1 %v6928_v40  ;;  %v6934_v25 = vpop.eup %5143 }
 0x693   : > { %4858 = vmatprep.subr.msk.mxu1 %vm801_vm1, %v2987_v42  ;;  %v6936_v1 = vpop.eup %5145 }
 0x694   : > { %v6942_v32 = vpop.eup %5147 }
 0x695   : > { %4817 = vmatmul.mubr.f32.gmra.mxu1 %v6934_v25  ;;  %v2959_v6 = vpop.permute.xlu0 %2958  ;;  %v6944_v37 = vpop.eup %5149 }
 0x696   : > { %4859 = vmatpush3.xpose.msk.msra.mxu1 %vm801_vm1, %v2987_v42  ;;  %4819 = vmatprep.mubr.f32.mxu1 %v6936_v1 }
 0x697   : > { %v6949_v62 = vpop.eup %5151 }
 0x699   : > { %4820 = vmatmul.mubr.f32.gmra.mxu1 %v6942_v32  ;;  %v2963_v26 = vpop.permute.xlu0 %2962  ;;  %v2517_v35 = vpop.xlane.xlu1 %2516 }
 0x69a   : > { %v2534_v39 = vsub.f32 %v6747_v23, %v2517_v35  ;;  %4822 = vmatprep.mubr.f32.mxu1 %v6944_v37 }
 0x69c   : > { %v2564_v24 = vmul.f32 1.442695, %v2534_v39 }
 0x69d   : > { %4823 = vmatmul.mubr.f32.gmra.mxu1 %v6949_v62  ;;  %v2967_v63 = vpop.permute.xlu0 %2966  ;;  %v2957_v49 = vpop.permute.xlu1 %2956 }
 0x69e   : > { %5153 = vpow2.f32 %v2564_v24 }
 0x69f   : > { %5155 = vpow2.f32 %v2566_v29 }
 0x6a1   : > { %v2971_v13 = vpop.permute.xlu0 %2970  ;;  %v2961_v19 = vpop.permute.xlu1 %2960 }
 0x6a5   : > { %v2975_v61 = vpop.permute.xlu0 %2974  ;;  %v2965_v20 = vpop.permute.xlu1 %2964 }
 0x6a9   : > { %v2979_v47 = vpop.permute.xlu0 %2978  ;;  %v2969_v50 = vpop.permute.xlu1 %2968 }
 0x6ab   : > { %v6952_v51 = vpop.eup %5153 }
 0x6ac   : > { %v6954_v23 = vpop.eup %5155  ;;  %4825 = vmatprep.mubr.f32.mxu1 %v6952_v51 }
 0x6ad   : > { %v2983_v3 = vpop.permute.xlu0 %2982  ;;  %4826 = vmatmul.mubr.f32.gmra.mxu1 %v6954_v23  ;;  %v2973_v9 = vpop.permute.xlu1 %2972 }
 0x6ae   : > { %4860 = vmatprep.mubr.msk.f32.mxu1 %vm801_vm1, %v2955_v31 }
 0x6b1   : > { %v3466_v38 = vpop.permute.xlu0 %3465  ;;  %4861 = vmatmul.mubr.msk.f32.vlgmr.msra.gmra.mxu1 %vm801_vm1, %v2957_v49  ;;  %v2977_v16 = vpop.permute.xlu1 %2976 }
 0x6b2   : > { %4863 = vmatprep.mubr.msk.f32.mxu1 %vm801_vm1, %v2959_v6  ;;  %4884 = vmatprep.subr.mxu0 %v3466_v38 }
 0x6b3   : > { %4980 = vmatprep.subr.mxu1 %v3466_v38  ;;  %4885 = vmatpush3.msra.mxu0 %v3466_v38 }
 0x6b4   : > { %4996 = vmatpush3.msra.mxu1 %v3466_v38 }
 0x6b5   : > { %v3464_v0 = vpop.permute.xlu0 %3463  ;;  %4864 = vmatmul.mubr.msk.f32.gmra.mxu1 %vm801_vm1, %v2961_v19  ;;  %v2981_v14 = vpop.permute.xlu1 %2980 }
 0x6b6   : > { %4866 = vmatprep.mubr.msk.f32.mxu1 %vm801_vm1, %v2963_v26  ;;  %4886 = vmatprep.subr.mxu0 %v3464_v0 }
 0x6b7   : > { %4981 = vmatprep.subr.mxu1 %v3464_v0  ;;  %4887 = vmatpush3.msra.mxu0 %v3464_v0 }
 0x6b8   : > { %4997 = vmatpush3.msra.mxu1 %v3464_v0 }
 0x6b9   : > { %v3460_v17 = vpop.permute.xlu0 %3459  ;;  %4867 = vmatmul.mubr.msk.f32.gmra.mxu1 %vm801_vm1, %v2965_v20  ;;  %v2985_v15 = vpop.permute.xlu1 %2984 }
 0x6ba   : > { %4869 = vmatprep.mubr.msk.f32.mxu1 %vm801_vm1, %v2967_v63 }
 0x6bd   : > { %4870 = vmatmul.mubr.msk.f32.gmra.mxu1 %vm801_vm1, %v2969_v50  ;;  %v3462_v43 = vpop.permute.xlu1 %3461  ;;  %v3456_v45 = vpop.permute.xlu0 %3455 }
 0x6be   : > { %4872 = vmatprep.mubr.msk.f32.mxu1 %vm801_vm1, %v2971_v13  ;;  %4888 = vmatprep.subr.mxu0 %v3462_v43 }
 0x6bf   : > { %4982 = vmatprep.subr.mxu1 %v3462_v43  ;;  %4889 = vmatpush3.msra.mxu0 %v3462_v43 }
 0x6c0   : > { %4998 = vmatpush3.msra.mxu1 %v3462_v43  ;;  %4890 = vmatprep.subr.mxu0 %v3460_v17 }
 0x6c1   : > { %4983 = vmatprep.subr.mxu1 %v3460_v17  ;;  %4873 = vmatmul.mubr.msk.f32.gmra.mxu1 %vm801_vm1, %v2973_v9  ;;  %v3458_v22 = vpop.permute.xlu1 %3457  ;;  %v3452_v28 = vpop.permute.xlu0 %3451 }
 0x6c2   : > { %4891 = vmatpush3.msra.mxu0 %v3460_v17  ;;  %4999 = vmatpush3.msra.mxu1 %v3460_v17 }
 0x6c3   : > { %4875 = vmatprep.mubr.msk.f32.mxu1 %vm801_vm1, %v2975_v61  ;;  %4892 = vmatprep.subr.mxu0 %v3458_v22 }
 0x6c4   : > { %4984 = vmatprep.subr.mxu1 %v3458_v22  ;;  %4893 = vmatpush3.msra.mxu0 %v3458_v22 }
 0x6c5   : > { %5000 = vmatpush3.msra.mxu1 %v3458_v22  ;;  %4894 = vmatprep.subr.mxu0 %v3456_v45  ;;  %v3454_v4 = vpop.permute.xlu1 %3453  ;;  %v3448_v33 = vpop.permute.xlu0 %3447 }
 0x6c6   : > { %4985 = vmatprep.subr.mxu1 %v3456_v45  ;;  %4876 = vmatmul.mubr.msk.f32.gmra.mxu1 %vm801_vm1, %v2977_v16 }
 0x6c7   : > { %4895 = vmatpush3.msra.mxu0 %v3456_v45  ;;  %5001 = vmatpush3.msra.mxu1 %v3456_v45 }
 0x6c8   : > { %4878 = vmatprep.mubr.msk.f32.mxu1 %vm801_vm1, %v2979_v47  ;;  %4896 = vmatprep.subr.mxu0 %v3454_v4 }
 0x6c9   : > { %4986 = vmatprep.subr.mxu1 %v3454_v4  ;;  %4897 = vmatpush3.msra.mxu0 %v3454_v4  ;;  %v3450_v27 = vpop.permute.xlu1 %3449  ;;  %v3444_v34 = vpop.permute.xlu0 %3443 }
 0x6ca   : > { %5002 = vmatpush3.msra.mxu1 %v3454_v4  ;;  %4898 = vmatprep.subr.mxu0 %v3452_v28 }
 0x6cb   : > { %4987 = vmatprep.subr.mxu1 %v3452_v28  ;;  %4879 = vmatmul.mubr.msk.f32.gmra.mxu1 %vm801_vm1, %v2981_v14 }
 0x6cc   : > { %4899 = vmatpush3.msra.mxu0 %v3452_v28  ;;  %5003 = vmatpush3.msra.mxu1 %v3452_v28 }
 0x6cd   : > { %4881 = vmatprep.mubr.msk.f32.mxu1 %vm801_vm1, %v2983_v3  ;;  %4900 = vmatprep.subr.mxu0 %v3450_v27  ;;  %v3446_v55 = vpop.permute.xlu1 %3445  ;;  %v3440_v52 = vpop.permute.xlu0 %3439 }
 0x6ce   : > { %4988 = vmatprep.subr.mxu1 %v3450_v27  ;;  %4901 = vmatpush3.msra.mxu0 %v3450_v27 }
 0x6cf   : > { %5004 = vmatpush3.msra.mxu1 %v3450_v27  ;;  %4902 = vmatprep.subr.mxu0 %v3448_v33 }
 0x6d0   : > { %4989 = vmatprep.subr.mxu1 %v3448_v33  ;;  %4882 = vmatmul.mubr.msk.f32.gmra.mxu1 %vm801_vm1, %v2985_v15 }
 0x6d1   : > { %4903 = vmatpush3.msra.mxu0 %v3448_v33  ;;  %5005 = vmatpush3.msra.mxu1 %v3448_v33  ;;  %v3442_v8 = vpop.permute.xlu1 %3441 }
 0x6d2   : > { %4904 = vmatprep.subr.mxu0 %v3446_v55  ;;  %4990 = vmatprep.subr.mxu1 %v3446_v55 }
 0x6d3   : > { %4905 = vmatpush3.msra.mxu0 %v3446_v55  ;;  %5006 = vmatpush3.msra.mxu1 %v3446_v55 }
 0x6d4   : > { %4906 = vmatprep.subr.mxu0 %v3444_v34  ;;  %4991 = vmatprep.subr.mxu1 %v3444_v34 }
 0x6d5   : > { %4907 = vmatpush3.msra.mxu0 %v3444_v34  ;;  %5007 = vmatpush3.msra.mxu1 %v3444_v34  ;;  %v3438_v30 = vpop.permute.xlu1 %3437 }
 0x6d6   : > { %4908 = vmatprep.subr.mxu0 %v3442_v8  ;;  %4992 = vmatprep.subr.mxu1 %v3442_v8 }
 0x6d7   : > { %4909 = vmatpush3.msra.mxu0 %v3442_v8  ;;  %5008 = vmatpush3.msra.mxu1 %v3442_v8 }
 0x6d8   : > { %4910 = vmatprep.subr.mxu0 %v3440_v52  ;;  %4993 = vmatprep.subr.mxu1 %v3440_v52 }
 0x6d9   : > { %4911 = vmatpush3.msra.mxu0 %v3440_v52  ;;  %5009 = vmatpush3.msra.mxu1 %v3440_v52 }
 0x6da   : > { %4912 = vmatprep.subr.mxu0 %v3438_v30  ;;  %4994 = vmatprep.subr.mxu1 %v3438_v30 }
 0x6db   : > { %4913 = vmatpush3.msra.mxu0 %v3438_v30  ;;  %5010 = vmatpush3.msra.mxu1 %v3438_v30 }
 0x718   : > { %v6974_v21 = vpop.f32.mrf.mxu1 }
 0x71a   : > { %v6976_v31 = vpop.f32.mrf.mxu1 }
 0x71d   : > { %v6978_v42 = vpop.f32.mrf.mxu1 }
 0x71f   : > { %v6980_v6 = vpop.f32.mrf.mxu1 }
 0x724   : > { %v6982_v5 = vpop.f32.mrf.mxu1 }
 0x726   : > { %v6984_v26 = vpop.f32.mrf.mxu1 }
 0x751   : > { %v6986_v35 = vpop.f32.mrf.mxu1 }
 0x753   : > { %v6988_v39 = vpop.f32.mrf.mxu1 }
 0x755   : > { %v6990_v29 = vpop.f32.mrf.mxu1 }
 0x757   : > { %v6992_v24 = vpop.f32.mrf.mxu1 }
 0x759   : > { %v6994_v63 = vpop.f32.mrf.mxu1 }
 0x75b   : > { %v6996_v49 = vpop.f32.mrf.mxu1 }
 0x75c   : > { %7806 = vst [vmem:[#allocation25_spill] sm:$0xff] %v6996_v49 }
 0x75d   : > { %v6998_v13 = vpop.f32.mrf.mxu1 }
 0x75e   : > { %7807 = vst [vmem:[#allocation44_spill] sm:$0xff] %v6998_v13 }
 0x75f   : > { %v7000_v19 = vpop.f32.mrf.mxu1 }
 0x760   : > { %7808 = vst [vmem:[#allocation26_spill] sm:$0xff] %v7000_v19 }
 0x76d   : > { %v7002_v61 = vpop.f32.mrf.mxu1 }
 0x76e   : > { %7809 = vst [vmem:[#allocation46_spill] sm:$0xff] %v7002_v61 }
 0x76f   : > { %v7004_v20 = vpop.f32.mrf.mxu1 }
 0x770   : > { %7810 = vst [vmem:[#allocation63_spill] sm:$0xff] %v7004_v20 }
 0x771   : > { %v4862_v47 = vpop.f32.mrf.mxu1 }
 0x772   : > { %v3228_v50 = vmul.f32 0.25, %v4862_v47 }
 0x773   : > { %v3148_v3 = vpop.f32.mrf.mxu1 }
 0x774   : > { %v7007_v9 = vadd.f32 %v3228_v50, %v6141_v44  ;;  %v3227_v38 = vmul.f32 0.25, %v3148_v3 }
 0x775   : > { %v4865_v16 = vpop.f32.mrf.mxu1 }
 0x776   : > { %v7010_v0 = vadd.f32 %v3227_v38, %v6141_v44  ;;  %v3230_v14 = vmul.f32 0.25, %v4865_v16  ;;  %3261 = vmax.xlane.f32.xlu0 %v7007_v9 }
 0x777   : > { %v3158_v17 = vpop.f32.mrf.mxu1 }
 0x778   : > { %v7014_v15 = vadd.f32 %v3230_v14, %v6141_v44  ;;  %v3229_v43 = vmul.f32 0.25, %v3158_v17  ;;  %3259 = vmax.xlane.f32.xlu1 %v7010_v0 }
 0x779   : > { %v4868_v45 = vpop.f32.mrf.mxu1 }
 0x77a   : > { %v7018_v22 = vadd.f32 %v3229_v43, %v6141_v44  ;;  %v3232_v28 = vmul.f32 0.25, %v4868_v45  ;;  %3265 = vmax.xlane.f32.xlu0 %v7014_v15 }
 0x77b   : > { %v3168_v4 = vpop.f32.mrf.mxu1 }
 0x77c   : > { %v7022_v27 = vadd.f32 %v3232_v28, %v6141_v44  ;;  %v3231_v33 = vmul.f32 0.25, %v3168_v4  ;;  %3263 = vmax.xlane.f32.xlu1 %v7018_v22 }
 0x77d   : > { %v4871_v55 = vpop.f32.mrf.mxu1 }
 0x77e   : > { %v7026_v34 = vadd.f32 %v3231_v33, %v6141_v44  ;;  %v3234_v8 = vmul.f32 0.25, %v4871_v55  ;;  %3269 = vmax.xlane.f32.xlu0 %v7022_v27 }
 0x77f   : > { %v3178_v52 = vpop.f32.mrf.mxu1 }
 0x780   : > { %v7030_v30 = vadd.f32 %v3234_v8, %v6141_v44  ;;  %v3233_v47 = vmul.f32 0.25, %v3178_v52  ;;  %3267 = vmax.xlane.f32.xlu1 %v7026_v34 }
 0x781   : > { %v4874_v50 = vpop.f32.mrf.mxu1 }
 0x782   : > { %v7034_v3 = vadd.f32 %v3233_v47, %v6141_v44  ;;  %v3236_v38 = vmul.f32 0.25, %v4874_v50  ;;  %3273 = vmax.xlane.f32.xlu0 %v7030_v30 }
 0x783   : > { %v3188_v16 = vpop.f32.mrf.mxu1 }
 0x784   : > { %v7038_v14 = vadd.f32 %v3236_v38, %v6141_v44  ;;  %v3235_v17 = vmul.f32 0.25, %v3188_v16  ;;  %3271 = vmax.xlane.f32.xlu1 %v7034_v3 }
 0x786   : > { %v7042_v43 = vadd.f32 %v3235_v17, %v6141_v44  ;;  %v4877_v45 = vpop.f32.mrf.mxu1  ;;  %3277 = vmax.xlane.f32.xlu0 %v7038_v14 }
 0x787   : > { %v3238_v28 = vmul.f32 0.25, %v4877_v45 }
 0x788   : > { %v3198_v4 = vpop.f32.mrf.mxu1  ;;  %3275 = vmax.xlane.f32.xlu1 %v7042_v43 }
 0x789   : > { %v7047_v33 = vadd.f32 %v3238_v28, %v6141_v44  ;;  %v3237_v55 = vmul.f32 0.25, %v3198_v4 }
 0x78b   : > { %v7050_v8 = vadd.f32 %v3237_v55, %v6141_v44  ;;  %v4880_v52 = vpop.f32.mrf.mxu1  ;;  %3281 = vmax.xlane.f32.xlu0 %v7047_v33 }
 0x78c   : > { %v3240_v47 = vmul.f32 0.25, %v4880_v52  ;;  %v7829_v52 = vld [vmem:[#allocation53_spill] sm:$0xff] }
 0x78d   : > { %v3208_v50 = vpop.f32.mrf.mxu1  ;;  %3279 = vmax.xlane.f32.xlu1 %v7050_v8 }
 0x78e   : > { %v7055_v38 = vadd.f32 %v3240_v47, %v6141_v44  ;;  %v3239_v16 = vmul.f32 0.25, %v3208_v50  ;;  %v7830_v47 = vld [vmem:[#allocation62_spill] sm:$0xff] }
 0x790   : > { %v7058_v17 = vadd.f32 %v3239_v16, %v6141_v44  ;;  %v4883_v45 = vpop.f32.mrf.mxu1  ;;  %3285 = vmax.xlane.f32.xlu0 %v7055_v38 }
 0x791   : > { %v3242_v28 = vmul.f32 0.25, %v4883_v45  ;;  %v7831_v45 = vld [vmem:[#allocation55_spill] sm:$0xff] }
 0x792   : > { %3283 = vmax.xlane.f32.xlu1 %v7058_v17  ;;  %v3218_v55 = vpop.f32.mrf.mxu1 }
 0x793   : > { %v7063_v4 = vadd.f32 %v3242_v28, %v6141_v44 }
 0x795   : > { %3289 = vmax.xlane.f32.xlu0 %v7063_v4 }
 0x796   : > { %1781 = vadd.xlane.f32.xlu1 %v6454_v56  ;;  %v3241_v56 = vmul.f32 0.25, %v3218_v55 }
 0x79a   : > { %1783 = vadd.xlane.f32.xlu1 %v6456_v12  ;;  %v7079_v12 = vadd.f32 %v3241_v56, %v6141_v44  ;;  %v7813_v44 = vld [vmem:[#allocation18_spill] sm:$0xff]  ;;  %v7832_v56 = vld [vmem:[#allocation57_spill] sm:$0xff] }
 0x79e   : > { %2568 = vadd.xlane.f32.xlu1 %v6840_v46  ;;  %v7819_v46 = vld [vmem:[#allocation50_spill] sm:$0xff] }
 0x7a2   : > { %2570 = vadd.xlane.f32.xlu1 %v6844_v58  ;;  %v7820_v58 = vld [vmem:[#allocation12_spill] sm:$0xff] }
 0x7a6   : > { %1787 = vadd.xlane.f32.xlu1 %v6468_v10  ;;  %v7811_v10 = vld [vmem:[#allocation16_spill] sm:$0xff] }
 0x7aa   : > { %2572 = vadd.xlane.f32.xlu1 %v6856_v60  ;;  %v7822_v60 = vld [vmem:[#allocation54_spill] sm:$0xff] }
 0x7ab   : > { %3435 = vrot.lane.b32.xlu0 %v7745_v36, %s5349_s29  ;;  %v7812_v36 = vld [vmem:[#allocation15_spill] sm:$0xff] }
 0x7ae   : > { %2574 = vadd.xlane.f32.xlu1 %v6852_v59  ;;  %v7821_v59 = vld [vmem:[#allocation52_spill] sm:$0xff] }
 0x7b2   : > { %1789 = vadd.xlane.f32.xlu1 %v6488_v48  ;;  %v7814_v48 = vld [vmem:[#allocation27_spill] sm:$0xff] }
 0x7b6   : > { %1791 = vadd.xlane.f32.xlu1 %v6492_v53  ;;  %v7816_v53 = vld [vmem:[#allocation28_spill] sm:$0xff] }
 0x7ba   : > { %2578 = vadd.xlane.f32.xlu1 %v6868_v18  ;;  %v7824_v18 = vld [vmem:[#allocation56_spill] sm:$0xff] }
 0x7be   : > { %3287 = vmax.xlane.f32.xlu1 %v7079_v12 }
 0x7c2   : > { %1795 = vadd.xlane.f32.xlu1 %v6564_v41  ;;  %v7817_v41 = vld [vmem:[#allocation17_spill] sm:$0xff] }
 0x7c6   : > { %2582 = vadd.xlane.f32.xlu1 %v6925_v11  ;;  %v7826_v11 = vld [vmem:[#allocation58_spill] sm:$0xff] }
 0x7ca   : > { %1785 = vadd.xlane.f32.xlu0 %v6459_v7  ;;  %1799 = vadd.xlane.f32.xlu1 %v6573_v57  ;;  %v7815_v7 = vld [vmem:[#allocation19_spill] sm:$0xff]  ;;  %v7818_v57 = vld [vmem:[#allocation48_spill] sm:$0xff] }
 0x7ce   : > { %2576 = vadd.xlane.f32.xlu0 %v6864_v2  ;;  %2586 = vadd.xlane.f32.xlu1 %v6934_v25  ;;  %v7823_v2 = vld [vmem:[#allocation47_spill] sm:$0xff] }
 0x7d2   : > { %1793 = vadd.xlane.f32.xlu0 %v7811_v10  ;;  %1803 = vadd.xlane.f32.xlu1 %v7812_v36 }
 0x7d6   : > { %2580 = vadd.xlane.f32.xlu0 %v6922_v54  ;;  %2590 = vadd.xlane.f32.xlu1 %v6942_v32  ;;  %v7825_v54 = vld [vmem:[#allocation49_spill] sm:$0xff]  ;;  %v7828_v32 = vld [vmem:[#allocation60_spill] sm:$0xff] }
 0x7da   : > { %1797 = vadd.xlane.f32.xlu0 %v7813_v44  ;;  %1807 = vadd.xlane.f32.xlu1 %v7814_v48  ;;  %v7833_v48 = vld [vmem:[#allocation59_spill] sm:$0xff] }
 0x7de   : > { %2584 = vadd.xlane.f32.xlu0 %v6928_v40  ;;  %2594 = vadd.xlane.f32.xlu1 %v6949_v62 }
 0x7e2   : > { %1801 = vadd.xlane.f32.xlu0 %v7815_v7  ;;  %1811 = vadd.xlane.f32.xlu1 %v7816_v53 }
 0x7e6   : > { %2588 = vadd.xlane.f32.xlu0 %v6936_v1  ;;  %2598 = vadd.xlane.f32.xlu1 %v6954_v23  ;;  %v7827_v1 = vld [vmem:[#allocation51_spill] sm:$0xff] }
 0x7ea   : > { %1805 = vadd.xlane.f32.xlu0 %v7817_v41  ;;  %1125 = vadd.xlane.f32.xlu1 %v7818_v57 }
 0x7ee   : > { %2592 = vadd.xlane.f32.xlu0 %v6944_v37  ;;  %1129 = vadd.xlane.f32.xlu1 %v7819_v46 }
 0x7f2   : > { %1809 = vadd.xlane.f32.xlu0 %v7820_v58  ;;  %1133 = vadd.xlane.f32.xlu1 %v7821_v59 }
 0x7f6   : > { %2596 = vadd.xlane.f32.xlu0 %v6952_v51  ;;  %1137 = vadd.xlane.f32.xlu1 %v7822_v60  ;;  %v7834_v60 = vld [vmem:[#allocation61_spill] sm:$0xff] }
 0x7fa   : > { %1123 = vadd.xlane.f32.xlu0 %v7823_v2  ;;  %1141 = vadd.xlane.f32.xlu1 %v7824_v18 }
 0x7fe   : > { %1127 = vadd.xlane.f32.xlu0 %v7825_v54  ;;  %1145 = vadd.xlane.f32.xlu1 %v7826_v11 }
 0x7ff   : > { %v3262_v40 = vpop.xlane.xlu0 %3261 }
 0x800   : > { %v3292_v10 = vsub.f32 %v7007_v9, %v3262_v40 }
 0x801   : > { %v3260_v25 = vpop.xlane.xlu1 %3259 }
 0x802   : > { %1131 = vadd.xlane.f32.xlu0 %v7827_v1  ;;  %1149 = vadd.xlane.f32.xlu1 %v7828_v32  ;;  %v3291_v37 = vsub.f32 %v7010_v0, %v3260_v25  ;;  %v3309_v53 = vmul.f32 1.442695, %v3292_v10 }
 0x803   : > { %v3266_v62 = vpop.xlane.xlu0 %3265 }
 0x804   : > { %v3307_v51 = vmul.f32 1.442695, %v3291_v37  ;;  %v3294_v41 = vsub.f32 %v7014_v15, %v3266_v62 }
 0x805   : > { %v3264_v23 = vpop.xlane.xlu1 %3263 }
 0x806   : > { %5157 = vpow2.f32 %v3307_v51  ;;  %1135 = vadd.xlane.f32.xlu0 %v7829_v52  ;;  %1153 = vadd.xlane.f32.xlu1 %v7830_v47  ;;  %v3293_v0 = vsub.f32 %v7018_v22, %v3264_v23  ;;  %v3313_v2 = vmul.f32 1.442695, %v3294_v41 }
 0x807   : > { %v3270_v50 = vpop.xlane.xlu0 %3269  ;;  %5159 = vpow2.f32 %v3309_v53 }
 0x808   : > { %v3311_v57 = vmul.f32 1.442695, %v3293_v0  ;;  %v3296_v59 = vsub.f32 %v7022_v27, %v3270_v50 }
 0x809   : > { %v3268_v16 = vpop.xlane.xlu1 %3267 }
 0x80a   : > { %1139 = vadd.xlane.f32.xlu0 %v7831_v45  ;;  %v3295_v46 = vsub.f32 %v7026_v34, %v3268_v16  ;;  %5161 = vpow2.f32 %v3311_v57  ;;  %v3317_v54 = vmul.f32 1.442695, %v3296_v59 }
 0x80b   : > { %v3274_v28 = vpop.xlane.xlu0 %3273  ;;  %5163 = vpow2.f32 %v3313_v2 }
 0x80c   : > { %v3315_v18 = vmul.f32 1.442695, %v3295_v46  ;;  %v3298_v15 = vsub.f32 %v7030_v30, %v3274_v28 }
 0x80d   : > { %v3272_v55 = vpop.xlane.xlu1 %3271 }
 0x80e   : > { %1143 = vadd.xlane.f32.xlu0 %v7832_v56  ;;  %v3297_v9 = vsub.f32 %v7034_v3, %v3272_v55  ;;  %5165 = vpow2.f32 %v3315_v18  ;;  %v3321_v32 = vmul.f32 1.442695, %v3298_v15 }
 0x80f   : > { %v3278_v36 = vpop.xlane.xlu0 %3277  ;;  %5167 = vpow2.f32 %v3317_v54 }
 0x810   : > { %v3319_v40 = vmul.f32 1.442695, %v3297_v9  ;;  %v3300_v37 = vsub.f32 %v7038_v14, %v3278_v36 }
 0x811   : > { %v3276_v44 = vpop.xlane.xlu1 %3275 }
 0x812   : > { %1147 = vadd.xlane.f32.xlu0 %v7833_v48  ;;  %v3299_v25 = vsub.f32 %v7042_v43, %v3276_v44  ;;  %5169 = vpow2.f32 %v3319_v40  ;;  %v3325_v43 = vmul.f32 1.442695, %v3300_v37 }
 0x813   : > { %v7122_v7 = vpop.eup %5157 }
 0x814   : > { %v3282_v58 = vpop.xlane.xlu0 %3281  ;;  %4916 = vmatprep.mubr.f32.mxu0 %v7122_v7  ;;  %v3323_v30 = vmul.f32 1.442695, %v3299_v25  ;;  %v7139_v50 = vpop.eup %5159 }
 0x816   : > { %1151 = vadd.xlane.f32.xlu0 %v7834_v60  ;;  %v3280_v22 = vpop.xlane.xlu1 %3279 }
 0x817   : > { %v3301_v23 = vsub.f32 %v7050_v8, %v3280_v22  ;;  %v7141_v8 = vpop.eup %5161 }
 0x819   : > { %v3286_v11 = vpop.xlane.xlu0 %3285  ;;  %v3327_v47 = vmul.f32 1.442695, %v3301_v23 }
 0x81a   : > { %v3304_v34 = vsub.f32 %v7055_v38, %v3286_v11  ;;  %v7835_v11 = vld [vmem:[#allocation39_spill] sm:$0xff] }
 0x81b   : > { %v3284_v27 = vpop.xlane.xlu1 %3283 }
 0x81c   : > { %v3333_v3 = vmul.f32 1.442695, %v3304_v34  ;;  %v3303_v1 = vsub.f32 %v7058_v17, %v3284_v27  ;;  %v3302_v17 = vsub.f32 %v7047_v33, %v3282_v58  ;;  %v7145_v33 = vpop.eup %5163 }
 0x81d   : > { %v7147_v28 = vpop.eup %5165 }
 0x81e   : > { %v3331_v62 = vmul.f32 1.442695, %v3303_v1  ;;  %v7135_v51 = vpop.xlane.xlu0 %3289  ;;  %5171 = vpow2.f32 %v3333_v3  ;;  %v3329_v16 = vmul.f32 1.442695, %v3302_v17  ;;  %v7150_v55 = vpop.eup %5167  ;;  %v7836_v1 = vld [vmem:[#allocation20_spill] sm:$0xff] }
 0x81f   : > { %v1782_v38 = vpop.xlane.xlu1 %1781  ;;  %v7153_v56 = vpop.eup %5169 }
 0x820   : > { %5173 = vpow2.f32 %v3331_v62 }
 0x821   : > { %5175 = vrcp.f32 %v1782_v38 }
 0x822   : > { %5177 = vpow2.f32 %v3321_v32  ;;  %v3436_v52 = vpop.permute.xlu0 %3435 }
 0x823   : > { %5179 = vpow2.f32 %v3323_v30  ;;  %4914 = vmatprep.subr.mxu0 %v3436_v52  ;;  %4995 = vmatprep.subr.mxu1 %v3436_v52  ;;  %v1784_v14 = vpop.xlane.xlu1 %1783 }
 0x824   : > { %4915 = vmatpush3.msra.mxu0 %v3436_v52  ;;  %5011 = vmatpush3.msra.mxu1 %v3436_v52  ;;  %5181 = vrcp.f32 %v1784_v14 }
 0x825   : > { %4917 = vmatmul.mubr.f32.vlgmr.msra.gmra.mxu0 %v7139_v50  ;;  %5183 = vpow2.f32 %v3325_v43 }
 0x826   : > { %4919 = vmatprep.mubr.f32.mxu0 %v7141_v8  ;;  %5185 = vpow2.f32 %v3327_v47 }
 0x827   : > { %v2569_v45 = vpop.xlane.xlu1 %2568 }
 0x828   : > { %5187 = vrcp.f32 %v2569_v45 }
 0x829   : > { %4920 = vmatmul.mubr.f32.gmra.mxu0 %v7145_v33  ;;  %5189 = vpow2.f32 %v3329_v16 }
 0x82a   : > { %4922 = vmatprep.mubr.f32.mxu0 %v7147_v28 }
 0x82b   : > { %v2571_v10 = vpop.xlane.xlu1 %2570  ;;  %v7155_v36 = vpop.eup %5171 }
 0x82c   : > { %5191 = vrcp.f32 %v2571_v10 }
 0x82d   : > { %v7157_v0 = vpop.eup %5173  ;;  %4923 = vmatmul.mubr.f32.gmra.mxu0 %v7150_v55 }
 0x82e   : > { %v5176_v44 = vpop.eup %5175  ;;  %4925 = vmatprep.mubr.f32.mxu0 %v7153_v56  ;;  %4934 = vmatprep.mubr.f32.mxu1 %v7157_v0 }
 0x82f   : > { %v7162_v48 = vpop.eup %5177  ;;  %v1829_v53 = vmul.f32 %v5176_v44, %v1782_v38  ;;  %4935 = vmatmul.mubr.f32.vlgmr.msra.gmra.mxu1 %v7155_v36  ;;  %v1788_v41 = vpop.xlane.xlu1 %1787 }
 0x830   : > { %v7165_v57 = vpop.eup %5179  ;;  %5193 = vrcp.f32 %v1788_v41 }
 0x831   : > { %v5182_v46 = vpop.eup %5181  ;;  %v1845_v58 = vsub.f32 2.0, %v1829_v53  ;;  %4926 = vmatmul.mubr.f32.gmra.mxu0 %v7162_v48 }
 0x832   : > { %v1830_v59 = vmul.f32 %v5182_v46, %v1784_v14  ;;  %4928 = vmatprep.mubr.f32.mxu0 %v7165_v57  ;;  %v7169_v9 = vpop.eup %5183 }
 0x833   : > { %v1861_v60 = vmul.f32 %v5176_v44, %v1845_v58  ;;  %v7171_v22 = vpop.xlane.xlu1 %2572  ;;  %v7173_v2 = vpop.eup %5185 }
 0x834   : > { %v1846_v18 = vsub.f32 2.0, %v1830_v59 }
 0x835   : > { %v5188_v54 = vpop.eup %5187  ;;  %4929 = vmatmul.mubr.f32.gmra.mxu0 %v7169_v9  ;;  %v2086_v15 = vmul.f32 %v7835_v11, %v1861_v60 }
 0x836   : > { %v1862_v40 = vmul.f32 %v5182_v46, %v1846_v18  ;;  %v2616_v34 = vmul.f32 %v5188_v54, %v2569_v45  ;;  %4931 = vmatprep.mubr.f32.mxu0 %v7173_v2  ;;  %v7179_v27 = vpop.eup %5189  ;;  %v7837_v46 = vld [vmem:[#allocation21_spill] sm:$0xff] }
 0x837   : > { %2118 = vrot.lane.b32.xlu0 %v2086_v15, %s5348_s28  ;;  %v2575_v25 = vpop.xlane.xlu1 %2574 }
 0x838   : > { %v2632_v3 = vsub.f32 2.0, %v2616_v34  ;;  %5195 = vrcp.f32 %v2575_v25  ;;  %v2087_v32 = vmul.f32 %v7836_v1, %v1862_v40 }
 0x839   : > { %v5192_v37 = vpop.eup %5191  ;;  %4932 = vmatmul.mubr.f32.gmra.mxu0 %v7179_v27 }
 0x83a   : > { %v2648_v62 = vmul.f32 %v5188_v54, %v2632_v3  ;;  %v2617_v30 = vmul.f32 %v5192_v37, %v2571_v10  ;;  %2120 = vrot.lane.b32.xlu1 %v2087_v32, %s5348_s28  ;;  %v3306_v10 = vsub.f32 %v7063_v4, %v7135_v51 }
 0x83b   : > { %v7184_v23 = vpop.xlane.xlu1 %1789 }
 0x83c   : > { %v2633_v38 = vsub.f32 2.0, %v2617_v30  ;;  %v2857_v43 = vmul.f32 %v6976_v31, %v2648_v62 }
 0x83d   : > { %v5194_v52 = vpop.eup %5193 }
 0x83e   : > { %v2649_v17 = vmul.f32 %v5192_v37, %v2633_v38  ;;  %v1832_v47 = vmul.f32 %v5194_v52, %v1788_v41  ;;  %2889 = vrot.lane.b32.xlu1 %v2857_v43, %s5345_s25  ;;  %v3337_v41 = vmul.f32 1.442695, %v3306_v10 }
 0x83f   : > { %v1792_v14 = vpop.xlane.xlu1 %1791 }
 0x840   : > { %v1848_v16 = vsub.f32 2.0, %v1832_v47  ;;  %5197 = vrcp.f32 %v1792_v14  ;;  %v2858_v45 = vmul.f32 %v6974_v21, %v2649_v17 }
 0x842   : > { %v1864_v44 = vmul.f32 %v5194_v52, %v1848_v16  ;;  %2891 = vrot.lane.b32.xlu1 %v2858_v45, %s5345_s25 }
 0x843   : > { %v2579_v53 = vpop.xlane.xlu1 %2578 }
 0x844   : > { %5199 = vrcp.f32 %v2579_v53  ;;  %v2089_v31 = vmul.f32 %v7837_v46, %v1864_v44 }
 0x845   : > { %v5196_v58 = vpop.eup %5195  ;;  %5201 = vpow2.f32 %v3337_v41 }
 0x846   : > { %v2619_v59 = vmul.f32 %v5196_v58, %v2575_v25  ;;  %2124 = vrot.lane.b32.xlu1 %v2089_v31, %s5348_s28 }
 0x847   : > { %v3288_v60 = vpop.xlane.xlu1 %3287 }
 0x848   : > { %v2635_v18 = vsub.f32 2.0, %v2619_v59  ;;  %v3305_v54 = vsub.f32 %v7079_v12, %v3288_v60 }
 0x84a   : > { %v2651_v21 = vmul.f32 %v5196_v58, %v2635_v18  ;;  %v3335_v11 = vmul.f32 1.442695, %v3305_v54  ;;  %v7839_v18 = vld [vmem:[#allocation23_spill] sm:$0xff] }
 0x84b   : > { %v1796_v15 = vpop.xlane.xlu1 %1795 }
 0x84c   : > { %5203 = vpow2.f32 %v3335_v11  ;;  %v2860_v4 = vmul.f32 %v6978_v42, %v2651_v21  ;;  %v7838_v42 = vld [vmem:[#allocation22_spill] sm:$0xff] }
 0x84d   : > { %v5198_v51 = vpop.eup %5197  ;;  %5205 = vrcp.f32 %v1796_v15 }
 0x84e   : > { %v1834_v40 = vmul.f32 %v5198_v51, %v1792_v14  ;;  %2895 = vrot.lane.b32.xlu1 %v2860_v4, %s5345_s25  ;;  %5207 = vrcp.f32 %v7171_v22 }
 0x84f   : > { %v7197_v34 = vpop.xlane.xlu1 %2582  ;;  %5209 = vrcp.f32 %v7184_v23 }
 0x850   : > { %v1850_v25 = vsub.f32 2.0, %v1834_v40 }
 0x851   : > { %v5200_v3 = vpop.eup %5199 }
 0x852   : > { %v1866_v1 = vmul.f32 %v5198_v51, %v1850_v25  ;;  %v2621_v12 = vmul.f32 %v5200_v3, %v2579_v53  ;;  %v7207_v17 = vpop.eup %5201 }
 0x853   : > { %v1786_v32 = vpop.xlane.xlu0 %1785  ;;  %v7201_v37 = vpop.xlane.xlu1 %1799 }
 0x854   : > { %v2637_v62 = vsub.f32 2.0, %v2621_v12  ;;  %5211 = vrcp.f32 %v1786_v32  ;;  %v2091_v30 = vmul.f32 %v7838_v42, %v1866_v1  ;;  %v7840_v42 = vld [vmem:[#allocation40_spill] sm:$0xff] }
 0x856   : > { %v2653_v38 = vmul.f32 %v5200_v3, %v2637_v62  ;;  %2128 = vrot.lane.b32.xlu1 %v2091_v30, %s5348_s28 }
 0x857   : > { %v2577_v43 = vpop.xlane.xlu0 %2576  ;;  %v7205_v52 = vpop.xlane.xlu1 %2586 }
 0x858   : > { %5213 = vrcp.f32 %v2577_v43  ;;  %v2862_v47 = vmul.f32 %v6982_v5, %v2653_v38 }
 0x859   : > { %v7210_v14 = vpop.eup %5203 }
 0x85a   : > { %v5206_v16 = vpop.eup %5205  ;;  %2899 = vrot.lane.b32.xlu1 %v2862_v47, %s5345_s25  ;;  %4937 = vmatprep.mubr.f32.mxu1 %v7210_v14 }
 0x85b   : > { %v1836_v45 = vmul.f32 %v5206_v16, %v1796_v15  ;;  %v1794_v44 = vpop.xlane.xlu0 %1793  ;;  %4938 = vmatmul.mubr.f32.gmra.mxu1 %v7207_v17  ;;  %v7215_v10 = vpop.xlane.xlu1 %1803 }
 0x85c   : > { %5215 = vrcp.f32 %v1794_v44  ;;  %v5208_v53 = vpop.eup %5207 }
 0x85d   : > { %v1852_v46 = vsub.f32 2.0, %v1836_v45  ;;  %v5210_v59 = vpop.eup %5209  ;;  %v2618_v41 = vmul.f32 %v5208_v53, %v7171_v22 }
 0x85e   : > { %v1833_v51 = vmul.f32 %v5210_v59, %v7184_v23 }
 0x85f   : > { %v1868_v31 = vmul.f32 %v5206_v16, %v1852_v46  ;;  %v7217_v58 = vpop.xlane.xlu0 %2580  ;;  %v7219_v5 = vpop.xlane.xlu1 %2590  ;;  %v2634_v4 = vsub.f32 2.0, %v2618_v41 }
 0x860   : > { %v1849_v62 = vsub.f32 2.0, %v1833_v51 }
 0x861   : > { %v5212_v60 = vpop.eup %5211  ;;  %v2093_v54 = vmul.f32 %v7839_v18, %v1868_v31  ;;  %v2650_v22 = vmul.f32 %v5208_v53, %v2634_v4  ;;  %v7841_v18 = vld [vmem:[#allocation43_spill] sm:$0xff] }
 0x862   : > { %v1831_v21 = vmul.f32 %v5212_v60, %v1786_v32  ;;  %v1865_v23 = vmul.f32 %v5210_v59, %v1849_v62 }
 0x863   : > { %v7223_v11 = vpop.xlane.xlu0 %1797  ;;  %2132 = vrot.lane.b32.xlu1 %v2093_v54, %s5348_s28  ;;  %v7226_v15 = vpop.xlane.xlu1 %1807  ;;  %v2859_v31 = vmul.f32 %v6980_v6, %v2650_v22 }
 0x864   : > { %v1847_v40 = vsub.f32 2.0, %v1831_v21  ;;  %v2090_v54 = vmul.f32 %v7841_v18, %v1865_v23 }
 0x865   : > { %v5214_v25 = vpop.eup %5213 }
 0x866   : > { %v1863_v3 = vmul.f32 %v5212_v60, %v1847_v40  ;;  %v2620_v30 = vmul.f32 %v5214_v25, %v2577_v43  ;;  %v7842_v40 = vld [vmem:[#allocation33_spill] sm:$0xff] }
 0x867   : > { %v7229_v1 = vpop.xlane.xlu0 %2584  ;;  %v7231_v12 = vpop.xlane.xlu1 %2594 }
 0x868   : > { %v2088_v32 = vmul.f32 %v7840_v42, %v1863_v3  ;;  %v2636_v45 = vsub.f32 2.0, %v2620_v30 }
 0x869   : > { %v5216_v38 = vpop.eup %5215 }
 0x86a   : > { %2122 = vrot.lane.b32.xlu0 %v2088_v32, %s5348_s28  ;;  %v1835_v46 = vmul.f32 %v5216_v38, %v1794_v44  ;;  %v2652_v60 = vmul.f32 %v5214_v25, %v2636_v45 }
 0x86b   : > { %v7235_v47 = vpop.xlane.xlu0 %1801  ;;  %v7237_v16 = vpop.xlane.xlu1 %1811 }
 0x86c   : > { %v1851_v43 = vsub.f32 2.0, %v1835_v46  ;;  %v2861_v59 = vmul.f32 %v6984_v26, %v2652_v60 }
 0x86e   : > { %2893 = vrot.lane.b32.xlu0 %v2859_v31, %s5345_s25  ;;  %v1867_v44 = vmul.f32 %v5216_v38, %v1851_v43 }
 0x86f   : > { %v7241_v41 = vpop.xlane.xlu0 %2588  ;;  %v7243_v53 = vpop.xlane.xlu1 %2598 }
 0x870   : > { %v2092_v3 = vmul.f32 %v7842_v40, %v1867_v44 }
 0x872   : > { %2126 = vrot.lane.b32.xlu0 %v2090_v54, %s5348_s28  ;;  %v7843_v54 = vld [vmem:[#allocation14_spill] sm:$0xff] }
 0x873   : > { %v7247_v21 = vpop.xlane.xlu0 %1805  ;;  %v1126_v4 = vpop.xlane.xlu1 %1125 }
 0x874   : > { %5217 = vrcp.f32 %v1126_v4 }
 0x876   : > { %2897 = vrot.lane.b32.xlu0 %v2861_v59, %s5345_s25 }
 0x877   : > { %v7251_v6 = vpop.xlane.xlu0 %2592  ;;  %v1130_v51 = vpop.xlane.xlu1 %1129 }
 0x878   : > { %5219 = vrcp.f32 %v1130_v51 }
 0x87a   : > { %2130 = vrot.lane.b32.xlu0 %v2092_v3, %s5348_s28 }
 0x87b   : > { %v7255_v25 = vpop.xlane.xlu0 %1809  ;;  %v1134_v22 = vpop.xlane.xlu1 %1133 }
 0x87c   : > { %5221 = vrcp.f32 %v1134_v22 }
 0x87f   : > { %v7257_v62 = vpop.xlane.xlu0 %2596  ;;  %v1138_v42 = vpop.xlane.xlu1 %1137 }
 0x880   : > { %5223 = vrcp.f32 %v1138_v42 }
 0x881   : > { %v5218_v26 = vpop.eup %5217 }
 0x882   : > { %v1172_v32 = vmul.f32 %v5218_v26, %v1126_v4 }
 0x883   : > { %v1124_v30 = vpop.xlane.xlu0 %1123  ;;  %v1142_v38 = vpop.xlane.xlu1 %1141 }
 0x884   : > { %5225 = vrcp.f32 %v1124_v30  ;;  %v1188_v23 = vsub.f32 2.0, %v1172_v32 }
 0x885   : > { %5227 = vrcp.f32 %v1142_v38  ;;  %v5220_v45 = vpop.eup %5219 }
 0x886   : > { %v1204_v46 = vmul.f32 %v5218_v26, %v1188_v23  ;;  %v1174_v31 = vmul.f32 %v5220_v45, %v1130_v51  ;;  %v7844_v26 = vld [vmem:[#allocation10_spill] sm:$0xff] }
 0x887   : > { %v1128_v60 = vpop.xlane.xlu0 %1127  ;;  %3341 = vadd.xlane.f32.xlu1 %v7139_v50  ;;  %v1146_v43 = vpop.xlane.xlu1 %1145 }
 0x888   : > { %5229 = vrcp.f32 %v1128_v60  ;;  %v1190_v18 = vsub.f32 2.0, %v1174_v31  ;;  %v1365_v59 = vmul.f32 %v7843_v54, %v1204_v46 }
 0x889   : > { %5231 = vrcp.f32 %v1146_v43  ;;  %v5222_v44 = vpop.eup %5221 }
 0x88a   : > { %v1206_v40 = vmul.f32 %v5220_v45, %v1190_v18  ;;  %v1176_v4 = vmul.f32 %v5222_v44, %v1134_v22  ;;  %1381 = vst.msk [vmem:[#allocation2 + $0x8] sm:$0xff] %vm801_vm1, %v1365_v59  ;;  %v7845_v45 = vld [vmem:[#allocation13_spill] sm:$0xff] }
 0x88b   : > { %v1132_v3 = vpop.xlane.xlu0 %1131  ;;  %3339 = vadd.xlane.f32.xlu1 %v7122_v7  ;;  %v1150_v32 = vpop.xlane.xlu1 %1149 }
 0x88c   : > { %5233 = vrcp.f32 %v1132_v3  ;;  %v1192_v51 = vsub.f32 2.0, %v1176_v4  ;;  %v1367_v50 = vmul.f32 %v7844_v26, %v1206_v40 }
 0x88d   : > { %5235 = vrcp.f32 %v1150_v32  ;;  %v5224_v23 = vpop.eup %5223 }
 0x88e   : > { %v1208_v20 = vmul.f32 %v5222_v44, %v1192_v51  ;;  %v1178_v31 = vmul.f32 %v5224_v23, %v1138_v42  ;;  %1383 = vst.msk [vmem:[#allocation2 + $0x18] sm:$0xff] %vm801_vm1, %v1367_v50  ;;  %v7846_v51 = vld [vmem:[#allocation11_spill] sm:$0xff] }
 0x88f   : > { %v1136_v61 = vpop.xlane.xlu0 %1135  ;;  %3345 = vadd.xlane.f32.xlu1 %v7145_v33  ;;  %v1154_v46 = vpop.xlane.xlu1 %1153 }
 0x890   : > { %5237 = vrcp.f32 %v1136_v61  ;;  %v1194_v7 = vsub.f32 2.0, %v1178_v31  ;;  %v1369_v18 = vmul.f32 %v7845_v45, %v1208_v20 }
 0x891   : > { %v5226_v22 = vpop.eup %5225  ;;  %5239 = vrcp.f32 %v1154_v46 }
 0x892   : > { %v5228_v54 = vpop.eup %5227  ;;  %v1171_v59 = vmul.f32 %v5226_v22, %v1124_v30  ;;  %v1210_v4 = vmul.f32 %v5224_v23, %v1194_v7  ;;  %1385 = vst.msk [vmem:[#allocation2 + $0x28] sm:$0xff] %vm801_vm1, %v1369_v18 }
 0x893   : > { %v1180_v19 = vmul.f32 %v5228_v54, %v1142_v38  ;;  %v1140_v40 = vpop.xlane.xlu0 %1139  ;;  %3343 = vadd.xlane.f32.xlu1 %v7141_v8  ;;  %v7847_v8 = vld [vmem:[#allocation29_spill] sm:$0xff] }
 0x894   : > { %v1187_v42 = vsub.f32 2.0, %v1171_v59  ;;  %5241 = vrcp.f32 %v1140_v40  ;;  %v1371_v26 = vmul.f32 %v7846_v51, %v1210_v4  ;;  %v7849_v4 = vld [vmem:[#allocation30_spill] sm:$0xff] }
 0x895   : > { %v5230_v33 = vpop.eup %5229  ;;  %v1196_v44 = vsub.f32 2.0, %v1180_v19  ;;  %v7848_v19 = vld [vmem:[#allocation6_spill] sm:$0xff] }
 0x896   : > { %v5232_v50 = vpop.eup %5231  ;;  %v1203_v31 = vmul.f32 %v5226_v22, %v1187_v42  ;;  %v1173_v13 = vmul.f32 %v5230_v33, %v1128_v60  ;;  %1387 = vst.msk [vmem:[#allocation2 + $0x38] sm:$0xff] %vm801_vm1, %v1371_v26 }
 0x897   : > { %v1212_v49 = vmul.f32 %v5228_v54, %v1196_v44  ;;  %v1182_v20 = vmul.f32 %v5232_v50, %v1146_v43  ;;  %v1144_v45 = vpop.xlane.xlu0 %1143  ;;  %3349 = vadd.xlane.f32.xlu1 %v7150_v55 }
 0x898   : > { %v1189_v30 = vsub.f32 2.0, %v1173_v13  ;;  %5243 = vrcp.f32 %v1144_v45  ;;  %v1364_v38 = vmul.f32 %v7847_v8, %v1203_v31 }
 0x899   : > { %v5234_v23 = vpop.eup %5233  ;;  %v1198_v7 = vsub.f32 2.0, %v1182_v20  ;;  %3347 = vadd.xlane.f32.xlu0 %v7147_v28  ;;  %v1373_v18 = vmul.f32 %v7848_v19, %v1212_v49  ;;  %v7850_v49 = vld [vmem:[#allocation9_spill] sm:$0xff]  ;;  %v7851_v20 = vld [vmem:[#allocation8_spill] sm:$0xff]  ;;  %v7853_v19 = vld [vmem:[#allocation31_spill] sm:$0xff] }
 0x89a   : > { %v5236_v59 = vpop.eup %5235  ;;  %v1205_v22 = vmul.f32 %v5230_v33, %v1189_v30  ;;  %v1175_v60 = vmul.f32 %v5234_v23, %v1132_v3  ;;  %1380 = vst.msk [vmem:[#allocation2] sm:$0xff] %vm801_vm1, %v1364_v38 }
 0x89b   : > { %v1214_v43 = vmul.f32 %v5232_v50, %v1198_v7  ;;  %v1184_v54 = vmul.f32 %v5236_v59, %v1150_v32  ;;  %v1148_v55 = vpop.xlane.xlu0 %1147  ;;  %3353 = vadd.xlane.f32.xlu1 %v7162_v48  ;;  %1389 = vst.msk [vmem:[#allocation2 + $0x48] sm:$0xff] %vm801_vm1, %v1373_v18 }
 0x89c   : > { %v1191_v13 = vsub.f32 2.0, %v1175_v60  ;;  %5245 = vrcp.f32 %v1148_v55  ;;  %v1366_v42 = vmul.f32 %v7849_v4, %v1205_v22 }
 0x89d   : > { %v5238_v44 = vpop.eup %5237  ;;  %v1200_v28 = vsub.f32 2.0, %v1184_v54  ;;  %3351 = vadd.xlane.f32.xlu0 %v7153_v56  ;;  %v1375_v33 = vmul.f32 %v7850_v49, %v1214_v43  ;;  %5247 = vrcp.f32 %v7197_v34  ;;  %v7855_v43 = vld [vmem:[#allocation32_spill] sm:$0xff] }
 0x89e   : > { %v5240_v3 = vpop.eup %5239  ;;  %v1207_v51 = vmul.f32 %v5234_v23, %v1191_v13  ;;  %v1177_v32 = vmul.f32 %v5238_v44, %v1136_v61  ;;  %1382 = vst.msk [vmem:[#allocation2 + $0x10] sm:$0xff] %vm801_vm1, %v1366_v42  ;;  %v7852_v61 = vld [vmem:[#allocation7_spill] sm:$0xff] }
 0x89f   : > { %v1216_v48 = vmul.f32 %v5236_v59, %v1200_v28  ;;  %v1186_v26 = vmul.f32 %v5240_v3, %v1154_v46  ;;  %v1152_v50 = vpop.xlane.xlu0 %1151  ;;  %3357 = vadd.xlane.f32.xlu1 %v7169_v9  ;;  %1391 = vst.msk [vmem:[#allocation2 + $0x58] sm:$0xff] %vm801_vm1, %v1375_v33  ;;  %v7856_v28 = vld [vmem:[#allocation4_spill] sm:$0xff] }
 0x8a0   : > { %v1193_v31 = vsub.f32 2.0, %v1177_v32  ;;  %5249 = vrcp.f32 %v1152_v50  ;;  %v1368_v56 = vmul.f32 %v7851_v20, %v1207_v51 }
 0x8a1   : > { %v5242_v30 = vpop.eup %5241  ;;  %5251 = vrcp.f32 %v7201_v37  ;;  %v1202_v8 = vsub.f32 2.0, %v1186_v26  ;;  %3355 = vadd.xlane.f32.xlu0 %v7165_v57  ;;  %v1377_v38 = vmul.f32 %v7852_v61, %v1216_v48  ;;  %v7854_v57 = vld [vmem:[#allocation38_spill] sm:$0xff]  ;;  %v7857_v48 = vld [vmem:[#allocation5_spill] sm:$0xff] }
 0x8a2   : > { %v1209_v23 = vmul.f32 %v5238_v44, %v1193_v31  ;;  %v1179_v7 = vmul.f32 %v5242_v30, %v1140_v40  ;;  %1384 = vst.msk [vmem:[#allocation2 + $0x20] sm:$0xff] %vm801_vm1, %v1368_v56  ;;  %5253 = vrcp.f32 %v7217_v58 }
 0x8a3   : > { %v1218_v46 = vmul.f32 %v5240_v3, %v1202_v8  ;;  %3361 = vadd.xlane.f32.xlu1 %v7179_v27  ;;  %1393 = vst.msk [vmem:[#allocation2 + $0x68] sm:$0xff] %vm801_vm1, %v1377_v38  ;;  %5255 = vrcp.f32 %v7205_v52 }
 0x8a4   : > { %v1195_v9 = vsub.f32 2.0, %v1179_v7  ;;  %v1370_v18 = vmul.f32 %v7853_v19, %v1209_v23  ;;  %5257 = vrcp.f32 %v7223_v11 }
 0x8a5   : > { %v5244_v59 = vpop.eup %5243  ;;  %3359 = vadd.xlane.f32.xlu0 %v7173_v2  ;;  %v1379_v22 = vmul.f32 %v7854_v57, %v1218_v46  ;;  %5259 = vrcp.f32 %v7215_v10 }
 0x8a6   : > { %v1211_v40 = vmul.f32 %v5242_v30, %v1195_v9  ;;  %v1181_v60 = vmul.f32 %v5244_v59, %v1144_v45  ;;  %1386 = vst.msk [vmem:[#allocation2 + $0x30] sm:$0xff] %vm801_vm1, %v1370_v18  ;;  %5261 = vrcp.f32 %v7229_v1  ;;  %v7858_v30 = vld [vmem:[#allocation3_spill] sm:$0xff] }
 0x8a7   : > { %3365 = vadd.xlane.f32.xlu1 %v7155_v36  ;;  %1395 = vst.msk [vmem:[#allocation2 + $0x78] sm:$0xff] %vm801_vm1, %v1379_v22  ;;  %5263 = vrcp.f32 %v7219_v5 }
 0x8a8   : > { %v1197_v27 = vsub.f32 2.0, %v1181_v60  ;;  %v1372_v54 = vmul.f32 %v7855_v43, %v1211_v40  ;;  %5265 = vrcp.f32 %v7235_v47  ;;  %v7859_v43 = vld [vmem:[#allocation35_spill] sm:$0xff] }
 0x8a9   : > { %v5246_v13 = vpop.eup %5245  ;;  %v2119_v2 = vpop.permute.xlu0 %2118  ;;  %3363 = vadd.xlane.f32.xlu0 %v7157_v0  ;;  %5267 = vrcp.f32 %v7226_v15 }
 0x8aa   : > { %v1213_v4 = vmul.f32 %v5244_v59, %v1197_v27  ;;  %v1183_v45 = vmul.f32 %v5246_v13, %v1148_v55  ;;  %2167 = vst.msk [vmem:[#allocation2] sm:$0xff] %vm2166_vm3, %v2119_v2  ;;  %v5248_v36 = vpop.eup %5247  ;;  %5269 = vrcp.f32 %v7241_v41 }
 0x8ab   : > { %1388 = vst.msk [vmem:[#allocation2 + $0x40] sm:$0xff] %vm801_vm1, %v1372_v54  ;;  %3369 = vadd.xlane.f32.xlu1 %v7207_v17  ;;  %v2623_v55 = vmul.f32 %v5248_v36, %v7197_v34  ;;  %5271 = vrcp.f32 %v7231_v12 }
 0x8ac   : > { %v1199_v42 = vsub.f32 2.0, %v1183_v45  ;;  %v2121_v44 = vpop.permute.xlu1 %2120  ;;  %v1374_v49 = vmul.f32 %v7856_v28, %v1213_v4  ;;  %5273 = vrcp.f32 %v7247_v21 }
 0x8ad   : > { %v5250_v33 = vpop.eup %5249  ;;  %3367 = vadd.xlane.f32.xlu0 %v7210_v14  ;;  %2168 = vst.msk [vmem:[#allocation2 + $0x8] sm:$0xff] %vm2166_vm3, %v2121_v44  ;;  %v2639_v20 = vsub.f32 2.0, %v2623_v55  ;;  %5275 = vrcp.f32 %v7237_v16 }
 0x8ae   : > { %v5252_v0 = vpop.eup %5251  ;;  %v1215_v3 = vmul.f32 %v5246_v13, %v1199_v42  ;;  %v1185_v51 = vmul.f32 %v5250_v33, %v1152_v50  ;;  %1390 = vst.msk [vmem:[#allocation2 + $0x50] sm:$0xff] %vm801_vm1, %v1374_v49  ;;  %5277 = vrcp.f32 %v7251_v6 }
 0x8af   : > { %v1838_v31 = vmul.f32 %v5252_v0, %v7201_v37  ;;  %v5254_v14 = vpop.eup %5253  ;;  %v2655_v37 = vmul.f32 %v5248_v36, %v2639_v20  ;;  %5279 = vrcp.f32 %v7243_v53 }
 0x8b0   : > { %v1201_v17 = vsub.f32 2.0, %v1185_v51  ;;  %v2890_v32 = vpop.permute.xlu1 %2889  ;;  %v1376_v26 = vmul.f32 %v7857_v48, %v1215_v3  ;;  %v5256_v50 = vpop.eup %5255  ;;  %v2622_v23 = vmul.f32 %v5254_v14, %v7217_v58  ;;  %5281 = vrcp.f32 %v7255_v25  ;;  %v7860_v3 = vld [vmem:[#allocation45_spill] sm:$0xff] }
 0x8b1   : > { %2938 = vst.msk [vmem:[#allocation2] sm:$0xff] %vm2937_vm4, %v2890_v32  ;;  %v5258_v61 = vpop.eup %5257  ;;  %v1854_v38 = vsub.f32 2.0, %v1838_v31  ;;  %v2625_v7 = vmul.f32 %v5256_v50, %v7205_v52  ;;  %v2864_v52 = vmul.f32 %v6986_v35, %v2655_v37  ;;  %5283 = vrcp.f32 %v7257_v62  ;;  %v7861_v48 = vld [vmem:[#allocation41_spill] sm:$0xff] }
 0x8b2   : > { %v1217_v34 = vmul.f32 %v5250_v33, %v1201_v17  ;;  %1392 = vst.msk [vmem:[#allocation2 + $0x60] sm:$0xff] %vm801_vm1, %v1376_v26  ;;  %v5260_v46 = vpop.eup %5259  ;;  %v1837_v9 = vmul.f32 %v5258_v61, %v7223_v11  ;;  %v2638_v59 = vsub.f32 2.0, %v2622_v23 }
 0x8b3   : > { %v1870_v18 = vmul.f32 %v5252_v0, %v1854_v38  ;;  %v5262_v58 = vpop.eup %5261  ;;  %v2641_v57 = vsub.f32 2.0, %v2625_v7  ;;  %v1840_v22 = vmul.f32 %v5260_v46, %v7215_v10 }
 0x8b4   : > { %v2892_v56 = vpop.permute.xlu1 %2891  ;;  %v1378_v8 = vmul.f32 %v7858_v30, %v1217_v34  ;;  %v5264_v40 = vpop.eup %5263  ;;  %v1853_v60 = vsub.f32 2.0, %v1837_v9  ;;  %v2654_v11 = vmul.f32 %v5254_v14, %v2638_v59  ;;  %v2624_v27 = vmul.f32 %v5262_v58, %v7229_v1 }
 0x8b5   : > { %2939 = vst.msk [vmem:[#allocation2 + $0x8] sm:$0xff] %vm2937_vm4, %v2892_v56  ;;  %v2095_v54 = vmul.f32 %v7859_v43, %v1870_v18  ;;  %v5266_v13 = vpop.eup %5265  ;;  %v2657_v2 = vmul.f32 %v5256_v50, %v2641_v57  ;;  %v1856_v4 = vsub.f32 2.0, %v1840_v22  ;;  %v2627_v10 = vmul.f32 %v5264_v40, %v7219_v5  ;;  %v7864_v57 = vld [vmem:[#allocation25_spill] sm:$0xff] }
 0x8b6   : > { %1394 = vst.msk [vmem:[#allocation2 + $0x70] sm:$0xff] %vm801_vm1, %v1378_v8  ;;  %v5268_v45 = vpop.eup %5267  ;;  %v1869_v35 = vmul.f32 %v5258_v61, %v1853_v60  ;;  %v2863_v42 = vmul.f32 %v6988_v39, %v2654_v11  ;;  %v2640_v44 = vsub.f32 2.0, %v2624_v27  ;;  %v1839_v1 = vmul.f32 %v5266_v13, %v7235_v47  ;;  %v7865_v11 = vld [vmem:[#allocation44_spill] sm:$0xff] }
 0x8b7   : > { %v5270_v28 = vpop.eup %5269  ;;  %v1872_v49 = vmul.f32 %v5260_v46, %v1856_v4  ;;  %v2643_v33 = vsub.f32 2.0, %v2627_v10  ;;  %v1842_v5 = vmul.f32 %v5268_v45, %v7226_v15  ;;  %v2866_v0 = vmul.f32 %v6990_v29, %v2657_v2 }
 0x8b8   : > { %v2125_v19 = vpop.permute.xlu1 %2124  ;;  %v5272_v55 = vpop.eup %5271  ;;  %v2094_v51 = vmul.f32 %v7860_v3, %v1869_v35  ;;  %v2656_v39 = vmul.f32 %v5262_v58, %v2640_v44  ;;  %v1855_v47 = vsub.f32 2.0, %v1839_v1  ;;  %v2626_v17 = vmul.f32 %v5270_v28, %v7241_v41  ;;  %v7867_v35 = vld [vmem:[#allocation36_spill] sm:$0xff] }
 0x8b9   : > { %2170 = vst.msk [vmem:[#allocation2 + $0x18] sm:$0xff] %vm2166_vm3, %v2125_v19  ;;  %v5274_v32 = vpop.eup %5273  ;;  %v2097_v26 = vmul.f32 %v7861_v48, %v1872_v49  ;;  %v2659_v31 = vmul.f32 %v5264_v40, %v2643_v33  ;;  %v1858_v15 = vsub.f32 2.0, %v1842_v5  ;;  %v2629_v29 = vmul.f32 %v5272_v55, %v7231_v12  ;;  %v7869_v49 = vld [vmem:[#allocation46_spill] sm:$0xff]  ;;  %v3747_v5 = vld [vmem:[%s7574_s4 + $0x30] sm:$0xff] }
 0x8ba   : > { %v5276_v14 = vpop.eup %5275  ;;  %v2865_v34 = vmul.f32 %v6992_v24, %v2656_v39  ;;  %v1871_v50 = vmul.f32 %v5266_v13, %v1855_v47  ;;  %v2642_v56 = vsub.f32 2.0, %v2626_v17  ;;  %v1841_v41 = vmul.f32 %v5274_v32, %v7247_v21  ;;  %v7862_v24 = vld [vmem:[#allocation34_spill] sm:$0xff]  ;;  %v7871_v47 = vld [vmem:[#allocation63_spill] sm:$0xff] }
 0x8bb   : > { %v5278_v30 = vpop.eup %5277  ;;  %v2868_v8 = vmul.f32 %v6994_v63, %v2659_v31  ;;  %v1874_v61 = vmul.f32 %v5268_v45, %v1858_v15  ;;  %v2645_v38 = vsub.f32 2.0, %v2629_v29  ;;  %v1844_v12 = vmul.f32 %v5276_v14, %v7237_v16  ;;  %v7863_v63 = vld [vmem:[#allocation24_spill] sm:$0xff] }
 0x8bc   : > { %2903 = vrot.lane.b32.xlu1 %v2864_v52, %s5345_s25  ;;  %v5280_v23 = vpop.eup %5279  ;;  %v2096_v7 = vmul.f32 %v7862_v24, %v1871_v50  ;;  %v2658_v46 = vmul.f32 %v5270_v28, %v2642_v56  ;;  %v1857_v9 = vsub.f32 2.0, %v1841_v41  ;;  %v2628_v21 = vmul.f32 %v5278_v30, %v7251_v6  ;;  %v3745_v50 = vld [vmem:[%s7574_s4 + $0x20] sm:$0xff] }
 0x8bd   : > { %v5282_v19 = vpop.eup %5281  ;;  %v2099_v18 = vmul.f32 %v7863_v63, %v1874_v61  ;;  %v2661_v59 = vmul.f32 %v5272_v55, %v2645_v38  ;;  %v1860_v58 = vsub.f32 2.0, %v1844_v12  ;;  %v2631_v16 = vmul.f32 %v5280_v23, %v7243_v53  ;;  %v7866_v53 = vld [vmem:[#allocation42_spill] sm:$0xff]  ;;  %v7870_v55 = vld [vmem:[#allocation37_spill] sm:$0xff] }
 0x8be   : > { %v2867_v22 = vmul.f32 %v7864_v57, %v2658_v46  ;;  %v1873_v52 = vmul.f32 %v5274_v32, %v1857_v9  ;;  %v2644_v40 = vsub.f32 2.0, %v2628_v21  ;;  %v1843_v60 = vmul.f32 %v5282_v19, %v7255_v25  ;;  %v5284_v6 = vpop.eup %5283  ;;  %v7868_v25 = vld [vmem:[#allocation26_spill] sm:$0xff]  ;;  %v3743_v61 = vld [vmem:[%s7574_s4 + $0x10] sm:$0xff]  ;;  %v3742_v46 = vld [vmem:[%s7574_s4 + $0x8] sm:$0xff] }
 0x8bf   : > { %v2870_v27 = vmul.f32 %v7865_v11, %v2661_v59  ;;  %v1876_v43 = vmul.f32 %v5276_v14, %v1860_v58  ;;  %v2630_v10 = vmul.f32 %v5284_v6, %v7257_v62  ;;  %v3748_v62 = vld [vmem:[%s7574_s4 + $0x38] sm:$0xff]  ;;  %v3741_v9 = vld [vmem:[%s7574_s4] sm:$0xff] }
 0x8c0   : > { %2136 = vrot.lane.b32.xlu1 %v2095_v54, %s5348_s28  ;;  %v2896_v36 = vpop.permute.xlu1 %2895  ;;  %v2647_v54 = vsub.f32 2.0, %v2631_v16  ;;  %v2098_v13 = vmul.f32 %v7866_v53, %v1873_v52  ;;  %v2660_v2 = vmul.f32 %v5278_v30, %v2644_v40  ;;  %v1859_v4 = vsub.f32 2.0, %v1843_v60  ;;  %4940 = vmatprep.subr.mxu0 %v3748_v62 }
 0x8c1   : > { %2941 = vst.msk [vmem:[#allocation2 + $0x18] sm:$0xff] %vm2937_vm4, %v2896_v36  ;;  %v2101_v36 = vmul.f32 %v7867_v35, %v1876_v43  ;;  %v2646_v28 = vsub.f32 2.0, %v2630_v10  ;;  %4941 = vmatpush3.msra.mxu0 %v3748_v62 }
 0x8c2   : > { %v2869_v44 = vmul.f32 %v7868_v25, %v2660_v2  ;;  %v1875_v1 = vmul.f32 %v5282_v19, %v1859_v4  ;;  %4942 = vmatprep.subr.mxu0 %v3747_v5 }
 0x8c3   : > { %2901 = vrot.lane.b32.xlu0 %v2863_v42, %s5345_s25  ;;  %v2663_v42 = vmul.f32 %v5280_v23, %v2647_v54  ;;  %4943 = vmatpush3.msra.mxu0 %v3747_v5 }
 0x8c4   : > { %2907 = vrot.lane.b32.xlu1 %v2866_v0, %s5345_s25  ;;  %v2100_v3 = vmul.f32 %v7870_v55, %v1875_v1 }
 0x8c5   : > { %v2872_v33 = vmul.f32 %v7869_v49, %v2663_v42 }
 0x8c7   : > { %2134 = vrot.lane.b32.xlu0 %v2094_v51, %s5348_s28  ;;  %v2662_v51 = vmul.f32 %v5284_v6, %v2646_v28 }
 0x8c8   : > { %2140 = vrot.lane.b32.xlu1 %v2097_v26, %s5348_s28  ;;  %v2129_v20 = vpop.permute.xlu1 %2128 }
 0x8c9   : > { %2172 = vst.msk [vmem:[#allocation2 + $0x28] sm:$0xff] %vm2166_vm3, %v2129_v20  ;;  %v2871_v17 = vmul.f32 %v7871_v47, %v2662_v51 }
 0x8cb   : > { %2905 = vrot.lane.b32.xlu0 %v2865_v34, %s5345_s25  ;;  %v3746_v34 = vld [vmem:[%s7574_s4 + $0x28] sm:$0xff] }
 0x8cc   : > { %2911 = vrot.lane.b32.xlu1 %v2868_v8, %s5345_s25  ;;  %v2900_v37 = vpop.permute.xlu1 %2899  ;;  %4944 = vmatprep.subr.mxu0 %v3746_v34  ;;  %v3744_v8 = vld [vmem:[%s7574_s4 + $0x18] sm:$0xff] }
 0x8cd   : > { %2943 = vst.msk [vmem:[#allocation2 + $0x28] sm:$0xff] %vm2937_vm4, %v2900_v37  ;;  %4945 = vmatpush3.msra.mxu0 %v3746_v34 }
 0x8ce   : > { %4946 = vmatprep.subr.mxu0 %v3745_v50 }
 0x8cf   : > { %2138 = vrot.lane.b32.xlu0 %v2096_v7, %s5348_s28  ;;  %4947 = vmatpush3.msra.mxu0 %v3745_v50 }
 0x8d0   : > { %2144 = vrot.lane.b32.xlu1 %v2099_v18, %s5348_s28  ;;  %4948 = vmatprep.subr.mxu0 %v3744_v8 }
 0x8d1   : > { %4949 = vmatpush3.msra.mxu0 %v3744_v8 }
 0x8d2   : > { %4950 = vmatprep.subr.mxu0 %v3743_v61 }
 0x8d3   : > { %2909 = vrot.lane.b32.xlu0 %v2867_v22, %s5345_s25  ;;  %4951 = vmatpush3.msra.mxu0 %v3743_v61 }
 0x8d4   : > { %2915 = vrot.lane.b32.xlu1 %v2870_v27, %s5345_s25  ;;  %4952 = vmatprep.subr.mxu0 %v3742_v46 }
 0x8d5   : > { %v2133_v45 = vpop.permute.xlu1 %2132  ;;  %4953 = vmatpush3.msra.mxu0 %v3742_v46 }
 0x8d6   : > { %2174 = vst.msk [vmem:[#allocation2 + $0x38] sm:$0xff] %vm2166_vm3, %v2133_v45  ;;  %4954 = vmatprep.subr.mxu0 %v3741_v9 }
 0x8d7   : > { %2142 = vrot.lane.b32.xlu0 %v2098_v13, %s5348_s28  ;;  %4955 = vmatpush3.msra.mxu0 %v3741_v9 }
 0x8d8   : > { %2148 = vrot.lane.b32.xlu1 %v2101_v36, %s5348_s28 }
 0x8db   : > { %2913 = vrot.lane.b32.xlu0 %v2869_v44, %s5345_s25 }
 0x8dc   : > { %v2123_v0 = vpop.permute.xlu0 %2122  ;;  %2919 = vrot.lane.b32.xlu1 %v2872_v33, %s5345_s25 }
 0x8dd   : > { %2169 = vst.msk [vmem:[#allocation2 + $0x10] sm:$0xff] %vm2166_vm3, %v2123_v0 }
 0x8df   : > { %2146 = vrot.lane.b32.xlu0 %v2100_v3, %s5348_s28 }
 0x8e0   : > { %v2894_v39 = vpop.permute.xlu0 %2893 }
 0x8e1   : > { %2940 = vst.msk [vmem:[#allocation2 + $0x10] sm:$0xff] %vm2937_vm4, %v2894_v39 }
 0x8e3   : > { %2917 = vrot.lane.b32.xlu0 %v2871_v17, %s5345_s25 }
 0x8e4   : > { %v2127_v32 = vpop.permute.xlu0 %2126 }
 0x8e5   : > { %2171 = vst.msk [vmem:[#allocation2 + $0x20] sm:$0xff] %vm2166_vm3, %v2127_v32  ;;  %v4918_v29 = vpop.f32.mrf.mxu0 }
 0x8e7   : > { %v3549_v20 = vpop.f32.mrf.mxu0 }
 0x8e8   : > { %v2898_v48 = vpop.permute.xlu0 %2897 }
 0x8e9   : > { %2942 = vst.msk [vmem:[#allocation2 + $0x20] sm:$0xff] %vm2937_vm4, %v2898_v48  ;;  %v4921_v30 = vpop.f32.mrf.mxu0 }
 0x8eb   : > { %v3559_v24 = vpop.f32.mrf.mxu0 }
 0x8ec   : > { %v2131_v26 = vpop.permute.xlu0 %2130 }
 0x8ed   : > { %2173 = vst.msk [vmem:[#allocation2 + $0x30] sm:$0xff] %vm2166_vm3, %v2131_v26  ;;  %v4924_v16 = vpop.f32.mrf.mxu0 }
 0x8ef   : > { %v3569_v27 = vpop.f32.mrf.mxu0 }
 0x8f1   : > { %v4927_v45 = vpop.f32.mrf.mxu0 }
 0x8f3   : > { %v3579_v62 = vpop.f32.mrf.mxu0 }
 0x910   : > { %v3342_v31 = vpop.xlane.xlu1 %3341 }
 0x911   : > { %5285 = vrcp.f32 %v3342_v31 }
 0x914   : > { %v3340_v15 = vpop.xlane.xlu1 %3339 }
 0x915   : > { %5287 = vrcp.f32 %v3340_v15 }
 0x918   : > { %v3346_v14 = vpop.xlane.xlu1 %3345 }
 0x919   : > { %5289 = vrcp.f32 %v3346_v14 }
 0x91c   : > { %v3344_v56 = vpop.xlane.xlu1 %3343 }
 0x91d   : > { %5291 = vrcp.f32 %v3344_v56 }
 0x91e   : > { %v5286_v41 = vpop.eup %5285 }
 0x91f   : > { %v3388_v38 = vmul.f32 %v5286_v41, %v3342_v31  ;;  %v4930_v31 = vpop.f32.mrf.mxu0 }
 0x920   : > { %v3350_v12 = vpop.xlane.xlu1 %3349 }
 0x921   : > { %v3404_v23 = vsub.f32 2.0, %v3388_v38  ;;  %5293 = vrcp.f32 %v3350_v12 }
 0x922   : > { %v5288_v37 = vpop.eup %5287  ;;  %v3348_v7 = vpop.xlane.xlu0 %3347 }
 0x923   : > { %v3420_v21 = vmul.f32 %v5286_v41, %v3404_v23  ;;  %v3387_v19 = vmul.f32 %v5288_v37, %v3340_v15  ;;  %5295 = vrcp.f32 %v3348_v7 }
 0x924   : > { %v3354_v63 = vpop.xlane.xlu1 %3353 }
 0x925   : > { %v3629_v18 = vmul.f32 %v4918_v29, %v3420_v21  ;;  %v3403_v59 = vsub.f32 2.0, %v3387_v19  ;;  %5297 = vrcp.f32 %v3354_v63 }
 0x926   : > { %v5290_v58 = vpop.eup %5289  ;;  %v3352_v57 = vpop.xlane.xlu0 %3351 }
 0x927   : > { %v3419_v22 = vmul.f32 %v5288_v37, %v3403_v59  ;;  %v3390_v52 = vmul.f32 %v5290_v58, %v3346_v14  ;;  %5299 = vrcp.f32 %v3352_v57  ;;  %3662 = vrot.lane.b32.xlu1 %v3629_v18, %s5343_s20 }
 0x928   : > { %v3358_v40 = vpop.xlane.xlu1 %3357 }
 0x929   : > { %v3628_v60 = vmul.f32 %v3549_v20, %v3419_v22  ;;  %v3406_v6 = vsub.f32 2.0, %v3390_v52  ;;  %5301 = vrcp.f32 %v3358_v40 }
 0x92a   : > { %v5292_v11 = vpop.eup %5291  ;;  %v3356_v43 = vpop.xlane.xlu0 %3355 }
 0x92b   : > { %v3422_v54 = vmul.f32 %v5290_v58, %v3406_v6  ;;  %v3389_v53 = vmul.f32 %v5292_v11, %v3344_v56  ;;  %5303 = vrcp.f32 %v3356_v43  ;;  %3660 = vrot.lane.b32.xlu0 %v3628_v60, %s5343_s20 }
 0x92c   : > { %v3362_v13 = vpop.xlane.xlu1 %3361 }
 0x92d   : > { %v3631_v2 = vmul.f32 %v4921_v30, %v3422_v54  ;;  %v3405_v4 = vsub.f32 2.0, %v3389_v53  ;;  %5305 = vrcp.f32 %v3362_v13 }
 0x92e   : > { %v5294_v10 = vpop.eup %5293  ;;  %v3360_v35 = vpop.xlane.xlu0 %3359 }
 0x92f   : > { %v3421_v36 = vmul.f32 %v5292_v11, %v3405_v4  ;;  %v3392_v42 = vmul.f32 %v5294_v10, %v3350_v12  ;;  %5307 = vrcp.f32 %v3360_v35  ;;  %3666 = vrot.lane.b32.xlu1 %v3631_v2, %s5343_s20  ;;  %v3589_v12 = vpop.f32.mrf.mxu0 }
 0x930   : > { %v5296_v25 = vpop.eup %5295  ;;  %v3366_v44 = vpop.xlane.xlu1 %3365 }
 0x931   : > { %v3630_v1 = vmul.f32 %v3559_v24, %v3421_v36  ;;  %v3408_v28 = vsub.f32 2.0, %v3392_v42  ;;  %v3391_v49 = vmul.f32 %v5296_v25, %v3348_v7  ;;  %5309 = vrcp.f32 %v3366_v44 }
 0x932   : > { %v5298_v33 = vpop.eup %5297  ;;  %v3364_v5 = vpop.xlane.xlu0 %3363 }
 0x933   : > { %v3424_v0 = vmul.f32 %v5294_v10, %v3408_v28  ;;  %v3407_v55 = vsub.f32 2.0, %v3391_v49  ;;  %v3394_v3 = vmul.f32 %v5298_v33, %v3354_v63  ;;  %5311 = vrcp.f32 %v3364_v5  ;;  %3664 = vrot.lane.b32.xlu0 %v3630_v1, %s5343_s20 }
 0x934   : > { %v5300_v51 = vpop.eup %5299  ;;  %v7421_v39 = vpop.xlane.xlu1 %3369 }
 0x935   : > { %v3633_v47 = vmul.f32 %v4924_v16, %v3424_v0  ;;  %v3423_v17 = vmul.f32 %v5296_v25, %v3407_v55  ;;  %v3410_v32 = vsub.f32 2.0, %v3394_v3  ;;  %v3393_v48 = vmul.f32 %v5300_v51, %v3352_v57  ;;  %v4933_v16 = vpop.f32.mrf.mxu0 }
 0x936   : > { %v5302_v26 = vpop.eup %5301  ;;  %5313 = vrcp.f32 %v7421_v39  ;;  %v7424_v15 = vpop.xlane.xlu0 %3367 }
 0x937   : > { %v3632_v29 = vmul.f32 %v3569_v27, %v3423_v17  ;;  %v3426_v14 = vmul.f32 %v5298_v33, %v3410_v32  ;;  %v3409_v20 = vsub.f32 2.0, %v3393_v48  ;;  %v3396_v34 = vmul.f32 %v5302_v26, %v3358_v40  ;;  %3670 = vrot.lane.b32.xlu1 %v3633_v47, %s5343_s20  ;;  %v4936_v27 = vpop.f32.mrf.mxu1  ;;  %v3599_v2 = vpop.f32.mrf.mxu0 }
 0x938   : > { %v5304_v50 = vpop.eup %5303  ;;  %5315 = vrcp.f32 %v7424_v15  ;;  %v2904_v56 = vpop.permute.xlu1 %2903 }
 0x939   : > { %v3635_v41 = vmul.f32 %v4927_v45, %v3426_v14  ;;  %v3425_v30 = vmul.f32 %v5300_v51, %v3409_v20  ;;  %v3412_v8 = vsub.f32 2.0, %v3396_v34  ;;  %v3395_v61 = vmul.f32 %v5304_v50, %v3356_v43  ;;  %2945 = vst.msk [vmem:[#allocation2 + $0x38] sm:$0xff] %vm2937_vm4, %v2904_v56  ;;  %3668 = vrot.lane.b32.xlu0 %v3632_v29, %s5343_s20  ;;  %v3609_v1 = vpop.f32.mrf.mxu1 }
 0x93a   : > { %v5306_v38 = vpop.eup %5305  ;;  %v2902_v23 = vpop.permute.xlu0 %2901 }
 0x93b   : > { %v3634_v37 = vmul.f32 %v3579_v62, %v3425_v30  ;;  %v3428_v24 = vmul.f32 %v5302_v26, %v3412_v8  ;;  %v3411_v7 = vsub.f32 2.0, %v3395_v61  ;;  %v3398_v46 = vmul.f32 %v5306_v38, %v3362_v13  ;;  %2944 = vst.msk [vmem:[#allocation2 + $0x30] sm:$0xff] %vm2937_vm4, %v2902_v23  ;;  %3674 = vrot.lane.b32.xlu1 %v3635_v41, %s5343_s20  ;;  %v4939_v0 = vpop.f32.mrf.mxu1 }
 0x93c   : > { %v5308_v9 = vpop.eup %5307  ;;  %v2137_v21 = vpop.permute.xlu1 %2136 }
 0x93d   : > { %v3637_v19 = vmul.f32 %v4930_v31, %v3428_v24  ;;  %v3427_v63 = vmul.f32 %v5304_v50, %v3411_v7  ;;  %v3414_v18 = vsub.f32 2.0, %v3398_v46  ;;  %v3397_v59 = vmul.f32 %v5308_v9, %v3360_v35  ;;  %2176 = vst.msk [vmem:[#allocation2 + $0x48] sm:$0xff] %vm2166_vm3, %v2137_v21  ;;  %3672 = vrot.lane.b32.xlu0 %v3634_v37, %s5343_s20  ;;  %v3619_v48 = vpop.f32.mrf.mxu1 }
 0x93e   : > { %v5310_v58 = vpop.eup %5309  ;;  %v2135_v57 = vpop.permute.xlu0 %2134 }
 0x93f   : > { %v3636_v22 = vmul.f32 %v3589_v12, %v3427_v63  ;;  %v3430_v52 = vmul.f32 %v5306_v38, %v3414_v18  ;;  %v3413_v40 = vsub.f32 2.0, %v3397_v59  ;;  %v3400_v60 = vmul.f32 %v5310_v58, %v3366_v44  ;;  %2175 = vst.msk [vmem:[#allocation2 + $0x40] sm:$0xff] %vm2166_vm3, %v2135_v57  ;;  %3678 = vrot.lane.b32.xlu1 %v3637_v19, %s5343_s20 }
 0x940   : > { %v5312_v6 = vpop.eup %5311  ;;  %v2908_v11 = vpop.permute.xlu1 %2907 }
 0x941   : > { %v3639_v43 = vmul.f32 %v4933_v16, %v3430_v52  ;;  %v3429_v54 = vmul.f32 %v5308_v9, %v3413_v40  ;;  %v3416_v53 = vsub.f32 2.0, %v3400_v60  ;;  %v3399_v13 = vmul.f32 %v5312_v6, %v3364_v5  ;;  %2947 = vst.msk [vmem:[#allocation2 + $0x48] sm:$0xff] %vm2937_vm4, %v2908_v11  ;;  %3676 = vrot.lane.b32.xlu0 %v3636_v22, %s5343_s20 }
 0x942   : > { %v2906_v4 = vpop.permute.xlu0 %2905 }
 0x943   : > { %v5314_v10 = vpop.eup %5313  ;;  %v3638_v45 = vmul.f32 %v3599_v2, %v3429_v54  ;;  %v3432_v35 = vmul.f32 %v5310_v58, %v3416_v53  ;;  %v3415_v36 = vsub.f32 2.0, %v3399_v13  ;;  %2946 = vst.msk [vmem:[#allocation2 + $0x40] sm:$0xff] %vm2937_vm4, %v2906_v4  ;;  %3682 = vrot.lane.b32.xlu1 %v3639_v43, %s5343_s20  ;;  %v7494_v4 = vld [vmem:[%s7575_s5] ss:$0 sm:$0xff] }
 0x944   : > { %v3402_v42 = vmul.f32 %v5314_v10, %v7421_v39  ;;  %v2141_v25 = vpop.permute.xlu1 %2140 }
 0x945   : > { %v5316_v44 = vpop.eup %5315  ;;  %v3641_v28 = vmul.f32 %v4936_v27, %v3432_v35  ;;  %v3431_v49 = vmul.f32 %v5312_v6, %v3415_v36  ;;  %2178 = vst.msk [vmem:[#allocation2 + $0x58] sm:$0xff] %vm2166_vm3, %v2141_v25  ;;  %3680 = vrot.lane.b32.xlu0 %v3638_v45, %s5343_s20  ;;  %v5317_v36 = vld [vmem:[%s5401_s26 + $0x8] sm:$0xff] }
 0x946   : > { %v3418_v33 = vsub.f32 2.0, %v3402_v42  ;;  %v3401_v62 = vmul.f32 %v5316_v44, %v7424_v15  ;;  %v2139_v5 = vpop.permute.xlu0 %2138 }
 0x947   : > { %v3640_v55 = vmul.f32 %v3609_v1, %v3431_v49  ;;  %2177 = vst.msk [vmem:[#allocation2 + $0x50] sm:$0xff] %vm2166_vm3, %v2139_v5  ;;  %3686 = vrot.lane.b32.xlu1 %v3641_v28, %s5343_s20 }
 0x948   : > { %v3434_v3 = vmul.f32 %v5314_v10, %v3418_v33  ;;  %v3417_v51 = vsub.f32 2.0, %v3401_v62  ;;  %v2912_v39 = vpop.permute.xlu1 %2911  ;;  %v5319_v62 = vld [vmem:[%s5401_s26 + $0x18] sm:$0xff] }
 0x949   : > { %2949 = vst.msk [vmem:[#allocation2 + $0x58] sm:$0xff] %vm2937_vm4, %v2912_v39  ;;  %3684 = vrot.lane.b32.xlu0 %v3640_v55, %s5343_s20  ;;  %v5320_v55 = vld [vmem:[%s5401_s26 + $0x10] sm:$0xff] }
 0x94a   : > { %v3643_v47 = vmul.f32 %v4939_v0, %v3434_v3  ;;  %v3433_v17 = vmul.f32 %v5316_v44, %v3417_v51  ;;  %v2910_v32 = vpop.permute.xlu0 %2909  ;;  %v5318_v44 = vld [vmem:[%s5401_s26] sm:$0xff] }
 0x94b   : > { %2948 = vst.msk [vmem:[#allocation2 + $0x50] sm:$0xff] %vm2937_vm4, %v2910_v32 }
 0x94c   : > { %v3642_v26 = vmul.f32 %v3619_v48, %v3433_v17  ;;  %3690 = vrot.lane.b32.xlu1 %v3643_v47, %s5343_s20  ;;  %v2145_v31 = vpop.permute.xlu1 %2144  ;;  %v5321_v17 = vld [vmem:[%s5401_s26 + $0x28] sm:$0xff] }
 0x94d   : > { %2180 = vst.msk [vmem:[#allocation2 + $0x68] sm:$0xff] %vm2166_vm3, %v2145_v31  ;;  %v5322_v31 = vld [vmem:[%s5401_s26 + $0x20] sm:$0xff] }
 0x94e   : > { %3688 = vrot.lane.b32.xlu0 %v3642_v26, %s5343_s20  ;;  %v2143_v15 = vpop.permute.xlu0 %2142 }
 0x94f   : > { %2179 = vst.msk [vmem:[#allocation2 + $0x60] sm:$0xff] %vm2166_vm3, %v2143_v15 }
 0x950   : > { %v2916_v29 = vpop.permute.xlu1 %2915 }
 0x951   : > { %2951 = vst.msk [vmem:[#allocation2 + $0x68] sm:$0xff] %vm2937_vm4, %v2916_v29 }
 0x952   : > { %v2914_v14 = vpop.permute.xlu0 %2913 }
 0x953   : > { %2950 = vst.msk [vmem:[#allocation2 + $0x60] sm:$0xff] %vm2937_vm4, %v2914_v14 }
 0x954   : > { %v2149_v20 = vpop.permute.xlu1 %2148 }
 0x955   : > { %2182 = vst.msk [vmem:[#allocation2 + $0x78] sm:$0xff] %vm2166_vm3, %v2149_v20  ;;  %v5323_v20 = vld [vmem:[%s5401_s26 + $0x38] sm:$0xff] }
 0x956   : > { %v2147_v34 = vpop.permute.xlu0 %2146 }
 0x957   : > { %2181 = vst.msk [vmem:[#allocation2 + $0x70] sm:$0xff] %vm2166_vm3, %v2147_v34 }
 0x958   : > { %v2920_v50 = vpop.permute.xlu1 %2919 }
 0x959   : > { %2953 = vst.msk [vmem:[#allocation2 + $0x78] sm:$0xff] %vm2937_vm4, %v2920_v50 }
 0x95a   : > { %v2918_v56 = vpop.permute.xlu0 %2917 }
 0x95b   : > { %2952 = vst.msk [vmem:[#allocation2 + $0x70] sm:$0xff] %vm2937_vm4, %v2918_v56 }
 0x999   : > { %v3663_v41 = vpop.permute.xlu1 %3662 }
 0x99a   : > { %3710 = vst.msk [vmem:[#allocation2 + $0x8] sm:$0xff] %vm3708_vm5, %v3663_v41  ;;  %v5324_v41 = vld [vmem:[%s5401_s26 + $0x30] sm:$0xff] }
 0x99d   : > { %v3661_v30 = vpop.permute.xlu0 %3660 }
 0x99e   : > { %3709 = vst.msk [vmem:[#allocation2] sm:$0xff] %vm3708_vm5, %v3661_v30 }
 0x9a1   : > { %v3667_v8 = vpop.permute.xlu1 %3666  ;;  %v3726_v12 = vld [vmem:[#allocation2 + $0x8] sm:$0xff] }
 0x9a2   : > { %3712 = vst.msk [vmem:[#allocation2 + $0x18] sm:$0xff] %vm3708_vm5, %v3667_v8 }
 0x9a5   : > { %v3665_v61 = vpop.permute.xlu0 %3664  ;;  %v3725_v38 = vld [vmem:[#allocation2] sm:$0xff] }
 0x9a6   : > { %3711 = vst.msk [vmem:[#allocation2 + $0x10] sm:$0xff] %vm3708_vm5, %v3665_v61  ;;  %4956 = vmatprep.mubr.msk.f32.mxu0 %vm270_vm0, %v3725_v38  ;;  %v5325_v38 = vld [vmem:[%s5401_s26 + $0x48] sm:$0xff] }
 0x9a7   : > { %4957 = vmatmul.mubr.msk.f32.vlgmr.msra.gmra.mxu0 %vm270_vm0, %v3726_v12 }
 0x9a9   : > { %v3671_v23 = vpop.permute.xlu1 %3670  ;;  %v3728_v46 = vld [vmem:[#allocation2 + $0x18] sm:$0xff] }
 0x9aa   : > { %3714 = vst.msk [vmem:[#allocation2 + $0x28] sm:$0xff] %vm3708_vm5, %v3671_v23 }
 0x9ab   : > { %v3669_v37 = vpop.permute.xlu0 %3668 }
 0x9ac   : > { %3713 = vst.msk [vmem:[#allocation2 + $0x20] sm:$0xff] %vm3708_vm5, %v3669_v37 }
 0x9ad   : > { %v3675_v24 = vpop.permute.xlu1 %3674  ;;  %v3727_v7 = vld [vmem:[#allocation2 + $0x10] sm:$0xff] }
 0x9ae   : > { %3716 = vst.msk [vmem:[#allocation2 + $0x38] sm:$0xff] %vm3708_vm5, %v3675_v24  ;;  %4959 = vmatprep.mubr.msk.f32.mxu0 %vm270_vm0, %v3727_v7  ;;  %v5326_v24 = vld [vmem:[%s5401_s26 + $0x40] sm:$0xff] }
 0x9af   : > { %v3673_v9 = vpop.permute.xlu0 %3672  ;;  %4960 = vmatmul.mubr.msk.f32.gmra.mxu0 %vm270_vm0, %v3728_v46 }
 0x9b0   : > { %3715 = vst.msk [vmem:[#allocation2 + $0x30] sm:$0xff] %vm3708_vm5, %v3673_v9 }
 0x9b1   : > { %v3679_v21 = vpop.permute.xlu1 %3678  ;;  %v3730_v18 = vld [vmem:[#allocation2 + $0x28] sm:$0xff] }
 0x9b2   : > { %3718 = vst.msk [vmem:[#allocation2 + $0x48] sm:$0xff] %vm3708_vm5, %v3679_v21  ;;  %v5327_v21 = vld [vmem:[%s5401_s26 + $0x58] sm:$0xff] }
 0x9b3   : > { %v3677_v19 = vpop.permute.xlu0 %3676  ;;  %v3729_v63 = vld [vmem:[#allocation2 + $0x20] sm:$0xff] }
 0x9b4   : > { %3717 = vst.msk [vmem:[#allocation2 + $0x40] sm:$0xff] %vm3708_vm5, %v3677_v19  ;;  %4962 = vmatprep.mubr.msk.f32.mxu0 %vm270_vm0, %v3729_v63 }
 0x9b5   : > { %4963 = vmatmul.mubr.msk.f32.gmra.mxu0 %vm270_vm0, %v3730_v18  ;;  %v3683_v59 = vpop.permute.xlu1 %3682  ;;  %v3732_v57 = vld [vmem:[#allocation2 + $0x38] sm:$0xff] }
 0x9b6   : > { %3720 = vst.msk [vmem:[#allocation2 + $0x58] sm:$0xff] %vm3708_vm5, %v3683_v59  ;;  %v5328_v59 = vld [vmem:[%s5401_s26 + $0x50] sm:$0xff] }
 0x9b7   : > { %v3681_v58 = vpop.permute.xlu0 %3680  ;;  %v3731_v16 = vld [vmem:[#allocation2 + $0x30] sm:$0xff] }
 0x9b8   : > { %3719 = vst.msk [vmem:[#allocation2 + $0x50] sm:$0xff] %vm3708_vm5, %v3681_v58  ;;  %4965 = vmatprep.mubr.msk.f32.mxu0 %vm270_vm0, %v3731_v16 }
 0x9b9   : > { %4966 = vmatmul.mubr.msk.f32.gmra.mxu0 %vm270_vm0, %v3732_v57  ;;  %v3687_v22 = vpop.permute.xlu1 %3686  ;;  %v3734_v60 = vld [vmem:[#allocation2 + $0x48] sm:$0xff] }
 0x9ba   : > { %3722 = vst.msk [vmem:[#allocation2 + $0x68] sm:$0xff] %vm3708_vm5, %v3687_v22  ;;  %v5329_v22 = vld [vmem:[%s5401_s26 + $0x68] sm:$0xff] }
 0x9bb   : > { %v3685_v52 = vpop.permute.xlu0 %3684  ;;  %v3733_v40 = vld [vmem:[#allocation2 + $0x40] sm:$0xff] }
 0x9bc   : > { %3721 = vst.msk [vmem:[#allocation2 + $0x60] sm:$0xff] %vm3708_vm5, %v3685_v52  ;;  %4968 = vmatprep.mubr.msk.f32.mxu0 %vm270_vm0, %v3733_v40 }
 0x9bd   : > { %4969 = vmatmul.mubr.msk.f32.gmra.mxu0 %vm270_vm0, %v3734_v60  ;;  %v3736_v43 = vld [vmem:[#allocation2 + $0x58] sm:$0xff]  ;;  %v5330_v60 = vld [vmem:[%s5401_s26 + $0x60] sm:$0xff] }
 0x9be   : > { %v3691_v6 = vpop.permute.xlu1 %3690 }
 0x9bf   : > { %3724 = vst.msk [vmem:[#allocation2 + $0x78] sm:$0xff] %vm3708_vm5, %v3691_v6  ;;  %v3735_v11 = vld [vmem:[#allocation2 + $0x50] sm:$0xff] }
 0x9c0   : > { %v3689_v27 = vpop.permute.xlu0 %3688  ;;  %4971 = vmatprep.mubr.msk.f32.mxu0 %vm270_vm0, %v3735_v11 }
 0x9c1   : > { %3723 = vst.msk [vmem:[#allocation2 + $0x70] sm:$0xff] %vm3708_vm5, %v3689_v27  ;;  %4972 = vmatmul.mubr.msk.f32.gmra.mxu0 %vm270_vm0, %v3736_v43  ;;  %v3738_v53 = vld [vmem:[#allocation2 + $0x68] sm:$0xff] }
 0x9c3   : > { %v3737_v54 = vld [vmem:[#allocation2 + $0x60] sm:$0xff] }
 0x9c4   : > { %4974 = vmatprep.mubr.msk.f32.mxu0 %vm270_vm0, %v3737_v54  ;;  %v5331_v54 = vld [vmem:[%s5401_s26 + $0x78] sm:$0xff] }
 0x9c5   : > { %4975 = vmatmul.mubr.msk.f32.gmra.mxu0 %vm270_vm0, %v3738_v53 }
 0x9c6   : > { %v3740_v2 = vld [vmem:[#allocation2 + $0x78] sm:$0xff] }
 0x9c8   : > { %v3739_v13 = vld [vmem:[#allocation2 + $0x70] sm:$0xff] }
 0x9c9   : > { %4977 = vmatprep.mubr.msk.f32.mxu0 %vm270_vm0, %v3739_v13 }
 0x9ca   : > { %4978 = vmatmul.mubr.msk.f32.gmra.mxu0 %vm270_vm0, %v3740_v2  ;;  %v5332_v2 = vld [vmem:[%s5401_s26 + $0x70] sm:$0xff] }
 0xa67   : > { %v4958_v10 = vpop.f32.mrf.mxu0 }
 0xa68   : > { %v3876_v45 = vadd.f32 %v4958_v10, %v7494_v4 }
 0xa69   : > { %v3870_v35 = vpop.f32.mrf.mxu0 }
 0xa6a   : > { %v3950_v42 = vadd.f32 %v5317_v36, %v3876_v45  ;;  %v3871_v25 = vadd.f32 %v7494_v4, %v3870_v35 }
 0xa6c   : > { %3966 = vst.msk [vmem:[%s7502_s30 + $0x8] sm:$0xff] %vm270_vm0, %v3950_v42  ;;  %v3949_v1 = vadd.f32 %v5318_v44, %v3871_v25 }
 0xa6e   : > { %3965 = vst.msk [vmem:[%s7502_s30] sm:$0xff] %vm270_vm0, %v3949_v1 }
 0xa6f   : > { %v4961_v28 = vpop.f32.mrf.mxu0 }
 0xa70   : > { %v3886_v49 = vadd.f32 %v4961_v28, %v7494_v4 }
 0xa71   : > { %v3880_v33 = vpop.f32.mrf.mxu0 }
 0xa72   : > { %v3952_v5 = vadd.f32 %v5319_v62, %v3886_v49  ;;  %v3881_v0 = vadd.f32 %v7494_v4, %v3880_v33 }
 0xa74   : > { %3968 = vst.msk [vmem:[%s7502_s30 + $0x18] sm:$0xff] %vm270_vm0, %v3952_v5  ;;  %v3951_v3 = vadd.f32 %v5320_v55, %v3881_v0 }
 0xa75   : > { %v4964_v51 = vpop.f32.mrf.mxu0 }
 0xa76   : > { %3967 = vst.msk [vmem:[%s7502_s30 + $0x10] sm:$0xff] %vm270_vm0, %v3951_v3  ;;  %v3896_v39 = vadd.f32 %v4964_v51, %v7494_v4 }
 0xa77   : > { %v3890_v47 = vpop.f32.mrf.mxu0 }
 0xa78   : > { %v3954_v32 = vadd.f32 %v5321_v17, %v3896_v39  ;;  %v3891_v48 = vadd.f32 %v7494_v4, %v3890_v47 }
 0xa79   : > { %v4967_v26 = vpop.f32.mrf.mxu0 }
 0xa7a   : > { %3970 = vst.msk [vmem:[%s7502_s30 + $0x28] sm:$0xff] %vm270_vm0, %v3954_v32  ;;  %v3953_v15 = vadd.f32 %v5322_v31, %v3891_v48  ;;  %v3906_v29 = vadd.f32 %v4967_v26, %v7494_v4 }
 0xa7b   : > { %v3900_v14 = vpop.f32.mrf.mxu0 }
 0xa7c   : > { %3969 = vst.msk [vmem:[%s7502_s30 + $0x20] sm:$0xff] %vm270_vm0, %v3953_v15  ;;  %v3956_v34 = vadd.f32 %v5323_v20, %v3906_v29  ;;  %v3901_v50 = vadd.f32 %v7494_v4, %v3900_v14 }
 0xa7d   : > { %v4970_v56 = vpop.f32.mrf.mxu0 }
 0xa7e   : > { %3972 = vst.msk [vmem:[%s7502_s30 + $0x38] sm:$0xff] %vm270_vm0, %v3956_v34  ;;  %v3955_v30 = vadd.f32 %v5324_v41, %v3901_v50  ;;  %v3916_v8 = vadd.f32 %v4970_v56, %v7494_v4 }
 0xa7f   : > { %v3910_v61 = vpop.f32.mrf.mxu0 }
 0xa80   : > { %3971 = vst.msk [vmem:[%s7502_s30 + $0x30] sm:$0xff] %vm270_vm0, %v3955_v30  ;;  %v3958_v12 = vadd.f32 %v5325_v38, %v3916_v8  ;;  %v3911_v23 = vadd.f32 %v7494_v4, %v3910_v61 }
 0xa81   : > { %v4973_v37 = vpop.f32.mrf.mxu0 }
 0xa82   : > { %3974 = vst.msk [vmem:[%s7502_s30 + $0x48] sm:$0xff] %vm270_vm0, %v3958_v12  ;;  %v3957_v7 = vadd.f32 %v5326_v24, %v3911_v23  ;;  %v3926_v46 = vadd.f32 %v4973_v37, %v7494_v4 }
 0xa83   : > { %v3920_v9 = vpop.f32.mrf.mxu0 }
 0xa84   : > { %3973 = vst.msk [vmem:[%s7502_s30 + $0x40] sm:$0xff] %vm270_vm0, %v3957_v7  ;;  %v3960_v19 = vadd.f32 %v5327_v21, %v3926_v46  ;;  %v3921_v63 = vadd.f32 %v7494_v4, %v3920_v9 }
 0xa85   : > { %v4976_v18 = vpop.f32.mrf.mxu0 }
 0xa86   : > { %3976 = vst.msk [vmem:[%s7502_s30 + $0x58] sm:$0xff] %vm270_vm0, %v3960_v19  ;;  %v3959_v58 = vadd.f32 %v5328_v59, %v3921_v63  ;;  %v3936_v16 = vadd.f32 %v4976_v18, %v7494_v4 }
 0xa87   : > { %v3930_v57 = vpop.f32.mrf.mxu0 }
 0xa88   : > { %3975 = vst.msk [vmem:[%s7502_s30 + $0x50] sm:$0xff] %vm270_vm0, %v3959_v58  ;;  %v3962_v52 = vadd.f32 %v5329_v22, %v3936_v16  ;;  %v3931_v40 = vadd.f32 %v7494_v4, %v3930_v57 }
 0xa8a   : > { %3978 = vst.msk [vmem:[%s7502_s30 + $0x68] sm:$0xff] %vm270_vm0, %v3962_v52  ;;  %v3961_v6 = vadd.f32 %v5330_v60, %v3931_v40  ;;  %v4979_v11 = vpop.f32.mrf.mxu0 }
 0xa8b   : > { %v3946_v27 = vadd.f32 %v4979_v11, %v7494_v4 }
 0xa8c   : > { %3977 = vst.msk [vmem:[%s7502_s30 + $0x60] sm:$0xff] %vm270_vm0, %v3961_v6  ;;  %v3940_v43 = vpop.f32.mrf.mxu0 }
 0xa8d   : > { %v3964_v53 = vadd.f32 %v5331_v54, %v3946_v27  ;;  %v3941_v13 = vadd.f32 %v7494_v4, %v3940_v43 }
 0xa8f   : > { %3980 = vst.msk [vmem:[%s7502_s30 + $0x78] sm:$0xff] %vm270_vm0, %v3964_v53  ;;  %v3963_v10 = vadd.f32 %v5332_v2, %v3941_v13 }
 0xa91   : > { %3979 = vst.msk [vmem:[%s7502_s30 + $0x70] sm:$0xff] %vm270_vm0, %v3963_v10 }
 0xa92 PF: > { %s16_s21 = sadd.s32 1, %s5339_s21  }
 0xa93   : > { %p13_p4 = scmp.ge.s32.totalorder %s16_s21, 4  }
 0xa95   :  { %15 = sbr.rel (!%p13_p4) target bundleno = 1 (0x1), region = 74 }

</bundles_post_ra>
